<compile_context>
chip_gen: v6e
topology: v6e:2x2x1
jax: 0.10.0
libtpu: 0.0.40
codegen_flags: <defaults>
</compile_context>

<pallas_src>
import math

import jax
import jax.numpy as jnp
from jax.experimental import pallas as pl
from jax.experimental.pallas import tpu as pltpu

# ---- small synthetic BERT config (stands in for bert-fa-zwnj-base) ----
VOCAB = 100
HIDDEN = 32
N_LAYERS = 2
N_HEADS = 2
HEAD_DIM = HIDDEN // N_HEADS          # 16
INTERMEDIATE = 64
MAX_POS = 16
TYPE_VOCAB = 2
LN_EPS = 1e-12
H1, H2, N_CLS = 200, 50, 2            # classifier head from the PyTorch module

# ---- lane-dense padded sizes (multiples of 128 on the last axis) ----
HP  = 128                             # hidden, padded
DP  = 128                             # per-head dim, padded
QKV = N_HEADS * DP                    # 256: q/k/v projection width
IP  = 128                             # intermediate, padded
H1P = 256
H2P = 128
CP  = 128                             # padded logits width


# ----------------------------- kernel helpers ------------------------------
def _layernorm_padded(x, gamma, beta, n_real, eps=LN_EPS):
    # x has exact zeros in all padded feature columns; stats use real width.
    # Padded gamma/beta are zero, so padded output columns stay exactly zero.
    s1 = jnp.sum(x, axis=-1, keepdims=True)
    s2 = jnp.sum(x * x, axis=-1, keepdims=True)
    mu = s1 / n_real
    var = s2 / n_real - mu * mu
    return (x - mu) * jax.lax.rsqrt(var + eps) * gamma + beta


def _gelu(x):
    # TODO(synk): HF BERT uses exact erf-GELU; tanh approximation kept for
    # robust Mosaic lowering (GELU(0) == 0 so padded columns stay zero).
    c = math.sqrt(2.0 / math.pi)
    return 0.5 * x * (1.0 + jnp.tanh(c * (x + 0.044715 * x * x * x)))


# --------------------------------- kernel -----------------------------------
def bert_fused_kernel(emb_ref, mask_ref, eg_ref, eb_ref,
                      wq_ref, bq_ref, wk_ref, bk_ref, wv_ref, bv_ref,
                      wo_ref, bo_ref, g1_ref, b1_ref,
                      wi_ref, bi_ref, w2_ref, b2_ref, g2_ref, b2n_ref,
                      cw1_ref, cb1_ref, cw2_ref, cb2_ref, cw3_ref, cb3_ref,
                      o_ref):
    # One batch element per grid step: x is [S, HP], all lane dims are 128-wide.
    x = emb_ref[0]                       # [S, HP]
    mask_bias = mask_ref[0]              # [1, S] additive bias over the k axis
    scale = 1.0 / math.sqrt(HEAD_DIM)

    # Embedding LayerNorm (fused here instead of a separate launch).
    x = _layernorm_padded(x, eg_ref[...], eb_ref[...], HIDDEN)

    for l in range(N_LAYERS):
        # ---- multi-head self-attention ----
        qf = jnp.dot(x, wq_ref[l], preferred_element_type=jnp.float32) + bq_ref[l]
        kf = jnp.dot(x, wk_ref[l], preferred_element_type=jnp.float32) + bk_ref[l]
        vf = jnp.dot(x, wv_ref[l], preferred_element_type=jnp.float32) + bv_ref[l]

        ctx_parts = []
        for h in range(N_HEADS):
            sl = slice(h * DP, (h + 1) * DP)        # 128-aligned lane slice
            qh, kh, vh = qf[:, sl], kf[:, sl], vf[:, sl]
            s = jnp.einsum('qd,kd->qk', qh, kh,
                           preferred_element_type=jnp.float32) * scale + mask_bias
            s = s - jnp.max(s, axis=-1, keepdims=True)
            p = jnp.exp(s)
            p = p * pl.reciprocal(jnp.sum(p, axis=-1, keepdims=True), approx=True)
            ctx_parts.append(jnp.dot(p, vh, preferred_element_type=jnp.float32))
        ctx = jnp.concatenate(ctx_parts, axis=-1)    # [S, QKV], aligned concat

        attn = jnp.dot(ctx, wo_ref[l],
                       preferred_element_type=jnp.float32) + bo_ref[l]
        h1 = _layernorm_padded(x + attn, g1_ref[l], b1_ref[l], HIDDEN)

        # ---- feed-forward ----
        inter = _gelu(jnp.dot(h1, wi_ref[l],
                              preferred_element_type=jnp.float32) + bi_ref[l])
        ffn = jnp.dot(inter, w2_ref[l],
                      preferred_element_type=jnp.float32) + b2_ref[l]
        x = _layernorm_padded(h1 + ffn, g2_ref[l], b2n_ref[l], HIDDEN)

    # ---- CLS token -> classifier MLP (fused) ----
    cls = x[0:1, :]                                   # [1, HP]
    hcls = jnp.maximum(jnp.dot(cls, cw1_ref[...],
                               preferred_element_type=jnp.float32) + cb1_ref[...], 0.0)
    hcls = jnp.maximum(jnp.dot(hcls, cw2_ref[...],
                               preferred_element_type=jnp.float32) + cb2_ref[...], 0.0)
    logits = jnp.dot(hcls, cw3_ref[...],
                     preferred_element_type=jnp.float32) + cb3_ref[...]   # [1, CP]
    o_ref[0] = logits


# ------------------------------ parameters ----------------------------------
def init_params(key):
    keys = iter(jax.random.split(key, 64))

    def w(shape, scale=0.02):
        return jax.random.normal(next(keys), shape, jnp.float32) * scale

    zeros = lambda s: jnp.zeros(s, jnp.float32)
    ones = lambda s: jnp.ones(s, jnp.float32)

    params = {
        'word_emb': w((VOCAB, HIDDEN)),
        'pos_emb': w((MAX_POS, HIDDEN)),
        'type_emb': w((TYPE_VOCAB, HIDDEN)),
        'emb_ln_g': ones((1, HIDDEN)),
        'emb_ln_b': zeros((1, HIDDEN)),
        'layers': [],
        'c_w1': w((HIDDEN, H1)), 'c_b1': zeros((1, H1)),
        'c_w2': w((H1, H2)),     'c_b2': zeros((1, H2)),
        'c_w3': w((H2, N_CLS)),  'c_b3': zeros((1, N_CLS)),
    }
    for _ in range(N_LAYERS):
        params['layers'].append({
            'wq': w((HIDDEN, HIDDEN)), 'bq': zeros((1, HIDDEN)),
            'wk': w((HIDDEN, HIDDEN)), 'bk': zeros((1, HIDDEN)),
            'wv': w((HIDDEN, HIDDEN)), 'bv': zeros((1, HIDDEN)),
            'wo': w((HIDDEN, HIDDEN)), 'bo': zeros((1, HIDDEN)),
            'ln1_g': ones((1, HIDDEN)), 'ln1_b': zeros((1, HIDDEN)),
            'wi': w((HIDDEN, INTERMEDIATE)), 'bi': zeros((1, INTERMEDIATE)),
            'w2': w((INTERMEDIATE, HIDDEN)), 'b2': zeros((1, HIDDEN)),
            'ln2_g': ones((1, HIDDEN)), 'ln2_b': zeros((1, HIDDEN)),
        })
    return params


# ------------------- lane-dense padding / layer stacking --------------------
def _pad2(w, rows, cols):
    out = jnp.zeros((rows, cols), jnp.float32)
    return out.at[:w.shape[0], :w.shape[1]].set(w)


def _split_heads_cols(w):
    # [HIDDEN, HIDDEN] -> [HP, QKV]; head h's real HEAD_DIM columns at h*DP.
    out = jnp.zeros((HP, QKV), jnp.float32)
    for h in range(N_HEADS):
        out = out.at[:HIDDEN, h * DP:h * DP + HEAD_DIM].set(
            w[:, h * HEAD_DIM:(h + 1) * HEAD_DIM])
    return out


def _split_heads_bias(b):
    out = jnp.zeros((1, QKV), jnp.float32)
    for h in range(N_HEADS):
        out = out.at[:, h * DP:h * DP + HEAD_DIM].set(
            b[:, h * HEAD_DIM:(h + 1) * HEAD_DIM])
    return out


def _split_heads_rows(w):
    # wo [HIDDEN, HIDDEN] -> [QKV, HP]; head h's real HEAD_DIM rows at h*DP.
    out = jnp.zeros((QKV, HP), jnp.float32)
    for h in range(N_HEADS):
        out = out.at[h * DP:h * DP + HEAD_DIM, :HIDDEN].set(
            w[h * HEAD_DIM:(h + 1) * HEAD_DIM, :])
    return out


def pack_params(p):
    stack = lambda fn, name: jnp.stack([fn(l[name]) for l in p['layers']])
    return {
        'word_emb': _pad2(p['word_emb'], VOCAB, HP),
        'pos_emb': _pad2(p['pos_emb'], MAX_POS, HP),
        'type_emb': _pad2(p['type_emb'], TYPE_VOCAB, HP),
        'emb_ln_g': _pad2(p['emb_ln_g'], 1, HP),
        'emb_ln_b': _pad2(p['emb_ln_b'], 1, HP),
        'wq': stack(_split_heads_cols, 'wq'), 'bq': stack(_split_heads_bias, 'bq'),
        'wk': stack(_split_heads_cols, 'wk'), 'bk': stack(_split_heads_bias, 'bk'),
        'wv': stack(_split_heads_cols, 'wv'), 'bv': stack(_split_heads_bias, 'bv'),
        'wo': stack(_split_heads_rows, 'wo'),
        'bo': stack(lambda b: _pad2(b, 1, HP), 'bo'),
        'ln1_g': stack(lambda g: _pad2(g, 1, HP), 'ln1_g'),
        'ln1_b': stack(lambda g: _pad2(g, 1, HP), 'ln1_b'),
        'wi': stack(lambda w: _pad2(w, HP, IP), 'wi'),
        'bi': stack(lambda b: _pad2(b, 1, IP), 'bi'),
        'w2': stack(lambda w: _pad2(w, IP, HP), 'w2'),
        'b2': stack(lambda b: _pad2(b, 1, HP), 'b2'),
        'ln2_g': stack(lambda g: _pad2(g, 1, HP), 'ln2_g'),
        'ln2_b': stack(lambda g: _pad2(g, 1, HP), 'ln2_b'),
        'c_w1': _pad2(p['c_w1'], HP, H1P), 'c_b1': _pad2(p['c_b1'], 1, H1P),
        'c_w2': _pad2(p['c_w2'], H1P, H2P), 'c_b2': _pad2(p['c_b2'], 1, H2P),
        'c_w3': _pad2(p['c_w3'], H2P, CP), 'c_b3': _pad2(p['c_b3'], 1, CP),
    }


# ------------------------------- forward ------------------------------------
_WEIGHT_ORDER = ['emb_ln_g', 'emb_ln_b',
                 'wq', 'bq', 'wk', 'bk', 'wv', 'bv', 'wo', 'bo',
                 'ln1_g', 'ln1_b', 'wi', 'bi', 'w2', 'b2', 'ln2_g', 'ln2_b',
                 'c_w1', 'c_b1', 'c_w2', 'c_b2', 'c_w3', 'c_b3']


def bert_classifier_forward(packed, input_ids, attention_mask):
    B, S = input_ids.shape

    # Embedding gather + sums in plain JAX (tiny tables; gather is glue).
    # TODO(synk): could move the token-id gather in-kernel via scalar prefetch.
    # TODO(synk): token_type_ids hard-coded to type 0.
    emb = (packed['word_emb'][input_ids]
           + packed['pos_emb'][:S][None, :, :]
           + packed['type_emb'][0][None, None, :])                 # [B, S, HP]

    # HF-style extended additive attention mask.
    mask_bias = (1.0 - attention_mask.astype(jnp.float32))[:, None, :] * -10000.0

    weights = [packed[n] for n in _WEIGHT_ORDER]

    def _w_spec(arr):
        nd = arr.ndim
        return pl.BlockSpec(tuple(arr.shape), lambda b, nd=nd: (0,) * nd)

    in_specs = ([pl.BlockSpec((1, S, HP), lambda b: (b, 0, 0)),     # emb
                 pl.BlockSpec((1, 1, S), lambda b: (b, 0, 0))]      # mask bias
                + [_w_spec(w) for w in weights])

    logits_p = pl.pallas_call(
        bert_fused_kernel,
        out_shape=jax.ShapeDtypeStruct((B, 1, CP), jnp.float32),
        grid=(B,),
        in_specs=in_specs,
        out_specs=pl.BlockSpec((1, 1, CP), lambda b: (b, 0, 0)),
        compiler_params=pltpu.CompilerParams(
            dimension_semantics=("parallel",)),
    )(emb, mask_bias, *weights)

    return logits_p[:, 0, :N_CLS]


if __name__ == "__main__":
    key = jax.random.PRNGKey(0)
    pkey, ikey = jax.random.split(key)
    params = init_params(pkey)
    packed = pack_params(params)

    B, S = 2, 8
    input_ids = jax.random.randint(ikey, (B, S), 0, VOCAB, dtype=jnp.int32)
    attention_mask = jnp.ones((B, S), dtype=jnp.int32).at[1, 6:].set(0)

    logits = bert_classifier_forward(packed, input_ids, attention_mask)
    logits = jax.block_until_ready(logits)

    assert logits.shape == (B, N_CLS), logits.shape
    assert bool(jnp.all(jnp.isfinite(logits)))
    print("KERNEL_OK")
</pallas_src>

<mosaic_0001>
module attributes {stable_mosaic.version = 11 : i64} {
  func.func @bert_fused_kernel(%arg0: i32, %arg1: memref<1x8x128xf32, #tpu.memory_space<vmem>>, %arg2: memref<1x1x8xf32, #tpu.memory_space<vmem>>, %arg3: memref<1x128xf32, #tpu.memory_space<vmem>>, %arg4: memref<1x128xf32, #tpu.memory_space<vmem>>, %arg5: memref<2x128x256xf32, #tpu.memory_space<vmem>>, %arg6: memref<2x1x256xf32, #tpu.memory_space<vmem>>, %arg7: memref<2x128x256xf32, #tpu.memory_space<vmem>>, %arg8: memref<2x1x256xf32, #tpu.memory_space<vmem>>, %arg9: memref<2x128x256xf32, #tpu.memory_space<vmem>>, %arg10: memref<2x1x256xf32, #tpu.memory_space<vmem>>, %arg11: memref<2x256x128xf32, #tpu.memory_space<vmem>>, %arg12: memref<2x1x128xf32, #tpu.memory_space<vmem>>, %arg13: memref<2x1x128xf32, #tpu.memory_space<vmem>>, %arg14: memref<2x1x128xf32, #tpu.memory_space<vmem>>, %arg15: memref<2x128x128xf32, #tpu.memory_space<vmem>>, %arg16: memref<2x1x128xf32, #tpu.memory_space<vmem>>, %arg17: memref<2x128x128xf32, #tpu.memory_space<vmem>>, %arg18: memref<2x1x128xf32, #tpu.memory_space<vmem>>, %arg19: memref<2x1x128xf32, #tpu.memory_space<vmem>>, %arg20: memref<2x1x128xf32, #tpu.memory_space<vmem>>, %arg21: memref<128x256xf32, #tpu.memory_space<vmem>>, %arg22: memref<1x256xf32, #tpu.memory_space<vmem>>, %arg23: memref<256x128xf32, #tpu.memory_space<vmem>>, %arg24: memref<1x128xf32, #tpu.memory_space<vmem>>, %arg25: memref<128x128xf32, #tpu.memory_space<vmem>>, %arg26: memref<1x128xf32, #tpu.memory_space<vmem>>, %arg27: memref<1x1x128xf32, #tpu.memory_space<vmem>>) attributes {dimension_semantics = [#tpu.dimension_semantics<parallel>], iteration_bounds = array<i64: 2>, scalar_prefetch = 0 : i64, scratch_operands = 0 : i64, tpu.core_type = #tpu.core_type<tc>, window_params = [{transform_indices = @transform_0, window_bounds = array<i64: 1, 8, 128>}, {transform_indices = @transform_1, window_bounds = array<i64: 1, 1, 8>}, {pipeline_mode = #tpu.pipeline_mode<synchronous>, transform_indices = @transform_2, window_bounds = array<i64: 1, 128>}, {pipeline_mode = #tpu.pipeline_mode<synchronous>, transform_indices = @transform_3, window_bounds = array<i64: 1, 128>}, {pipeline_mode = #tpu.pipeline_mode<synchronous>, transform_indices = @transform_4, window_bounds = array<i64: 2, 128, 256>}, {pipeline_mode = #tpu.pipeline_mode<synchronous>, transform_indices = @transform_5, window_bounds = array<i64: 2, 1, 256>}, {pipeline_mode = #tpu.pipeline_mode<synchronous>, transform_indices = @transform_6, window_bounds = array<i64: 2, 128, 256>}, {pipeline_mode = #tpu.pipeline_mode<synchronous>, transform_indices = @transform_7, window_bounds = array<i64: 2, 1, 256>}, {pipeline_mode = #tpu.pipeline_mode<synchronous>, transform_indices = @transform_8, window_bounds = array<i64: 2, 128, 256>}, {pipeline_mode = #tpu.pipeline_mode<synchronous>, transform_indices = @transform_9, window_bounds = array<i64: 2, 1, 256>}, {pipeline_mode = #tpu.pipeline_mode<synchronous>, transform_indices = @transform_10, window_bounds = array<i64: 2, 256, 128>}, {pipeline_mode = #tpu.pipeline_mode<synchronous>, transform_indices = @transform_11, window_bounds = array<i64: 2, 1, 128>}, {pipeline_mode = #tpu.pipeline_mode<synchronous>, transform_indices = @transform_12, window_bounds = array<i64: 2, 1, 128>}, {pipeline_mode = #tpu.pipeline_mode<synchronous>, transform_indices = @transform_13, window_bounds = array<i64: 2, 1, 128>}, {pipeline_mode = #tpu.pipeline_mode<synchronous>, transform_indices = @transform_14, window_bounds = array<i64: 2, 128, 128>}, {pipeline_mode = #tpu.pipeline_mode<synchronous>, transform_indices = @transform_15, window_bounds = array<i64: 2, 1, 128>}, {pipeline_mode = #tpu.pipeline_mode<synchronous>, transform_indices = @transform_16, window_bounds = array<i64: 2, 128, 128>}, {pipeline_mode = #tpu.pipeline_mode<synchronous>, transform_indices = @transform_17, window_bounds = array<i64: 2, 1, 128>}, {pipeline_mode = #tpu.pipeline_mode<synchronous>, transform_indices = @transform_18, window_bounds = array<i64: 2, 1, 128>}, {pipeline_mode = #tpu.pipeline_mode<synchronous>, transform_indices = @transform_19, window_bounds = array<i64: 2, 1, 128>}, {pipeline_mode = #tpu.pipeline_mode<synchronous>, transform_indices = @transform_20, window_bounds = array<i64: 128, 256>}, {pipeline_mode = #tpu.pipeline_mode<synchronous>, transform_indices = @transform_21, window_bounds = array<i64: 1, 256>}, {pipeline_mode = #tpu.pipeline_mode<synchronous>, transform_indices = @transform_22, window_bounds = array<i64: 256, 128>}, {pipeline_mode = #tpu.pipeline_mode<synchronous>, transform_indices = @transform_23, window_bounds = array<i64: 1, 128>}, {pipeline_mode = #tpu.pipeline_mode<synchronous>, transform_indices = @transform_24, window_bounds = array<i64: 128, 128>}, {pipeline_mode = #tpu.pipeline_mode<synchronous>, transform_indices = @transform_25, window_bounds = array<i64: 1, 128>}, {transform_indices = @transform_26, window_bounds = array<i64: 1, 1, 128>}]} {
    %c0 = arith.constant 0 : index
    %c0_0 = arith.constant 0 : index
    %c0_1 = arith.constant 0 : index
    %0 = vector.load %arg1[%c0, %c0_0, %c0_1] : memref<1x8x128xf32, #tpu.memory_space<vmem>>, vector<1x8x128xf32>
    %1 = vector.shape_cast %0 : vector<1x8x128xf32> to vector<8x128xf32>
    %c0_2 = arith.constant 0 : index
    %c0_3 = arith.constant 0 : index
    %c0_4 = arith.constant 0 : index
    %2 = vector.load %arg2[%c0_2, %c0_3, %c0_4] : memref<1x1x8xf32, #tpu.memory_space<vmem>>, vector<1x1x8xf32>
    %3 = vector.shape_cast %2 : vector<1x1x8xf32> to vector<1x8xf32>
    %c0_5 = arith.constant 0 : index
    %c0_6 = arith.constant 0 : index
    %4 = vector.load %arg3[%c0_5, %c0_6] : memref<1x128xf32, #tpu.memory_space<vmem>>, vector<1x128xf32>
    %c0_7 = arith.constant 0 : index
    %c0_8 = arith.constant 0 : index
    %5 = vector.load %arg4[%c0_7, %c0_8] : memref<1x128xf32, #tpu.memory_space<vmem>>, vector<1x128xf32>
    %cst = arith.constant dense<0.000000e+00> : vector<8xf32>
    %6 = vector.multi_reduction <add>, %1, %cst [1] : vector<8x128xf32> to vector<8xf32>
    %7 = vector.shape_cast %6 : vector<8xf32> to vector<8x1xf32>
    %8 = arith.mulf %1, %1 : vector<8x128xf32>
    %cst_9 = arith.constant dense<0.000000e+00> : vector<8xf32>
    %9 = vector.multi_reduction <add>, %8, %cst_9 [1] : vector<8x128xf32> to vector<8xf32>
    %10 = vector.shape_cast %9 : vector<8xf32> to vector<8x1xf32>
    %cst_10 = arith.constant 3.200000e+01 : f32
    %11 = vector.broadcast %cst_10 : f32 to vector<8x1xf32>
    %12 = arith.divf %7, %11 : vector<8x1xf32>
    %cst_11 = arith.constant 3.200000e+01 : f32
    %13 = vector.broadcast %cst_11 : f32 to vector<8x1xf32>
    %14 = arith.divf %10, %13 : vector<8x1xf32>
    %15 = arith.mulf %12, %12 : vector<8x1xf32>
    %16 = arith.subf %14, %15 : vector<8x1xf32>
    %17 = vector.broadcast %12 : vector<8x1xf32> to vector<8x128xf32>
    %18 = arith.subf %1, %17 : vector<8x128xf32>
    %cst_12 = arith.constant 9.99999996E-13 : f32
    %19 = vector.broadcast %cst_12 : f32 to vector<8x1xf32>
    %20 = arith.addf %16, %19 : vector<8x1xf32>
    %21 = math.rsqrt %20 : vector<8x1xf32>
    %22 = vector.broadcast %21 : vector<8x1xf32> to vector<8x128xf32>
    %23 = arith.mulf %18, %22 : vector<8x128xf32>
    %24 = vector.broadcast %4 : vector<1x128xf32> to vector<8x128xf32>
    %25 = arith.mulf %23, %24 : vector<8x128xf32>
    %26 = vector.broadcast %5 : vector<1x128xf32> to vector<8x128xf32>
    %27 = arith.addf %25, %26 : vector<8x128xf32>
    %c0_13 = arith.constant 0 : index
    %c0_14 = arith.constant 0 : index
    %c0_15 = arith.constant 0 : index
    %28 = vector.load %arg5[%c0_13, %c0_14, %c0_15] : memref<2x128x256xf32, #tpu.memory_space<vmem>>, vector<1x128x256xf32>
    %29 = vector.shape_cast %28 : vector<1x128x256xf32> to vector<128x256xf32>
    %cst_16 = arith.constant dense<0.000000e+00> : vector<8x256xf32>
    %30 = tpu.matmul %27, %29, %cst_16 {dimension_numbers = #tpu.dot_dimension_numbers<[1], [0], [0], [1], [0, 0, 1, 1], [], []>} : vector<8x128xf32>, vector<128x256xf32>, vector<8x256xf32> -> vector<8x256xf32>
    %c0_17 = arith.constant 0 : index
    %c0_18 = arith.constant 0 : index
    %c0_19 = arith.constant 0 : index
    %31 = vector.load %arg6[%c0_17, %c0_18, %c0_19] : memref<2x1x256xf32, #tpu.memory_space<vmem>>, vector<1x1x256xf32>
    %32 = vector.shape_cast %31 : vector<1x1x256xf32> to vector<1x256xf32>
    %33 = vector.broadcast %32 : vector<1x256xf32> to vector<8x256xf32>
    %34 = arith.addf %30, %33 : vector<8x256xf32>
    %c0_20 = arith.constant 0 : index
    %c0_21 = arith.constant 0 : index
    %c0_22 = arith.constant 0 : index
    %35 = vector.load %arg7[%c0_20, %c0_21, %c0_22] : memref<2x128x256xf32, #tpu.memory_space<vmem>>, vector<1x128x256xf32>
    %36 = vector.shape_cast %35 : vector<1x128x256xf32> to vector<128x256xf32>
    %cst_23 = arith.constant dense<0.000000e+00> : vector<8x256xf32>
    %37 = tpu.matmul %27, %36, %cst_23 {dimension_numbers = #tpu.dot_dimension_numbers<[1], [0], [0], [1], [0, 0, 1, 1], [], []>} : vector<8x128xf32>, vector<128x256xf32>, vector<8x256xf32> -> vector<8x256xf32>
    %c0_24 = arith.constant 0 : index
    %c0_25 = arith.constant 0 : index
    %c0_26 = arith.constant 0 : index
    %38 = vector.load %arg8[%c0_24, %c0_25, %c0_26] : memref<2x1x256xf32, #tpu.memory_space<vmem>>, vector<1x1x256xf32>
    %39 = vector.shape_cast %38 : vector<1x1x256xf32> to vector<1x256xf32>
    %40 = vector.broadcast %39 : vector<1x256xf32> to vector<8x256xf32>
    %41 = arith.addf %37, %40 : vector<8x256xf32>
    %c0_27 = arith.constant 0 : index
    %c0_28 = arith.constant 0 : index
    %c0_29 = arith.constant 0 : index
    %42 = vector.load %arg9[%c0_27, %c0_28, %c0_29] : memref<2x128x256xf32, #tpu.memory_space<vmem>>, vector<1x128x256xf32>
    %43 = vector.shape_cast %42 : vector<1x128x256xf32> to vector<128x256xf32>
    %cst_30 = arith.constant dense<0.000000e+00> : vector<8x256xf32>
    %44 = tpu.matmul %27, %43, %cst_30 {dimension_numbers = #tpu.dot_dimension_numbers<[1], [0], [0], [1], [0, 0, 1, 1], [], []>} : vector<8x128xf32>, vector<128x256xf32>, vector<8x256xf32> -> vector<8x256xf32>
    %c0_31 = arith.constant 0 : index
    %c0_32 = arith.constant 0 : index
    %c0_33 = arith.constant 0 : index
    %45 = vector.load %arg10[%c0_31, %c0_32, %c0_33] : memref<2x1x256xf32, #tpu.memory_space<vmem>>, vector<1x1x256xf32>
    %46 = vector.shape_cast %45 : vector<1x1x256xf32> to vector<1x256xf32>
    %47 = vector.broadcast %46 : vector<1x256xf32> to vector<8x256xf32>
    %48 = arith.addf %44, %47 : vector<8x256xf32>
    %49 = vector.extract_strided_slice %34 {offsets = [0, 0], sizes = [8, 128], strides = [1, 1]} : vector<8x256xf32> to vector<8x128xf32>
    %50 = vector.extract_strided_slice %41 {offsets = [0, 0], sizes = [8, 128], strides = [1, 1]} : vector<8x256xf32> to vector<8x128xf32>
    %51 = vector.extract_strided_slice %48 {offsets = [0, 0], sizes = [8, 128], strides = [1, 1]} : vector<8x256xf32> to vector<8x128xf32>
    "tpu.trace_start"() <{level = 10 : i32, message = "qd,kd->qk"}> : () -> ()
    %cst_34 = arith.constant dense<0.000000e+00> : vector<8x8xf32>
    %52 = tpu.matmul %49, %50, %cst_34 {dimension_numbers = #tpu.dot_dimension_numbers<[1], [1], [0], [0], [0, 0, 1, 0], [], []>} : vector<8x128xf32>, vector<8x128xf32>, vector<8x8xf32> -> vector<8x8xf32>
    "tpu.trace_stop"() : () -> ()
    %cst_35 = arith.constant 2.500000e-01 : f32
    %53 = vector.broadcast %cst_35 : f32 to vector<8x8xf32>
    %54 = arith.mulf %52, %53 : vector<8x8xf32>
    %55 = vector.broadcast %3 : vector<1x8xf32> to vector<8x8xf32>
    %56 = arith.addf %54, %55 : vector<8x8xf32>
    %cst_36 = arith.constant dense<0xFF800000> : vector<8xf32>
    %57 = vector.multi_reduction <maximumf>, %56, %cst_36 [1] : vector<8x8xf32> to vector<8xf32>
    %58 = vector.shape_cast %57 : vector<8xf32> to vector<8x1xf32>
    %59 = vector.broadcast %58 : vector<8x1xf32> to vector<8x8xf32>
    %60 = arith.subf %56, %59 : vector<8x8xf32>
    %61 = math.exp %60 : vector<8x8xf32>
    %cst_37 = arith.constant dense<0.000000e+00> : vector<8xf32>
    %62 = vector.multi_reduction <add>, %61, %cst_37 [1] : vector<8x8xf32> to vector<8xf32>
    %63 = vector.shape_cast %62 : vector<8xf32> to vector<8x1xf32>
    %64 = tpu.reciprocal %63 {approx = true} : vector<8x1xf32> -> vector<8x1xf32>
    %65 = vector.broadcast %64 : vector<8x1xf32> to vector<8x8xf32>
    %66 = arith.mulf %61, %65 : vector<8x8xf32>
    %cst_38 = arith.constant dense<0.000000e+00> : vector<8x128xf32>
    %67 = tpu.matmul %66, %51, %cst_38 {dimension_numbers = #tpu.dot_dimension_numbers<[1], [0], [0], [1], [0, 0, 1, 1], [], []>} : vector<8x8xf32>, vector<8x128xf32>, vector<8x128xf32> -> vector<8x128xf32>
    %68 = vector.extract_strided_slice %34 {offsets = [0, 128], sizes = [8, 128], strides = [1, 1]} : vector<8x256xf32> to vector<8x128xf32>
    %69 = vector.extract_strided_slice %41 {offsets = [0, 128], sizes = [8, 128], strides = [1, 1]} : vector<8x256xf32> to vector<8x128xf32>
    %70 = vector.extract_strided_slice %48 {offsets = [0, 128], sizes = [8, 128], strides = [1, 1]} : vector<8x256xf32> to vector<8x128xf32>
    "tpu.trace_start"() <{level = 10 : i32, message = "qd,kd->qk"}> : () -> ()
    %cst_39 = arith.constant dense<0.000000e+00> : vector<8x8xf32>
    %71 = tpu.matmul %68, %69, %cst_39 {dimension_numbers = #tpu.dot_dimension_numbers<[1], [1], [0], [0], [0, 0, 1, 0], [], []>} : vector<8x128xf32>, vector<8x128xf32>, vector<8x8xf32> -> vector<8x8xf32>
    "tpu.trace_stop"() : () -> ()
    %cst_40 = arith.constant 2.500000e-01 : f32
    %72 = vector.broadcast %cst_40 : f32 to vector<8x8xf32>
    %73 = arith.mulf %71, %72 : vector<8x8xf32>
    %74 = vector.broadcast %3 : vector<1x8xf32> to vector<8x8xf32>
    %75 = arith.addf %73, %74 : vector<8x8xf32>
    %cst_41 = arith.constant dense<0xFF800000> : vector<8xf32>
    %76 = vector.multi_reduction <maximumf>, %75, %cst_41 [1] : vector<8x8xf32> to vector<8xf32>
    %77 = vector.shape_cast %76 : vector<8xf32> to vector<8x1xf32>
    %78 = vector.broadcast %77 : vector<8x1xf32> to vector<8x8xf32>
    %79 = arith.subf %75, %78 : vector<8x8xf32>
    %80 = math.exp %79 : vector<8x8xf32>
    %cst_42 = arith.constant dense<0.000000e+00> : vector<8xf32>
    %81 = vector.multi_reduction <add>, %80, %cst_42 [1] : vector<8x8xf32> to vector<8xf32>
    %82 = vector.shape_cast %81 : vector<8xf32> to vector<8x1xf32>
    %83 = tpu.reciprocal %82 {approx = true} : vector<8x1xf32> -> vector<8x1xf32>
    %84 = vector.broadcast %83 : vector<8x1xf32> to vector<8x8xf32>
    %85 = arith.mulf %80, %84 : vector<8x8xf32>
    %cst_43 = arith.constant dense<0.000000e+00> : vector<8x128xf32>
    %86 = tpu.matmul %85, %70, %cst_43 {dimension_numbers = #tpu.dot_dimension_numbers<[1], [0], [0], [1], [0, 0, 1, 1], [], []>} : vector<8x8xf32>, vector<8x128xf32>, vector<8x128xf32> -> vector<8x128xf32>
    %87 = tpu.concatenate %67, %86 in 1 : vector<8x128xf32>, vector<8x128xf32> -> vector<8x256xf32>
    %c0_44 = arith.constant 0 : index
    %c0_45 = arith.constant 0 : index
    %c0_46 = arith.constant 0 : index
    %88 = vector.load %arg11[%c0_44, %c0_45, %c0_46] : memref<2x256x128xf32, #tpu.memory_space<vmem>>, vector<1x256x128xf32>
    %89 = vector.shape_cast %88 : vector<1x256x128xf32> to vector<256x128xf32>
    %cst_47 = arith.constant dense<0.000000e+00> : vector<8x128xf32>
    %90 = tpu.matmul %87, %89, %cst_47 {dimension_numbers = #tpu.dot_dimension_numbers<[1], [0], [0], [1], [0, 0, 1, 1], [], []>} : vector<8x256xf32>, vector<256x128xf32>, vector<8x128xf32> -> vector<8x128xf32>
    %c0_48 = arith.constant 0 : index
    %c0_49 = arith.constant 0 : index
    %c0_50 = arith.constant 0 : index
    %91 = vector.load %arg12[%c0_48, %c0_49, %c0_50] : memref<2x1x128xf32, #tpu.memory_space<vmem>>, vector<1x1x128xf32>
    %92 = vector.shape_cast %91 : vector<1x1x128xf32> to vector<1x128xf32>
    %93 = vector.broadcast %92 : vector<1x128xf32> to vector<8x128xf32>
    %94 = arith.addf %90, %93 : vector<8x128xf32>
    %95 = arith.addf %27, %94 : vector<8x128xf32>
    %c0_51 = arith.constant 0 : index
    %c0_52 = arith.constant 0 : index
    %c0_53 = arith.constant 0 : index
    %96 = vector.load %arg13[%c0_51, %c0_52, %c0_53] : memref<2x1x128xf32, #tpu.memory_space<vmem>>, vector<1x1x128xf32>
    %97 = vector.shape_cast %96 : vector<1x1x128xf32> to vector<1x128xf32>
    %c0_54 = arith.constant 0 : index
    %c0_55 = arith.constant 0 : index
    %c0_56 = arith.constant 0 : index
    %98 = vector.load %arg14[%c0_54, %c0_55, %c0_56] : memref<2x1x128xf32, #tpu.memory_space<vmem>>, vector<1x1x128xf32>
    %99 = vector.shape_cast %98 : vector<1x1x128xf32> to vector<1x128xf32>
    %cst_57 = arith.constant dense<0.000000e+00> : vector<8xf32>
    %100 = vector.multi_reduction <add>, %95, %cst_57 [1] : vector<8x128xf32> to vector<8xf32>
    %101 = vector.shape_cast %100 : vector<8xf32> to vector<8x1xf32>
    %102 = arith.mulf %95, %95 : vector<8x128xf32>
    %cst_58 = arith.constant dense<0.000000e+00> : vector<8xf32>
    %103 = vector.multi_reduction <add>, %102, %cst_58 [1] : vector<8x128xf32> to vector<8xf32>
    %104 = vector.shape_cast %103 : vector<8xf32> to vector<8x1xf32>
    %cst_59 = arith.constant 3.200000e+01 : f32
    %105 = vector.broadcast %cst_59 : f32 to vector<8x1xf32>
    %106 = arith.divf %101, %105 : vector<8x1xf32>
    %cst_60 = arith.constant 3.200000e+01 : f32
    %107 = vector.broadcast %cst_60 : f32 to vector<8x1xf32>
    %108 = arith.divf %104, %107 : vector<8x1xf32>
    %109 = arith.mulf %106, %106 : vector<8x1xf32>
    %110 = arith.subf %108, %109 : vector<8x1xf32>
    %111 = vector.broadcast %106 : vector<8x1xf32> to vector<8x128xf32>
    %112 = arith.subf %95, %111 : vector<8x128xf32>
    %cst_61 = arith.constant 9.99999996E-13 : f32
    %113 = vector.broadcast %cst_61 : f32 to vector<8x1xf32>
    %114 = arith.addf %110, %113 : vector<8x1xf32>
    %115 = math.rsqrt %114 : vector<8x1xf32>
    %116 = vector.broadcast %115 : vector<8x1xf32> to vector<8x128xf32>
    %117 = arith.mulf %112, %116 : vector<8x128xf32>
    %118 = vector.broadcast %97 : vector<1x128xf32> to vector<8x128xf32>
    %119 = arith.mulf %117, %118 : vector<8x128xf32>
    %120 = vector.broadcast %99 : vector<1x128xf32> to vector<8x128xf32>
    %121 = arith.addf %119, %120 : vector<8x128xf32>
    %c0_62 = arith.constant 0 : index
    %c0_63 = arith.constant 0 : index
    %c0_64 = arith.constant 0 : index
    %122 = vector.load %arg15[%c0_62, %c0_63, %c0_64] : memref<2x128x128xf32, #tpu.memory_space<vmem>>, vector<1x128x128xf32>
    %123 = vector.shape_cast %122 : vector<1x128x128xf32> to vector<128x128xf32>
    %cst_65 = arith.constant dense<0.000000e+00> : vector<8x128xf32>
    %124 = tpu.matmul %121, %123, %cst_65 {dimension_numbers = #tpu.dot_dimension_numbers<[1], [0], [0], [1], [0, 0, 1, 1], [], []>} : vector<8x128xf32>, vector<128x128xf32>, vector<8x128xf32> -> vector<8x128xf32>
    %c0_66 = arith.constant 0 : index
    %c0_67 = arith.constant 0 : index
    %c0_68 = arith.constant 0 : index
    %125 = vector.load %arg16[%c0_66, %c0_67, %c0_68] : memref<2x1x128xf32, #tpu.memory_space<vmem>>, vector<1x1x128xf32>
    %126 = vector.shape_cast %125 : vector<1x1x128xf32> to vector<1x128xf32>
    %127 = vector.broadcast %126 : vector<1x128xf32> to vector<8x128xf32>
    %128 = arith.addf %124, %127 : vector<8x128xf32>
    %cst_69 = arith.constant 5.000000e-01 : f32
    %129 = vector.broadcast %cst_69 : f32 to vector<8x128xf32>
    %130 = arith.mulf %129, %128 : vector<8x128xf32>
    %cst_70 = arith.constant 4.471500e-02 : f32
    %131 = vector.broadcast %cst_70 : f32 to vector<8x128xf32>
    %132 = arith.mulf %131, %128 : vector<8x128xf32>
    %133 = arith.mulf %132, %128 : vector<8x128xf32>
    %134 = arith.mulf %133, %128 : vector<8x128xf32>
    %135 = arith.addf %128, %134 : vector<8x128xf32>
    %cst_71 = arith.constant 0.797884583 : f32
    %136 = vector.broadcast %cst_71 : f32 to vector<8x128xf32>
    %137 = arith.mulf %136, %135 : vector<8x128xf32>
    %138 = math.tanh %137 : vector<8x128xf32>
    %cst_72 = arith.constant 1.000000e+00 : f32
    %139 = vector.broadcast %cst_72 : f32 to vector<8x128xf32>
    %140 = arith.addf %139, %138 : vector<8x128xf32>
    %141 = arith.mulf %130, %140 : vector<8x128xf32>
    %c0_73 = arith.constant 0 : index
    %c0_74 = arith.constant 0 : index
    %c0_75 = arith.constant 0 : index
    %142 = vector.load %arg17[%c0_73, %c0_74, %c0_75] : memref<2x128x128xf32, #tpu.memory_space<vmem>>, vector<1x128x128xf32>
    %143 = vector.shape_cast %142 : vector<1x128x128xf32> to vector<128x128xf32>
    %cst_76 = arith.constant dense<0.000000e+00> : vector<8x128xf32>
    %144 = tpu.matmul %141, %143, %cst_76 {dimension_numbers = #tpu.dot_dimension_numbers<[1], [0], [0], [1], [0, 0, 1, 1], [], []>} : vector<8x128xf32>, vector<128x128xf32>, vector<8x128xf32> -> vector<8x128xf32>
    %c0_77 = arith.constant 0 : index
    %c0_78 = arith.constant 0 : index
    %c0_79 = arith.constant 0 : index
    %145 = vector.load %arg18[%c0_77, %c0_78, %c0_79] : memref<2x1x128xf32, #tpu.memory_space<vmem>>, vector<1x1x128xf32>
    %146 = vector.shape_cast %145 : vector<1x1x128xf32> to vector<1x128xf32>
    %147 = vector.broadcast %146 : vector<1x128xf32> to vector<8x128xf32>
    %148 = arith.addf %144, %147 : vector<8x128xf32>
    %149 = arith.addf %121, %148 : vector<8x128xf32>
    %c0_80 = arith.constant 0 : index
    %c0_81 = arith.constant 0 : index
    %c0_82 = arith.constant 0 : index
    %150 = vector.load %arg19[%c0_80, %c0_81, %c0_82] : memref<2x1x128xf32, #tpu.memory_space<vmem>>, vector<1x1x128xf32>
    %151 = vector.shape_cast %150 : vector<1x1x128xf32> to vector<1x128xf32>
    %c0_83 = arith.constant 0 : index
    %c0_84 = arith.constant 0 : index
    %c0_85 = arith.constant 0 : index
    %152 = vector.load %arg20[%c0_83, %c0_84, %c0_85] : memref<2x1x128xf32, #tpu.memory_space<vmem>>, vector<1x1x128xf32>
    %153 = vector.shape_cast %152 : vector<1x1x128xf32> to vector<1x128xf32>
    %cst_86 = arith.constant dense<0.000000e+00> : vector<8xf32>
    %154 = vector.multi_reduction <add>, %149, %cst_86 [1] : vector<8x128xf32> to vector<8xf32>
    %155 = vector.shape_cast %154 : vector<8xf32> to vector<8x1xf32>
    %156 = arith.mulf %149, %149 : vector<8x128xf32>
    %cst_87 = arith.constant dense<0.000000e+00> : vector<8xf32>
    %157 = vector.multi_reduction <add>, %156, %cst_87 [1] : vector<8x128xf32> to vector<8xf32>
    %158 = vector.shape_cast %157 : vector<8xf32> to vector<8x1xf32>
    %cst_88 = arith.constant 3.200000e+01 : f32
    %159 = vector.broadcast %cst_88 : f32 to vector<8x1xf32>
    %160 = arith.divf %155, %159 : vector<8x1xf32>
    %cst_89 = arith.constant 3.200000e+01 : f32
    %161 = vector.broadcast %cst_89 : f32 to vector<8x1xf32>
    %162 = arith.divf %158, %161 : vector<8x1xf32>
    %163 = arith.mulf %160, %160 : vector<8x1xf32>
    %164 = arith.subf %162, %163 : vector<8x1xf32>
    %165 = vector.broadcast %160 : vector<8x1xf32> to vector<8x128xf32>
    %166 = arith.subf %149, %165 : vector<8x128xf32>
    %cst_90 = arith.constant 9.99999996E-13 : f32
    %167 = vector.broadcast %cst_90 : f32 to vector<8x1xf32>
    %168 = arith.addf %164, %167 : vector<8x1xf32>
    %169 = math.rsqrt %168 : vector<8x1xf32>
    %170 = vector.broadcast %169 : vector<8x1xf32> to vector<8x128xf32>
    %171 = arith.mulf %166, %170 : vector<8x128xf32>
    %172 = vector.broadcast %151 : vector<1x128xf32> to vector<8x128xf32>
    %173 = arith.mulf %171, %172 : vector<8x128xf32>
    %174 = vector.broadcast %153 : vector<1x128xf32> to vector<8x128xf32>
    %175 = arith.addf %173, %174 : vector<8x128xf32>
    %c1 = arith.constant 1 : index
    %c0_91 = arith.constant 0 : index
    %c0_92 = arith.constant 0 : index
    %176 = vector.load %arg5[%c1, %c0_91, %c0_92] : memref<2x128x256xf32, #tpu.memory_space<vmem>>, vector<1x128x256xf32>
    %177 = vector.shape_cast %176 : vector<1x128x256xf32> to vector<128x256xf32>
    %cst_93 = arith.constant dense<0.000000e+00> : vector<8x256xf32>
    %178 = tpu.matmul %175, %177, %cst_93 {dimension_numbers = #tpu.dot_dimension_numbers<[1], [0], [0], [1], [0, 0, 1, 1], [], []>} : vector<8x128xf32>, vector<128x256xf32>, vector<8x256xf32> -> vector<8x256xf32>
    %c1_94 = arith.constant 1 : index
    %c0_95 = arith.constant 0 : index
    %c0_96 = arith.constant 0 : index
    %179 = vector.load %arg6[%c1_94, %c0_95, %c0_96] : memref<2x1x256xf32, #tpu.memory_space<vmem>>, vector<1x1x256xf32>
    %180 = vector.shape_cast %179 : vector<1x1x256xf32> to vector<1x256xf32>
    %181 = vector.broadcast %180 : vector<1x256xf32> to vector<8x256xf32>
    %182 = arith.addf %178, %181 : vector<8x256xf32>
    %c1_97 = arith.constant 1 : index
    %c0_98 = arith.constant 0 : index
    %c0_99 = arith.constant 0 : index
    %183 = vector.load %arg7[%c1_97, %c0_98, %c0_99] : memref<2x128x256xf32, #tpu.memory_space<vmem>>, vector<1x128x256xf32>
    %184 = vector.shape_cast %183 : vector<1x128x256xf32> to vector<128x256xf32>
    %cst_100 = arith.constant dense<0.000000e+00> : vector<8x256xf32>
    %185 = tpu.matmul %175, %184, %cst_100 {dimension_numbers = #tpu.dot_dimension_numbers<[1], [0], [0], [1], [0, 0, 1, 1], [], []>} : vector<8x128xf32>, vector<128x256xf32>, vector<8x256xf32> -> vector<8x256xf32>
    %c1_101 = arith.constant 1 : index
    %c0_102 = arith.constant 0 : index
    %c0_103 = arith.constant 0 : index
    %186 = vector.load %arg8[%c1_101, %c0_102, %c0_103] : memref<2x1x256xf32, #tpu.memory_space<vmem>>, vector<1x1x256xf32>
    %187 = vector.shape_cast %186 : vector<1x1x256xf32> to vector<1x256xf32>
    %188 = vector.broadcast %187 : vector<1x256xf32> to vector<8x256xf32>
    %189 = arith.addf %185, %188 : vector<8x256xf32>
    %c1_104 = arith.constant 1 : index
    %c0_105 = arith.constant 0 : index
    %c0_106 = arith.constant 0 : index
    %190 = vector.load %arg9[%c1_104, %c0_105, %c0_106] : memref<2x128x256xf32, #tpu.memory_space<vmem>>, vector<1x128x256xf32>
    %191 = vector.shape_cast %190 : vector<1x128x256xf32> to vector<128x256xf32>
    %cst_107 = arith.constant dense<0.000000e+00> : vector<8x256xf32>
    %192 = tpu.matmul %175, %191, %cst_107 {dimension_numbers = #tpu.dot_dimension_numbers<[1], [0], [0], [1], [0, 0, 1, 1], [], []>} : vector<8x128xf32>, vector<128x256xf32>, vector<8x256xf32> -> vector<8x256xf32>
    %c1_108 = arith.constant 1 : index
    %c0_109 = arith.constant 0 : index
    %c0_110 = arith.constant 0 : index
    %193 = vector.load %arg10[%c1_108, %c0_109, %c0_110] : memref<2x1x256xf32, #tpu.memory_space<vmem>>, vector<1x1x256xf32>
    %194 = vector.shape_cast %193 : vector<1x1x256xf32> to vector<1x256xf32>
    %195 = vector.broadcast %194 : vector<1x256xf32> to vector<8x256xf32>
    %196 = arith.addf %192, %195 : vector<8x256xf32>
    %197 = vector.extract_strided_slice %182 {offsets = [0, 0], sizes = [8, 128], strides = [1, 1]} : vector<8x256xf32> to vector<8x128xf32>
    %198 = vector.extract_strided_slice %189 {offsets = [0, 0], sizes = [8, 128], strides = [1, 1]} : vector<8x256xf32> to vector<8x128xf32>
    %199 = vector.extract_strided_slice %196 {offsets = [0, 0], sizes = [8, 128], strides = [1, 1]} : vector<8x256xf32> to vector<8x128xf32>
    "tpu.trace_start"() <{level = 10 : i32, message = "qd,kd->qk"}> : () -> ()
    %cst_111 = arith.constant dense<0.000000e+00> : vector<8x8xf32>
    %200 = tpu.matmul %197, %198, %cst_111 {dimension_numbers = #tpu.dot_dimension_numbers<[1], [1], [0], [0], [0, 0, 1, 0], [], []>} : vector<8x128xf32>, vector<8x128xf32>, vector<8x8xf32> -> vector<8x8xf32>
    "tpu.trace_stop"() : () -> ()
    %cst_112 = arith.constant 2.500000e-01 : f32
    %201 = vector.broadcast %cst_112 : f32 to vector<8x8xf32>
    %202 = arith.mulf %200, %201 : vector<8x8xf32>
    %203 = vector.broadcast %3 : vector<1x8xf32> to vector<8x8xf32>
    %204 = arith.addf %202, %203 : vector<8x8xf32>
    %cst_113 = arith.constant dense<0xFF800000> : vector<8xf32>
    %205 = vector.multi_reduction <maximumf>, %204, %cst_113 [1] : vector<8x8xf32> to vector<8xf32>
    %206 = vector.shape_cast %205 : vector<8xf32> to vector<8x1xf32>
    %207 = vector.broadcast %206 : vector<8x1xf32> to vector<8x8xf32>
    %208 = arith.subf %204, %207 : vector<8x8xf32>
    %209 = math.exp %208 : vector<8x8xf32>
    %cst_114 = arith.constant dense<0.000000e+00> : vector<8xf32>
    %210 = vector.multi_reduction <add>, %209, %cst_114 [1] : vector<8x8xf32> to vector<8xf32>
    %211 = vector.shape_cast %210 : vector<8xf32> to vector<8x1xf32>
    %212 = tpu.reciprocal %211 {approx = true} : vector<8x1xf32> -> vector<8x1xf32>
    %213 = vector.broadcast %212 : vector<8x1xf32> to vector<8x8xf32>
    %214 = arith.mulf %209, %213 : vector<8x8xf32>
    %cst_115 = arith.constant dense<0.000000e+00> : vector<8x128xf32>
    %215 = tpu.matmul %214, %199, %cst_115 {dimension_numbers = #tpu.dot_dimension_numbers<[1], [0], [0], [1], [0, 0, 1, 1], [], []>} : vector<8x8xf32>, vector<8x128xf32>, vector<8x128xf32> -> vector<8x128xf32>
    %216 = vector.extract_strided_slice %182 {offsets = [0, 128], sizes = [8, 128], strides = [1, 1]} : vector<8x256xf32> to vector<8x128xf32>
    %217 = vector.extract_strided_slice %189 {offsets = [0, 128], sizes = [8, 128], strides = [1, 1]} : vector<8x256xf32> to vector<8x128xf32>
    %218 = vector.extract_strided_slice %196 {offsets = [0, 128], sizes = [8, 128], strides = [1, 1]} : vector<8x256xf32> to vector<8x128xf32>
    "tpu.trace_start"() <{level = 10 : i32, message = "qd,kd->qk"}> : () -> ()
    %cst_116 = arith.constant dense<0.000000e+00> : vector<8x8xf32>
    %219 = tpu.matmul %216, %217, %cst_116 {dimension_numbers = #tpu.dot_dimension_numbers<[1], [1], [0], [0], [0, 0, 1, 0], [], []>} : vector<8x128xf32>, vector<8x128xf32>, vector<8x8xf32> -> vector<8x8xf32>
    "tpu.trace_stop"() : () -> ()
    %cst_117 = arith.constant 2.500000e-01 : f32
    %220 = vector.broadcast %cst_117 : f32 to vector<8x8xf32>
    %221 = arith.mulf %219, %220 : vector<8x8xf32>
    %222 = vector.broadcast %3 : vector<1x8xf32> to vector<8x8xf32>
    %223 = arith.addf %221, %222 : vector<8x8xf32>
    %cst_118 = arith.constant dense<0xFF800000> : vector<8xf32>
    %224 = vector.multi_reduction <maximumf>, %223, %cst_118 [1] : vector<8x8xf32> to vector<8xf32>
    %225 = vector.shape_cast %224 : vector<8xf32> to vector<8x1xf32>
    %226 = vector.broadcast %225 : vector<8x1xf32> to vector<8x8xf32>
    %227 = arith.subf %223, %226 : vector<8x8xf32>
    %228 = math.exp %227 : vector<8x8xf32>
    %cst_119 = arith.constant dense<0.000000e+00> : vector<8xf32>
    %229 = vector.multi_reduction <add>, %228, %cst_119 [1] : vector<8x8xf32> to vector<8xf32>
    %230 = vector.shape_cast %229 : vector<8xf32> to vector<8x1xf32>
    %231 = tpu.reciprocal %230 {approx = true} : vector<8x1xf32> -> vector<8x1xf32>
    %232 = vector.broadcast %231 : vector<8x1xf32> to vector<8x8xf32>
    %233 = arith.mulf %228, %232 : vector<8x8xf32>
    %cst_120 = arith.constant dense<0.000000e+00> : vector<8x128xf32>
    %234 = tpu.matmul %233, %218, %cst_120 {dimension_numbers = #tpu.dot_dimension_numbers<[1], [0], [0], [1], [0, 0, 1, 1], [], []>} : vector<8x8xf32>, vector<8x128xf32>, vector<8x128xf32> -> vector<8x128xf32>
    %235 = tpu.concatenate %215, %234 in 1 : vector<8x128xf32>, vector<8x128xf32> -> vector<8x256xf32>
    %c1_121 = arith.constant 1 : index
    %c0_122 = arith.constant 0 : index
    %c0_123 = arith.constant 0 : index
    %236 = vector.load %arg11[%c1_121, %c0_122, %c0_123] : memref<2x256x128xf32, #tpu.memory_space<vmem>>, vector<1x256x128xf32>
    %237 = vector.shape_cast %236 : vector<1x256x128xf32> to vector<256x128xf32>
    %cst_124 = arith.constant dense<0.000000e+00> : vector<8x128xf32>
    %238 = tpu.matmul %235, %237, %cst_124 {dimension_numbers = #tpu.dot_dimension_numbers<[1], [0], [0], [1], [0, 0, 1, 1], [], []>} : vector<8x256xf32>, vector<256x128xf32>, vector<8x128xf32> -> vector<8x128xf32>
    %c1_125 = arith.constant 1 : index
    %c0_126 = arith.constant 0 : index
    %c0_127 = arith.constant 0 : index
    %239 = vector.load %arg12[%c1_125, %c0_126, %c0_127] : memref<2x1x128xf32, #tpu.memory_space<vmem>>, vector<1x1x128xf32>
    %240 = vector.shape_cast %239 : vector<1x1x128xf32> to vector<1x128xf32>
    %241 = vector.broadcast %240 : vector<1x128xf32> to vector<8x128xf32>
    %242 = arith.addf %238, %241 : vector<8x128xf32>
    %243 = arith.addf %175, %242 : vector<8x128xf32>
    %c1_128 = arith.constant 1 : index
    %c0_129 = arith.constant 0 : index
    %c0_130 = arith.constant 0 : index
    %244 = vector.load %arg13[%c1_128, %c0_129, %c0_130] : memref<2x1x128xf32, #tpu.memory_space<vmem>>, vector<1x1x128xf32>
    %245 = vector.shape_cast %244 : vector<1x1x128xf32> to vector<1x128xf32>
    %c1_131 = arith.constant 1 : index
    %c0_132 = arith.constant 0 : index
    %c0_133 = arith.constant 0 : index
    %246 = vector.load %arg14[%c1_131, %c0_132, %c0_133] : memref<2x1x128xf32, #tpu.memory_space<vmem>>, vector<1x1x128xf32>
    %247 = vector.shape_cast %246 : vector<1x1x128xf32> to vector<1x128xf32>
    %cst_134 = arith.constant dense<0.000000e+00> : vector<8xf32>
    %248 = vector.multi_reduction <add>, %243, %cst_134 [1] : vector<8x128xf32> to vector<8xf32>
    %249 = vector.shape_cast %248 : vector<8xf32> to vector<8x1xf32>
    %250 = arith.mulf %243, %243 : vector<8x128xf32>
    %cst_135 = arith.constant dense<0.000000e+00> : vector<8xf32>
    %251 = vector.multi_reduction <add>, %250, %cst_135 [1] : vector<8x128xf32> to vector<8xf32>
    %252 = vector.shape_cast %251 : vector<8xf32> to vector<8x1xf32>
    %cst_136 = arith.constant 3.200000e+01 : f32
    %253 = vector.broadcast %cst_136 : f32 to vector<8x1xf32>
    %254 = arith.divf %249, %253 : vector<8x1xf32>
    %cst_137 = arith.constant 3.200000e+01 : f32
    %255 = vector.broadcast %cst_137 : f32 to vector<8x1xf32>
    %256 = arith.divf %252, %255 : vector<8x1xf32>
    %257 = arith.mulf %254, %254 : vector<8x1xf32>
    %258 = arith.subf %256, %257 : vector<8x1xf32>
    %259 = vector.broadcast %254 : vector<8x1xf32> to vector<8x128xf32>
    %260 = arith.subf %243, %259 : vector<8x128xf32>
    %cst_138 = arith.constant 9.99999996E-13 : f32
    %261 = vector.broadcast %cst_138 : f32 to vector<8x1xf32>
    %262 = arith.addf %258, %261 : vector<8x1xf32>
    %263 = math.rsqrt %262 : vector<8x1xf32>
    %264 = vector.broadcast %263 : vector<8x1xf32> to vector<8x128xf32>
    %265 = arith.mulf %260, %264 : vector<8x128xf32>
    %266 = vector.broadcast %245 : vector<1x128xf32> to vector<8x128xf32>
    %267 = arith.mulf %265, %266 : vector<8x128xf32>
    %268 = vector.broadcast %247 : vector<1x128xf32> to vector<8x128xf32>
    %269 = arith.addf %267, %268 : vector<8x128xf32>
    %c1_139 = arith.constant 1 : index
    %c0_140 = arith.constant 0 : index
    %c0_141 = arith.constant 0 : index
    %270 = vector.load %arg15[%c1_139, %c0_140, %c0_141] : memref<2x128x128xf32, #tpu.memory_space<vmem>>, vector<1x128x128xf32>
    %271 = vector.shape_cast %270 : vector<1x128x128xf32> to vector<128x128xf32>
    %cst_142 = arith.constant dense<0.000000e+00> : vector<8x128xf32>
    %272 = tpu.matmul %269, %271, %cst_142 {dimension_numbers = #tpu.dot_dimension_numbers<[1], [0], [0], [1], [0, 0, 1, 1], [], []>} : vector<8x128xf32>, vector<128x128xf32>, vector<8x128xf32> -> vector<8x128xf32>
    %c1_143 = arith.constant 1 : index
    %c0_144 = arith.constant 0 : index
    %c0_145 = arith.constant 0 : index
    %273 = vector.load %arg16[%c1_143, %c0_144, %c0_145] : memref<2x1x128xf32, #tpu.memory_space<vmem>>, vector<1x1x128xf32>
    %274 = vector.shape_cast %273 : vector<1x1x128xf32> to vector<1x128xf32>
    %275 = vector.broadcast %274 : vector<1x128xf32> to vector<8x128xf32>
    %276 = arith.addf %272, %275 : vector<8x128xf32>
    %cst_146 = arith.constant 5.000000e-01 : f32
    %277 = vector.broadcast %cst_146 : f32 to vector<8x128xf32>
    %278 = arith.mulf %277, %276 : vector<8x128xf32>
    %cst_147 = arith.constant 4.471500e-02 : f32
    %279 = vector.broadcast %cst_147 : f32 to vector<8x128xf32>
    %280 = arith.mulf %279, %276 : vector<8x128xf32>
    %281 = arith.mulf %280, %276 : vector<8x128xf32>
    %282 = arith.mulf %281, %276 : vector<8x128xf32>
    %283 = arith.addf %276, %282 : vector<8x128xf32>
    %cst_148 = arith.constant 0.797884583 : f32
    %284 = vector.broadcast %cst_148 : f32 to vector<8x128xf32>
    %285 = arith.mulf %284, %283 : vector<8x128xf32>
    %286 = math.tanh %285 : vector<8x128xf32>
    %cst_149 = arith.constant 1.000000e+00 : f32
    %287 = vector.broadcast %cst_149 : f32 to vector<8x128xf32>
    %288 = arith.addf %287, %286 : vector<8x128xf32>
    %289 = arith.mulf %278, %288 : vector<8x128xf32>
    %c1_150 = arith.constant 1 : index
    %c0_151 = arith.constant 0 : index
    %c0_152 = arith.constant 0 : index
    %290 = vector.load %arg17[%c1_150, %c0_151, %c0_152] : memref<2x128x128xf32, #tpu.memory_space<vmem>>, vector<1x128x128xf32>
    %291 = vector.shape_cast %290 : vector<1x128x128xf32> to vector<128x128xf32>
    %cst_153 = arith.constant dense<0.000000e+00> : vector<8x128xf32>
    %292 = tpu.matmul %289, %291, %cst_153 {dimension_numbers = #tpu.dot_dimension_numbers<[1], [0], [0], [1], [0, 0, 1, 1], [], []>} : vector<8x128xf32>, vector<128x128xf32>, vector<8x128xf32> -> vector<8x128xf32>
    %c1_154 = arith.constant 1 : index
    %c0_155 = arith.constant 0 : index
    %c0_156 = arith.constant 0 : index
    %293 = vector.load %arg18[%c1_154, %c0_155, %c0_156] : memref<2x1x128xf32, #tpu.memory_space<vmem>>, vector<1x1x128xf32>
    %294 = vector.shape_cast %293 : vector<1x1x128xf32> to vector<1x128xf32>
    %295 = vector.broadcast %294 : vector<1x128xf32> to vector<8x128xf32>
    %296 = arith.addf %292, %295 : vector<8x128xf32>
    %297 = arith.addf %269, %296 : vector<8x128xf32>
    %c1_157 = arith.constant 1 : index
    %c0_158 = arith.constant 0 : index
    %c0_159 = arith.constant 0 : index
    %298 = vector.load %arg19[%c1_157, %c0_158, %c0_159] : memref<2x1x128xf32, #tpu.memory_space<vmem>>, vector<1x1x128xf32>
    %299 = vector.shape_cast %298 : vector<1x1x128xf32> to vector<1x128xf32>
    %c1_160 = arith.constant 1 : index
    %c0_161 = arith.constant 0 : index
    %c0_162 = arith.constant 0 : index
    %300 = vector.load %arg20[%c1_160, %c0_161, %c0_162] : memref<2x1x128xf32, #tpu.memory_space<vmem>>, vector<1x1x128xf32>
    %301 = vector.shape_cast %300 : vector<1x1x128xf32> to vector<1x128xf32>
    %cst_163 = arith.constant dense<0.000000e+00> : vector<8xf32>
    %302 = vector.multi_reduction <add>, %297, %cst_163 [1] : vector<8x128xf32> to vector<8xf32>
    %303 = vector.shape_cast %302 : vector<8xf32> to vector<8x1xf32>
    %304 = arith.mulf %297, %297 : vector<8x128xf32>
    %cst_164 = arith.constant dense<0.000000e+00> : vector<8xf32>
    %305 = vector.multi_reduction <add>, %304, %cst_164 [1] : vector<8x128xf32> to vector<8xf32>
    %306 = vector.shape_cast %305 : vector<8xf32> to vector<8x1xf32>
    %cst_165 = arith.constant 3.200000e+01 : f32
    %307 = vector.broadcast %cst_165 : f32 to vector<8x1xf32>
    %308 = arith.divf %303, %307 : vector<8x1xf32>
    %cst_166 = arith.constant 3.200000e+01 : f32
    %309 = vector.broadcast %cst_166 : f32 to vector<8x1xf32>
    %310 = arith.divf %306, %309 : vector<8x1xf32>
    %311 = arith.mulf %308, %308 : vector<8x1xf32>
    %312 = arith.subf %310, %311 : vector<8x1xf32>
    %313 = vector.broadcast %308 : vector<8x1xf32> to vector<8x128xf32>
    %314 = arith.subf %297, %313 : vector<8x128xf32>
    %cst_167 = arith.constant 9.99999996E-13 : f32
    %315 = vector.broadcast %cst_167 : f32 to vector<8x1xf32>
    %316 = arith.addf %312, %315 : vector<8x1xf32>
    %317 = math.rsqrt %316 : vector<8x1xf32>
    %318 = vector.broadcast %317 : vector<8x1xf32> to vector<8x128xf32>
    %319 = arith.mulf %314, %318 : vector<8x128xf32>
    %320 = vector.broadcast %299 : vector<1x128xf32> to vector<8x128xf32>
    %321 = arith.mulf %319, %320 : vector<8x128xf32>
    %322 = vector.broadcast %301 : vector<1x128xf32> to vector<8x128xf32>
    %323 = arith.addf %321, %322 : vector<8x128xf32>
    %324 = vector.extract_strided_slice %323 {offsets = [0, 0], sizes = [1, 128], strides = [1, 1]} : vector<8x128xf32> to vector<1x128xf32>
    %c0_168 = arith.constant 0 : index
    %c0_169 = arith.constant 0 : index
    %325 = vector.load %arg21[%c0_168, %c0_169] : memref<128x256xf32, #tpu.memory_space<vmem>>, vector<128x256xf32>
    %cst_170 = arith.constant dense<0.000000e+00> : vector<1x256xf32>
    %326 = tpu.matmul %324, %325, %cst_170 {dimension_numbers = #tpu.dot_dimension_numbers<[1], [0], [0], [1], [0, 0, 1, 1], [], []>} : vector<1x128xf32>, vector<128x256xf32>, vector<1x256xf32> -> vector<1x256xf32>
    %c0_171 = arith.constant 0 : index
    %c0_172 = arith.constant 0 : index
    %327 = vector.load %arg22[%c0_171, %c0_172] : memref<1x256xf32, #tpu.memory_space<vmem>>, vector<1x256xf32>
    %328 = arith.addf %326, %327 : vector<1x256xf32>
    %cst_173 = arith.constant 0.000000e+00 : f32
    %329 = vector.broadcast %cst_173 : f32 to vector<1x256xf32>
    %330 = arith.maximumf %328, %329 : vector<1x256xf32>
    %c0_174 = arith.constant 0 : index
    %c0_175 = arith.constant 0 : index
    %331 = vector.load %arg23[%c0_174, %c0_175] : memref<256x128xf32, #tpu.memory_space<vmem>>, vector<256x128xf32>
    %cst_176 = arith.constant dense<0.000000e+00> : vector<1x128xf32>
    %332 = tpu.matmul %330, %331, %cst_176 {dimension_numbers = #tpu.dot_dimension_numbers<[1], [0], [0], [1], [0, 0, 1, 1], [], []>} : vector<1x256xf32>, vector<256x128xf32>, vector<1x128xf32> -> vector<1x128xf32>
    %c0_177 = arith.constant 0 : index
    %c0_178 = arith.constant 0 : index
    %333 = vector.load %arg24[%c0_177, %c0_178] : memref<1x128xf32, #tpu.memory_space<vmem>>, vector<1x128xf32>
    %334 = arith.addf %332, %333 : vector<1x128xf32>
    %cst_179 = arith.constant 0.000000e+00 : f32
    %335 = vector.broadcast %cst_179 : f32 to vector<1x128xf32>
    %336 = arith.maximumf %334, %335 : vector<1x128xf32>
    %c0_180 = arith.constant 0 : index
    %c0_181 = arith.constant 0 : index
    %337 = vector.load %arg25[%c0_180, %c0_181] : memref<128x128xf32, #tpu.memory_space<vmem>>, vector<128x128xf32>
    %cst_182 = arith.constant dense<0.000000e+00> : vector<1x128xf32>
    %338 = tpu.matmul %336, %337, %cst_182 {dimension_numbers = #tpu.dot_dimension_numbers<[1], [0], [0], [1], [0, 0, 1, 1], [], []>} : vector<1x128xf32>, vector<128x128xf32>, vector<1x128xf32> -> vector<1x128xf32>
    %c0_183 = arith.constant 0 : index
    %c0_184 = arith.constant 0 : index
    %339 = vector.load %arg26[%c0_183, %c0_184] : memref<1x128xf32, #tpu.memory_space<vmem>>, vector<1x128xf32>
    %340 = arith.addf %338, %339 : vector<1x128xf32>
    %c0_185 = arith.constant 0 : index
    %c0_186 = arith.constant 0 : index
    %c0_187 = arith.constant 0 : index
    %341 = vector.load %arg27[%c0_185, %c0_186, %c0_187] : memref<1x1x128xf32, #tpu.memory_space<vmem>>, vector<1x1x128xf32>
    %342 = vector.shape_cast %341 : vector<1x1x128xf32> to vector<1x128xf32>
    %343 = vector.shape_cast %340 : vector<1x128xf32> to vector<1x1x128xf32>
    tpu.vector_store %arg27[%c0_185, %c0_186, %c0_187], %343 {strides = array<i32>} : memref<1x1x128xf32, #tpu.memory_space<vmem>>, vector<1x1x128xf32>,
    return
  }
  func.func @transform_0(%arg0: i32) -> (i32, i32, i32) {
    %c0_i32 = arith.constant 0 : i32
    %c0_i32_0 = arith.constant 0 : i32
    %c0_i32_1 = arith.constant 0 : i32
    return %arg0, %c0_i32, %c0_i32_0 : i32, i32, i32
  }
  func.func @transform_1(%arg0: i32) -> (i32, i32, i32) {
    %c0_i32 = arith.constant 0 : i32
    %c0_i32_0 = arith.constant 0 : i32
    %c0_i32_1 = arith.constant 0 : i32
    return %arg0, %c0_i32, %c0_i32_0 : i32, i32, i32
  }
  func.func @transform_2(%arg0: i32) -> (i32, i32) {
    %c0_i32 = arith.constant 0 : i32
    %c0_i32_0 = arith.constant 0 : i32
    %c0_i32_1 = arith.constant 0 : i32
    return %c0_i32, %c0_i32_0 : i32, i32
  }
  func.func @transform_3(%arg0: i32) -> (i32, i32) {
    %c0_i32 = arith.constant 0 : i32
    %c0_i32_0 = arith.constant 0 : i32
    %c0_i32_1 = arith.constant 0 : i32
    return %c0_i32, %c0_i32_0 : i32, i32
  }
  func.func @transform_4(%arg0: i32) -> (i32, i32, i32) {
    %c0_i32 = arith.constant 0 : i32
    %c0_i32_0 = arith.constant 0 : i32
    %c0_i32_1 = arith.constant 0 : i32
    %c0_i32_2 = arith.constant 0 : i32
    return %c0_i32, %c0_i32_0, %c0_i32_1 : i32, i32, i32
  }
  func.func @transform_5(%arg0: i32) -> (i32, i32, i32) {
    %c0_i32 = arith.constant 0 : i32
    %c0_i32_0 = arith.constant 0 : i32
    %c0_i32_1 = arith.constant 0 : i32
    %c0_i32_2 = arith.constant 0 : i32
    return %c0_i32, %c0_i32_0, %c0_i32_1 : i32, i32, i32
  }
  func.func @transform_6(%arg0: i32) -> (i32, i32, i32) {
    %c0_i32 = arith.constant 0 : i32
    %c0_i32_0 = arith.constant 0 : i32
    %c0_i32_1 = arith.constant 0 : i32
    %c0_i32_2 = arith.constant 0 : i32
    return %c0_i32, %c0_i32_0, %c0_i32_1 : i32, i32, i32
  }
  func.func @transform_7(%arg0: i32) -> (i32, i32, i32) {
    %c0_i32 = arith.constant 0 : i32
    %c0_i32_0 = arith.constant 0 : i32
    %c0_i32_1 = arith.constant 0 : i32
    %c0_i32_2 = arith.constant 0 : i32
    return %c0_i32, %c0_i32_0, %c0_i32_1 : i32, i32, i32
  }
  func.func @transform_8(%arg0: i32) -> (i32, i32, i32) {
    %c0_i32 = arith.constant 0 : i32
    %c0_i32_0 = arith.constant 0 : i32
    %c0_i32_1 = arith.constant 0 : i32
    %c0_i32_2 = arith.constant 0 : i32
    return %c0_i32, %c0_i32_0, %c0_i32_1 : i32, i32, i32
  }
  func.func @transform_9(%arg0: i32) -> (i32, i32, i32) {
    %c0_i32 = arith.constant 0 : i32
    %c0_i32_0 = arith.constant 0 : i32
    %c0_i32_1 = arith.constant 0 : i32
    %c0_i32_2 = arith.constant 0 : i32
    return %c0_i32, %c0_i32_0, %c0_i32_1 : i32, i32, i32
  }
  func.func @transform_10(%arg0: i32) -> (i32, i32, i32) {
    %c0_i32 = arith.constant 0 : i32
    %c0_i32_0 = arith.constant 0 : i32
    %c0_i32_1 = arith.constant 0 : i32
    %c0_i32_2 = arith.constant 0 : i32
    return %c0_i32, %c0_i32_0, %c0_i32_1 : i32, i32, i32
  }
  func.func @transform_11(%arg0: i32) -> (i32, i32, i32) {
    %c0_i32 = arith.constant 0 : i32
    %c0_i32_0 = arith.constant 0 : i32
    %c0_i32_1 = arith.constant 0 : i32
    %c0_i32_2 = arith.constant 0 : i32
    return %c0_i32, %c0_i32_0, %c0_i32_1 : i32, i32, i32
  }
  func.func @transform_12(%arg0: i32) -> (i32, i32, i32) {
    %c0_i32 = arith.constant 0 : i32
    %c0_i32_0 = arith.constant 0 : i32
    %c0_i32_1 = arith.constant 0 : i32
    %c0_i32_2 = arith.constant 0 : i32
    return %c0_i32, %c0_i32_0, %c0_i32_1 : i32, i32, i32
  }
  func.func @transform_13(%arg0: i32) -> (i32, i32, i32) {
    %c0_i32 = arith.constant 0 : i32
    %c0_i32_0 = arith.constant 0 : i32
    %c0_i32_1 = arith.constant 0 : i32
    %c0_i32_2 = arith.constant 0 : i32
    return %c0_i32, %c0_i32_0, %c0_i32_1 : i32, i32, i32
  }
  func.func @transform_14(%arg0: i32) -> (i32, i32, i32) {
    %c0_i32 = arith.constant 0 : i32
    %c0_i32_0 = arith.constant 0 : i32
    %c0_i32_1 = arith.constant 0 : i32
    %c0_i32_2 = arith.constant 0 : i32
    return %c0_i32, %c0_i32_0, %c0_i32_1 : i32, i32, i32
  }
  func.func @transform_15(%arg0: i32) -> (i32, i32, i32) {
    %c0_i32 = arith.constant 0 : i32
    %c0_i32_0 = arith.constant 0 : i32
    %c0_i32_1 = arith.constant 0 : i32
    %c0_i32_2 = arith.constant 0 : i32
    return %c0_i32, %c0_i32_0, %c0_i32_1 : i32, i32, i32
  }
  func.func @transform_16(%arg0: i32) -> (i32, i32, i32) {
    %c0_i32 = arith.constant 0 : i32
    %c0_i32_0 = arith.constant 0 : i32
    %c0_i32_1 = arith.constant 0 : i32
    %c0_i32_2 = arith.constant 0 : i32
    return %c0_i32, %c0_i32_0, %c0_i32_1 : i32, i32, i32
  }
  func.func @transform_17(%arg0: i32) -> (i32, i32, i32) {
    %c0_i32 = arith.constant 0 : i32
    %c0_i32_0 = arith.constant 0 : i32
    %c0_i32_1 = arith.constant 0 : i32
    %c0_i32_2 = arith.constant 0 : i32
    return %c0_i32, %c0_i32_0, %c0_i32_1 : i32, i32, i32
  }
  func.func @transform_18(%arg0: i32) -> (i32, i32, i32) {
    %c0_i32 = arith.constant 0 : i32
    %c0_i32_0 = arith.constant 0 : i32
    %c0_i32_1 = arith.constant 0 : i32
    %c0_i32_2 = arith.constant 0 : i32
    return %c0_i32, %c0_i32_0, %c0_i32_1 : i32, i32, i32
  }
  func.func @transform_19(%arg0: i32) -> (i32, i32, i32) {
    %c0_i32 = arith.constant 0 : i32
    %c0_i32_0 = arith.constant 0 : i32
    %c0_i32_1 = arith.constant 0 : i32
    %c0_i32_2 = arith.constant 0 : i32
    return %c0_i32, %c0_i32_0, %c0_i32_1 : i32, i32, i32
  }
  func.func @transform_20(%arg0: i32) -> (i32, i32) {
    %c0_i32 = arith.constant 0 : i32
    %c0_i32_0 = arith.constant 0 : i32
    %c0_i32_1 = arith.constant 0 : i32
    return %c0_i32, %c0_i32_0 : i32, i32
  }
  func.func @transform_21(%arg0: i32) -> (i32, i32) {
    %c0_i32 = arith.constant 0 : i32
    %c0_i32_0 = arith.constant 0 : i32
    %c0_i32_1 = arith.constant 0 : i32
    return %c0_i32, %c0_i32_0 : i32, i32
  }
  func.func @transform_22(%arg0: i32) -> (i32, i32) {
    %c0_i32 = arith.constant 0 : i32
    %c0_i32_0 = arith.constant 0 : i32
    %c0_i32_1 = arith.constant 0 : i32
    return %c0_i32, %c0_i32_0 : i32, i32
  }
  func.func @transform_23(%arg0: i32) -> (i32, i32) {
    %c0_i32 = arith.constant 0 : i32
    %c0_i32_0 = arith.constant 0 : i32
    %c0_i32_1 = arith.constant 0 : i32
    return %c0_i32, %c0_i32_0 : i32, i32
  }
  func.func @transform_24(%arg0: i32) -> (i32, i32) {
    %c0_i32 = arith.constant 0 : i32
    %c0_i32_0 = arith.constant 0 : i32
    %c0_i32_1 = arith.constant 0 : i32
    return %c0_i32, %c0_i32_0 : i32, i32
  }
  func.func @transform_25(%arg0: i32) -> (i32, i32) {
    %c0_i32 = arith.constant 0 : i32
    %c0_i32_0 = arith.constant 0 : i32
    %c0_i32_1 = arith.constant 0 : i32
    return %c0_i32, %c0_i32_0 : i32, i32
  }
  func.func @transform_26(%arg0: i32) -> (i32, i32, i32) {
    %c0_i32 = arith.constant 0 : i32
    %c0_i32_0 = arith.constant 0 : i32
    %c0_i32_1 = arith.constant 0 : i32
    return %arg0, %c0_i32, %c0_i32_0 : i32, i32, i32
  }
}

</mosaic_0001>

<bundles_post_ra>
// kernel: tpu_custom_call.1
= control target key start
LH: loop header
LB: loop body
LE: loop exit
PB: predicated region body
PF: predicated region fallthrough
CT: control target
= control target key end

     0   :  { %s5489_s0 = inlined_call_operand.hbm [shape: f32[2,8,128], index: 0, kind: input, shape index: {}]   ;;  %s5490_s1 = inlined_call_operand.hbm [shape: f32[2,1,8], index: 1, kind: input, shape index: {}]   ;;  %s5491_s2 = inlined_call_operand.hbm [shape: f32[1,128], index: 2, kind: input, shape index: {}]   ;;  %s5492_s3 = inlined_call_operand.hbm [shape: f32[1,128], index: 3, kind: input, shape index: {}]   ;;  %s5493_s4 = inlined_call_operand.hbm [shape: f32[2,128,256], index: 4, kind: input, shape index: {}]   ;;  %s5494_s5 = inlined_call_operand.vmem [shape: f32[2,1,256], index: 5, kind: input, shape index: {}]   ;;  %s5495_s6 = inlined_call_operand.hbm [shape: f32[2,128,256], index: 6, kind: input, shape index: {}]   ;;  %s5496_s7 = inlined_call_operand.vmem [shape: f32[2,1,256], index: 7, kind: input, shape index: {}]   ;;  %s5497_s8 = inlined_call_operand.hbm [shape: f32[2,128,256], index: 8, kind: input, shape index: {}]   ;;  %s5498_s9 = inlined_call_operand.vmem [shape: f32[2,1,256], index: 9, kind: input, shape index: {}]   ;;  %s5499_s10 = inlined_call_operand.hbm [shape: f32[2,256,128], index: 10, kind: input, shape index: {}]   ;;  %s5500_s11 = inlined_call_operand.vmem [shape: f32[2,1,128], index: 11, kind: input, shape index: {}]   ;;  %s5501_s12 = inlined_call_operand.vmem [shape: f32[2,1,128], index: 12, kind: input, shape index: {}]   ;;  %s5502_s13 = inlined_call_operand.vmem [shape: f32[2,1,128], index: 13, kind: input, shape index: {}]   ;;  %s5503_s14 = inlined_call_operand.hbm [shape: f32[2,128,128], index: 14, kind: input, shape index: {}]   ;;  %s5504_s15 = inlined_call_operand.vmem [shape: f32[2,1,128], index: 15, kind: input, shape index: {}]   ;;  %s5505_s16 = inlined_call_operand.hbm [shape: f32[2,128,128], index: 16, kind: input, shape index: {}]   ;;  %s5506_s17 = inlined_call_operand.vmem [shape: f32[2,1,128], index: 17, kind: input, shape index: {}]   ;;  %s5507_s18 = inlined_call_operand.vmem [shape: f32[2,1,128], index: 18, kind: input, shape index: {}]   ;;  %s5508_s19 = inlined_call_operand.vmem [shape: f32[2,1,128], index: 19, kind: input, shape index: {}]   ;;  %s5509_s20 = inlined_call_operand.hbm [shape: f32[128,256], index: 20, kind: input, shape index: {}]   ;;  %s5510_s21 = inlined_call_operand.vmem [shape: f32[1,256], index: 21, kind: input, shape index: {}]   ;;  %s5511_s22 = inlined_call_operand.hbm [shape: f32[256,128], index: 22, kind: input, shape index: {}]   ;;  %s5512_s23 = inlined_call_operand.vmem [shape: f32[1,128], index: 23, kind: input, shape index: {}]   ;;  %s5513_s24 = inlined_call_operand.hbm [shape: f32[128,128], index: 24, kind: input, shape index: {}]   ;;  %s5514_s25 = inlined_call_operand.vmem [shape: f32[1,128], index: 25, kind: input, shape index: {}]   ;;  %s5515_s26 = inlined_call_operand.hbm [shape: f32[2,1,128], index: 26, kind: output, shape index: {}]  }
   0x1   :  { %5536 = sst [smem:[#allocation35_spill]] %s5489_s0 }
   0x2   :  { %5537 = sst [smem:[#allocation36_spill]] %s5490_s1 }
   0x3   :  { %5538 = sst [smem:[#allocation37_spill]] %s5491_s2 }
   0x4   :  { %5539 = sst [smem:[#allocation38_spill]] %s5492_s3 }
   0x5   :  { %5540 = sst [smem:[#allocation39_spill]] %s5493_s4 }
   0x6   :  { %5541 = sst [smem:[#allocation40_spill]] %s5494_s5 }
   0x7   :  { %5542 = sst [smem:[#allocation41_spill]] %s5495_s6 }
   0x8   :  { %5543 = sst [smem:[#allocation42_spill]] %s5496_s7 }
   0x9   :  { %5544 = sst [smem:[#allocation43_spill]] %s5497_s8 }
   0xa   :  { %5545 = sst [smem:[#allocation44_spill]] %s5498_s9 }
   0xb   :  { %5546 = sst [smem:[#allocation45_spill]] %s5499_s10 }
   0xc   :  { %5547 = sst [smem:[#allocation46_spill]] %s5503_s14 }
   0xd   :  { %5548 = sst [smem:[#allocation47_spill]] %s5505_s16 }
   0xe   :  { %5549 = sst [smem:[#allocation48_spill]] %s5509_s20 }
   0xf   :  { %5550 = sst [smem:[#allocation49_spill]] %s5510_s21 }
  0x10   :  { %5551 = sst [smem:[#allocation50_spill]] %s5511_s22 }
  0x11   :  { %5552 = sst [smem:[#allocation51_spill]] %s5512_s23 }
  0x12   :  { %5553 = sst [smem:[#allocation52_spill]] %s5513_s24 }
  0x13   :  { %5554 = sst [smem:[#allocation53_spill]] %s5514_s25 }
  0x14   :  { %5555 = sst [smem:[#allocation54_spill]] %s5515_s26 }
  0x15   :  { %31 = vsyncpa [#allocation3], 0 }
  0x16   :  { %33 = vsyncpa [#allocation3 + $0x1], 0 }
  0x17   :  { %34 = vsyncpa [#allocation6], 0 }
  0x18   :  { %36 = vsyncpa [#allocation6 + $0x1], 0 }
  0x19   :  { %37 = vsyncpa [#allocation9], 0 }
  0x1a   :  { %38 = vsyncpa [#allocation12], 0 }
  0x1b   :  { %39 = vsyncpa [#allocation15], 0 }
  0x1c   :  { %40 = vsyncpa [#allocation18], 0 }
  0x1d   :  { %41 = vsyncpa [#allocation21], 0 }
  0x1e   :  { %42 = vsyncpa [#allocation4], 0 }
  0x1f   :  { %44 = vsyncpa [#allocation4 + $0x1], 0  ;;  %s4879_s27 = smov 0   ;;  %s4881_s3 = smov 0  }
  0x20   :  { %s4883_s7 = smov 0   ;;  %s4885_s28 = smov 0  }
  0x21 LB: > { %5556 = sst [smem:[#allocation33_spill]] %s4718_s7  ;;  %s4724_s8 = smov [#allocation7]   ;;  %s4722_s28 = sphi %s4885_s28, %s5612_s28   ;;  %s4718_s7 = sphi %s4883_s7, %s5609_s7   ;;  %s4714_s3 = sphi %s4881_s3, %s5611_s3   ;;  %s4710_s27 = sphi %s4879_s27, %s5610_s27  }
  0x22   : > { %s650_s4 = sshll.u32 %s4724_s8, 4  ;;  %s4900_s29 = sadd.s32 4294967295, %s4722_s28   ;;  %s651_s4 = int_to_ptr.vmem [resolvable:$true] %s650_s4 }
  0x23   : > { %p3605_p0 = scmp.ge.s32.totalorder %s4722_s28, 1  ;;  %p5522_p1 = scmp.eq.s32.totalorder %s4900_s29, 0 }
  0x24   : > { %p637_p2 = scmp.lt.s32.totalorder %s4722_s28, 3  ;;  %s4725_s9 = smov [#allocation8]  }
  0x25   : > { %s661_s30 = sshll.u32 %s4725_s9, 4  ;;  %s4726_s5 = smov [#allocation11]   ;;  %s662_s30 = int_to_ptr.vmem [resolvable:$true] %s661_s30 }
  0x26   : > { %p4905_p3 = pnand %p3605_p0, %p637_p2  ;;  %s687_s10 = sshll.u32 %s4726_s5, 4  ;;  %s4918_s10 = int_to_ptr.vmem [resolvable:$true] %s687_s10 }
  0x27   : > { %s4299_s1 = scalar_lea.vmem %s651_s4, 16  ;;  %s4306_s8 = scalar_lea.vmem %s651_s4, 32 }
  0x28   : > { %s5557_s0 = scalar_select %p4905_p3, 1, 0 }
  0x29   : > { %p4139_p5 = pneg %p4905_p3  ;;  %p4300_p8 = scmp.ne.s32.totalorder %s651_s4, %s4299_s1 }
  0x2a   : > { %p4307_p11 = scmp.lt.s32.totalorder %s651_s4, %s651_s4  ;;  %p4308_p12 = scmp.lt.s32.totalorder %s4306_s8, %s4299_s1 }
  0x2b   : > { %p4914_p6 = pnand %p4139_p5, %p5522_p1 }
  0x2c   : > { %p4309_p13 = por %p4308_p12, %p4307_p11 }
  0x2d   : > { %p4922_p7 = pneg %p4914_p6 }
  0x2f   : > { %p4302_p9 = pnand %p4300_p8, %p4922_p7 }
  0x31   : > { %p4303_p10 = pneg %p4302_p9 }
  0x33   : > { %p4310_p0 = pnand %p4309_p13, %p4303_p10 }
  0x35   : > { %4313 = shalt.err (!%p4310_p0)
}
  0x36   : > { %s5560_s26 = sld [smem:[#allocation37_spill]]  ;;  %s4325_s25 = scalar_lea.vmem %s662_s30, 16 }
  0x37   : > { %p4326_p2 = scmp.ne.s32.totalorder %s662_s30, %s4325_s25  ;;  %s4332_s23 = scalar_lea.vmem %s662_s30, 32 }
  0x38   : > { %p4333_p8 = scmp.lt.s32.totalorder %s662_s30, %s662_s30  ;;  %p4334_p9 = scmp.lt.s32.totalorder %s4332_s23, %s4325_s25 }
  0x39   : > { %p4328_p5 = pnand %p4326_p2, %p4922_p7 }
  0x3a   : > { %p4335_p1 = por %p4334_p9, %p4333_p8 }
  0x3b   : > { %p4329_p4 = pneg %p4328_p5 }
  0x3c   : > { %4142 = dma.hbm_to_vmem [thread:$0]  (!%p4914_p6), %s5560_s26, 16, %s651_s4, [#allocation6]  }
  0x3d   : > { %p4336_p3 = pnand %p4335_p1, %p4329_p4 }
  0x3f   : > { %4339 = shalt.err (!%p4336_p3)
}
  0x40   : > { %s5561_s21 = sld [smem:[#allocation38_spill]]  ;;  %s4351_s26 = scalar_lea.vmem %s4918_s10, 8192 }
  0x41   : > { %p4352_p10 = scmp.ne.s32.totalorder %s4918_s10, %s4351_s26  ;;  %p4359_p13 = scmp.lt.s32.totalorder %s4918_s10, %s4918_s10 }
  0x42   : > { %p4360_p0 = scmp.lt.s32.totalorder %s4351_s26, %s4351_s26 }
  0x43   : > { %p4354_p11 = pnand %p4352_p10, %p4922_p7 }
  0x44   : > { %p4361_p1 = por %p4360_p0, %p4359_p13 }
  0x45   : > { %p4355_p12 = pneg %p4354_p11 }
  0x46   : > { %4145 = dma.hbm_to_vmem [thread:$0]  (!%p4914_p6), %s5561_s21, 16, %s662_s30, [#allocation9]  }
  0x47   : > { %p4362_p3 = pnand %p4361_p1, %p4355_p12 }
  0x49   : > { %4365 = shalt.err (!%p4362_p3)
}
  0x4a   : > { %s5524_s23 = smov 256   ;;  %s5526_s25 = smov 16  }
  0x4b   : > { %s5562_s30 = sld [smem:[#allocation41_spill]]  ;;  %s4729_s9 = smov [#allocation14]  }
  0x4c   : > { %s719_s5 = sshll.u32 %s4729_s9, 4  ;;  %s720_s5 = int_to_ptr.vmem [resolvable:$true] %s719_s5 }
  0x4d   : > { %s4377_s1 = scalar_lea.vmem %s720_s5, 8192  ;;  %p4385_p8 = scmp.lt.s32.totalorder %s720_s5, %s720_s5 }
  0x4e   : > { %p4378_p4 = scmp.ne.s32.totalorder %s720_s5, %s4377_s1  ;;  %p4386_p9 = scmp.lt.s32.totalorder %s4377_s1, %s4377_s1 }
  0x50   : > { %p4380_p2 = pnand %p4378_p4, %p4922_p7  ;;  %p4387_p10 = por %p4386_p9, %p4385_p8 }
  0x51   : > { %4151 = dma.hbm_to_vmem [thread:$0]  (!%p4914_p6), %s5562_s30, 8192, %s4918_s10, [#allocation12], %s5524_s23, %s5524_s23, %s5526_s25  }
  0x52   : > { %p4381_p5 = pneg %p4380_p2 }
  0x54   : > { %p4388_p11 = pnand %p4387_p10, %p4381_p5 }
  0x56   : > { %4391 = shalt.err (!%p4388_p11)
}
  0x57   : > { %s5528_s8 = smov 128   ;;  %s5530_s26 = smov 8  }
  0x58   : > { %s5563_s4 = sld [smem:[#allocation45_spill]]  ;;  %s4732_s30 = smov [#allocation17]  }
  0x59   : > { %s757_s9 = sshll.u32 %s4732_s30, 4  ;;  %s4733_s23 = smov [#allocation20]   ;;  %s758_s9 = int_to_ptr.vmem [resolvable:$true] %s757_s9 }
  0x5a   : > { %s795_s25 = sshll.u32 %s4733_s23, 4  ;;  %s4403_s1 = scalar_lea.vmem %s758_s9, 4096  ;;  %s796_s25 = int_to_ptr.vmem [resolvable:$true] %s795_s25 }
  0x5b   : > { %p4404_p12 = scmp.ne.s32.totalorder %s758_s9, %s4403_s1  ;;  %p4411_p1 = scmp.lt.s32.totalorder %s758_s9, %s758_s9 }
  0x5c   : > { %p4412_p3 = scmp.lt.s32.totalorder %s4403_s1, %s4403_s1 }
  0x5d   : > { %p4406_p13 = pnand %p4404_p12, %p4922_p7 }
  0x5e   : > { %4157 = dma.hbm_to_vmem [thread:$0]  (!%p4914_p6), %s5563_s4, 8192, %s720_s5, [#allocation15], %s5528_s8, %s5528_s8, %s5530_s26  }
  0x5f   : > { %p4407_p0 = pneg %p4406_p13  ;;  %p4413_p4 = por %p4412_p3, %p4411_p1 }
  0x61   : > { %p4414_p2 = pnand %p4413_p4, %p4407_p0 }
  0x63   : > { %4417 = shalt.err (!%p4414_p2)
}
  0x64   : > { %s5564_s16 = sld [smem:[#allocation47_spill]]  ;;  %s4429_s23 = scalar_lea.vmem %s796_s25, 4096 }
  0x65   : > { %p4430_p5 = scmp.ne.s32.totalorder %s796_s25, %s4429_s23  ;;  %p4437_p10 = scmp.lt.s32.totalorder %s796_s25, %s796_s25 }
  0x66   : > { %p4438_p11 = scmp.lt.s32.totalorder %s4429_s23, %s4429_s23 }
  0x67   : > { %p4432_p8 = pnand %p4430_p5, %p4922_p7 }
  0x68   : > { %p4439_p12 = por %p4438_p11, %p4437_p10 }
  0x69   : > { %p4433_p9 = pneg %p4432_p8 }
  0x6a   : > { %4163 = dma.hbm_to_vmem [thread:$0]  (!%p4914_p6), %s5564_s16, 4096, %s758_s9, [#allocation18], %s5528_s8, %s5528_s8, %s5530_s26  }
  0x6b   : > { %p4440_p13 = pnand %p4439_p12, %p4433_p9 }
  0x6d   : > { %4443 = shalt.err (!%p4440_p13)
}
  0x6e   : > { %s5565_s22 = sld [smem:[#allocation50_spill]]  ;;  %s4734_s30 = smov [#allocation10]  }
  0x6f   : > { %s671_s9 = sshll.u32 %s4734_s30, 4  ;;  %s4735_s1 = smov [#allocation13]   ;;  %s672_s9 = int_to_ptr.vmem [resolvable:$true] %s671_s9 }
  0x70   : > { %s703_s5 = sshll.u32 %s4735_s1, 4  ;;  %s4455_s10 = scalar_lea.vmem %s672_s9, 8192  ;;  %s704_s5 = int_to_ptr.vmem [resolvable:$true] %s703_s5 }
  0x71   : > { %p4456_p0 = scmp.ne.s32.totalorder %s672_s9, %s4455_s10  ;;  %p4463_p4 = scmp.lt.s32.totalorder %s672_s9, %s672_s9 }
  0x72   : > { %p4464_p2 = scmp.lt.s32.totalorder %s4455_s10, %s4455_s10 }
  0x73   : > { %p4458_p1 = pnand %p4456_p0, %p4922_p7 }
  0x74   : > { %4169 = dma.hbm_to_vmem [thread:$0]  (!%p4914_p6), %s5565_s22, 4096, %s796_s25, [#allocation21], %s5528_s8, %s5528_s8, %s5530_s26  }
  0x75   : > { %p4459_p3 = pneg %p4458_p1  ;;  %p4465_p5 = por %p4464_p2, %p4463_p4 }
  0x77   : > { %p4466_p8 = pnand %p4465_p5, %p4459_p3 }
  0x79   : > { %4469 = shalt.err (!%p4466_p8)
}
  0x7a   : > { %s5566_s23 = smov 16   ;;  %s5567_s25 = smov 256  }
  0x7b   : > { %s5568_s30 = sld [smem:[#allocation39_spill]]  ;;  %s4481_s1 = scalar_lea.vmem %s704_s5, 8192 }
  0x7c   : > { %p4482_p9 = scmp.ne.s32.totalorder %s704_s5, %s4481_s1  ;;  %p4489_p12 = scmp.lt.s32.totalorder %s704_s5, %s704_s5 }
  0x7d   : > { %p4490_p13 = scmp.lt.s32.totalorder %s4481_s1, %s4481_s1 }
  0x7e   : > { %p4484_p10 = pnand %p4482_p9, %p4922_p7 }
  0x7f   : > { %p4491_p0 = por %p4490_p13, %p4489_p12 }
  0x80   : > { %p4485_p11 = pneg %p4484_p10 }
  0x81   : > { %4148 = dma.hbm_to_vmem [thread:$0]  (!%p4914_p6), %s5568_s30, 8192, %s672_s9, [#allocation9], %s5567_s25, %s5567_s25, %s5566_s23  }
  0x82   : > { %p4492_p1 = pnand %p4491_p0, %p4485_p11 }
  0x84   : > { %4495 = shalt.err (!%p4492_p1)
}
  0x85   : > { %s5569_s21 = sld [smem:[#allocation43_spill]]  ;;  %s4736_s9 = smov [#allocation16]  }
  0x86   : > { %s741_s4 = sshll.u32 %s4736_s9, 4  ;;  %s4737_s30 = smov [#allocation19]   ;;  %s742_s4 = int_to_ptr.vmem [resolvable:$true] %s741_s4 }
  0x87   : > { %s779_s26 = sshll.u32 %s4737_s30, 4  ;;  %s4507_s1 = scalar_lea.vmem %s742_s4, 4096  ;;  %s780_s26 = int_to_ptr.vmem [resolvable:$true] %s779_s26 }
  0x88   : > { %p4508_p3 = scmp.ne.s32.totalorder %s742_s4, %s4507_s1  ;;  %p4515_p5 = scmp.lt.s32.totalorder %s742_s4, %s742_s4 }
  0x89   : > { %p4516_p8 = scmp.lt.s32.totalorder %s4507_s1, %s4507_s1 }
  0x8a   : > { %p4510_p4 = pnand %p4508_p3, %p4922_p7 }
  0x8b   : > { %4154 = dma.hbm_to_vmem [thread:$0]  (!%p4914_p6), %s5569_s21, 8192, %s704_s5, [#allocation12], %s5567_s25, %s5567_s25, %s5566_s23  }
  0x8c   : > { %p4511_p2 = pneg %p4510_p4  ;;  %p4517_p9 = por %p4516_p8, %p4515_p5 }
  0x8e   : > { %p4518_p10 = pnand %p4517_p9, %p4511_p2 }
  0x90   : > { %4521 = shalt.err (!%p4518_p10)
}
  0x91   : > { %s5570_s8 = smov 8   ;;  %s5571_s5 = smov 128  }
  0x92   : > { %s5572_s14 = sld [smem:[#allocation46_spill]]  ;;  %s4533_s9 = scalar_lea.vmem %s780_s26, 4096 }
  0x93   : > { %p4534_p11 = scmp.ne.s32.totalorder %s780_s26, %s4533_s9  ;;  %p4541_p0 = scmp.lt.s32.totalorder %s780_s26, %s780_s26 }
  0x94   : > { %p4542_p1 = scmp.lt.s32.totalorder %s4533_s9, %s4533_s9 }
  0x95   : > { %p4536_p12 = pnand %p4534_p11, %p4922_p7 }
  0x96   : > { %p4543_p3 = por %p4542_p1, %p4541_p0 }
  0x97   : > { %p4537_p13 = pneg %p4536_p12 }
  0x98   : > { %4160 = dma.hbm_to_vmem [thread:$0]  (!%p4914_p6), %s5572_s14, 4096, %s742_s4, [#allocation15], %s5571_s5, %s5571_s5, %s5570_s8  }
  0x99   : > { %p4544_p4 = pnand %p4543_p3, %p4537_p13 }
  0x9b   : > { %4547 = shalt.err (!%p4544_p4)
}
  0x9c   : > { %s5573_s20 = sld [smem:[#allocation48_spill]]  ;;  %s4738_s4 = smov [#allocation22]  }
  0x9d   : > { %s811_s10 = sshll.u32 %s4738_s4, 4  ;;  %s812_s10 = int_to_ptr.vmem [resolvable:$true] %s811_s10 }
  0x9e   : > { %s4559_s21 = scalar_lea.vmem %s812_s10, 2048  ;;  %p4567_p9 = scmp.lt.s32.totalorder %s812_s10, %s812_s10 }
  0x9f   : > { %p4560_p2 = scmp.ne.s32.totalorder %s812_s10, %s4559_s21  ;;  %p4568_p10 = scmp.lt.s32.totalorder %s4559_s21, %s4559_s21 }
  0xa1   : > { %p4562_p5 = pnand %p4560_p2, %p4922_p7  ;;  %p4569_p11 = por %p4568_p10, %p4567_p9 }
  0xa2   : > { %4166 = dma.hbm_to_vmem [thread:$0]  (!%p4914_p6), %s5573_s20, 4096, %s780_s26, [#allocation18], %s5567_s25, %s5567_s25, %s5566_s23  }
  0xa3   : > { %p4563_p8 = pneg %p4562_p5 }
  0xa5   : > { %p4570_p12 = pnand %p4569_p11, %p4563_p8 }
  0xa7   : > { %4573 = shalt.err (!%p4570_p12)
}
  0xa8   : > { %s5574_s24 = sld [smem:[#allocation52_spill]]  ;;  %s3604_s2 = sadd.s32 4294967294, %s4722_s28  }
  0xa9   : > { %s5037_s6 = sadd.s32 1, %s4722_s28   ;;  %s57_s23 = sadd.s32 1, %s4718_s7 }
  0xaa   : > { %s54_s25 = ssub.s32 %s4722_s28, %s5037_s6  ;;  %p64_p7 = scmp.ne.s32.totalorder %s4718_s7, %s4714_s3 }
  0xab   : > { %p55_p13 = scmp.eq.s32.totalorder %s54_s25, 0  ;;  %p65_p0 = scmp.eq.s32.totalorder %s4722_s28, 0 }
  0xac   : > { %p70_p1 = scmp.ne.s32.totalorder %s4714_s3, %s4710_s27  ;;  %p624_p3 = scmp.eq.s32.totalorder %s4900_s29, 1 }
  0xad   : > { %s5049_s30 = scalar_select %p55_p13, %s4718_s7, %s57_s23  }
  0xae   : > { %4172 = dma.hbm_to_vmem [thread:$0]  (!%p4914_p6), %s5574_s24, 2048, %s812_s10, [#allocation21], %s5571_s5, %s5571_s5, %s5570_s8  }
  0xaf   : > { %5575 = sst [smem:[#allocation34_spill]] %s5049_s30  ;;  %p66_p4 = por %p65_p0, %p64_p7 }
  0xb0   : > { %p5576_p2 = scmp.eq.s32.totalorder %s4900_s29, 0  ;;  %p5057_p6 = por %p624_p3, %p64_p7 }
  0xb1   : > { %p630_p8 = scmp.eq.s32.totalorder %s3604_s2, 1  ;;  %p4195_p9 = scmp.lt.s32.totalorder %s4722_s28, 2 }
  0xb2   : > { %p5053_p5 = por %p5576_p2, %p70_p1  ;;  %s5063_s1 = sand.u32 1, %s4718_s7  }
  0xb3   : > { %s5578_s5 = scalar_select %p5057_p6, 1, 0 }
  0xb4   : > { %s5577_s8 = scalar_select %p5053_p5, 1, 0 }
  0xb5   : > { %p5065_p10 = por %p630_p8, %p70_p1  ;;  %s3618_s10 = sshll.u32 %s5063_s1, 3 }
  0xb6   : > { %s3619_s21 = sshll.u32 %s4722_s28, 7  ;;  %s5580_s23 = sld [smem:[#allocation35_spill]] }
  0xb7   : > { %s5579_s4 = scalar_select %p5065_p10, 1, 0 }
  0xb8   : > { %s832_s2 = scalar_lea.vmem [#allocation2], %s3618_s10  ;;  %p5076_p11 = pnand %p4195_p9, %p66_p4 }
  0xb9   : > { %s839_s14 = sshll.u32 %s832_s2, 4  ;;  %s829_s22 = scalar_lea.sflag [#allocation3], %s5063_s1  ;;  %s840_s14 = int_to_ptr.vmem [resolvable:$true] %s839_s14 }
  0xba   : > { %p4576_p7 = pneg %p5076_p11 }
  0xbc   : > { %s5074_s25 = scalar_lea.hbm %s5580_s23, %s3619_s21  ;;  %s4579_s9 = scalar_lea.hbm %s5580_s23, 256 }
  0xbd   : > { %s4574_s24 = scalar_lea.hbm %s5074_s25, 128  ;;  %p4580_p1 = scmp.lt.s32.totalorder %s5074_s25, %s5580_s23 }
  0xbe   : > { %p4575_p12 = scmp.ne.s32.totalorder %s5074_s25, %s4574_s24  ;;  %p4581_p3 = scmp.lt.s32.totalorder %s4579_s9, %s4574_s24 }
  0xc0   : > { %p4577_p13 = pnand %p4576_p7, %p4575_p12  ;;  %p4582_p4 = por %p4581_p3, %p4580_p1 }
  0xc2   : > { %p4578_p0 = pneg %p4577_p13 }
  0xc4   : > { %p4583_p2 = pnand %p4582_p4, %p4578_p0 }
  0xc6   : > { %4586 = shalt.err (!%p4583_p2)
}
  0xc7   : > { %s4587_s20 = scalar_lea.vmem %s840_s14, 128  ;;  %s4739_s30 = smov [#allocation2]  }
  0xc8   : > { %p4588_p8 = scmp.ne.s32.totalorder %s840_s14, %s4587_s20  ;;  %s4592_s7 = sshll.u32 %s4739_s30, 4  ;;  %s4593_s7 = int_to_ptr.vmem [resolvable:$false] %s4592_s7 }
  0xc9   : > { %s4594_s21 = scalar_lea.vmem %s4593_s7, 256  ;;  %p4595_p13 = scmp.lt.s32.totalorder %s840_s14, %s4593_s7 }
  0xca   : > { %p4590_p9 = pnand %p4588_p8, %p4576_p7  ;;  %p4596_p10 = scmp.lt.s32.totalorder %s4594_s21, %s4587_s20 }
  0xcc   : > { %p4591_p12 = pneg %p4590_p9  ;;  %p4597_p6 = por %p4596_p10, %p4595_p13 }
  0xce   : > { %p4598_p5 = pnand %p4597_p6, %p4591_p12 }
  0xd0   : > { %4601 = shalt.err (!%p4598_p5)
}
  0xd1   : > { %4176 = dma.hbm_to_vmem [thread:$0]  (!%p5076_p11), %s5074_s25, 128, %s840_s14, %s829_s22  }
  0xd2   : > { %s3620_s24 = sshll.u32 %s4722_s28, 4  ;;  %s5582_s26 = sld [smem:[#allocation36_spill]] }
  0xd3   : > { %s849_s20 = scalar_lea.vmem [#allocation5], %s5063_s1  ;;  %s5583_s2 = sand.u32 1, %s4722_s28  }
  0xd4   : > { %s856_s7 = sshll.u32 %s849_s20, 4  ;;  %s847_s21 = scalar_lea.sflag [#allocation6], %s5583_s2  ;;  %s857_s7 = int_to_ptr.vmem [resolvable:$true] %s856_s7 }
  0xd8   : > { %s5106_s30 = scalar_lea.hbm %s5582_s26, %s3620_s24  ;;  %s4607_s25 = scalar_lea.hbm %s5582_s26, 32 }
  0xd9   : > { %s4602_s23 = scalar_lea.hbm %s5106_s30, 16  ;;  %p4608_p0 = scmp.lt.s32.totalorder %s5106_s30, %s5582_s26 }
  0xda   : > { %p4603_p5 = scmp.ne.s32.totalorder %s5106_s30, %s4602_s23  ;;  %p4609_p1 = scmp.lt.s32.totalorder %s4607_s25, %s4602_s23 }
  0xdc   : > { %p4605_p6 = pnand %p4603_p5, %p4576_p7  ;;  %p4610_p3 = por %p4609_p1, %p4608_p0 }
  0xde   : > { %p4606_p10 = pneg %p4605_p6 }
  0xe0   : > { %p4611_p4 = pnand %p4610_p3, %p4606_p10 }
  0xe2   : > { %4614 = shalt.err (!%p4611_p4)
}
  0xe3   : > { %s4615_s1 = scalar_lea.vmem %s857_s7, 16  ;;  %s4740_s9 = smov [#allocation5]  }
  0xe4   : > { %p4616_p2 = scmp.ne.s32.totalorder %s857_s7, %s4615_s1  ;;  %s4620_s20 = sshll.u32 %s4740_s9, 4  ;;  %s4621_s20 = int_to_ptr.vmem [resolvable:$false] %s4620_s20 }
  0xe5   : > { %s4622_s2 = scalar_lea.vmem %s4621_s20, 32  ;;  %p4623_p12 = scmp.lt.s32.totalorder %s857_s7, %s4621_s20 }
  0xe6   : > { %p4618_p8 = pnand %p4616_p2, %p4576_p7  ;;  %p4624_p13 = scmp.lt.s32.totalorder %s4622_s2, %s4615_s1 }
  0xe8   : > { %p4619_p9 = pneg %p4618_p8  ;;  %p4625_p5 = por %p4624_p13, %p4623_p12 }
  0xea   : > { %p4626_p6 = pnand %p4625_p5, %p4619_p9 }
  0xec   : > { %4629 = shalt.err (!%p4626_p6)
}
  0xed   : > { %4179 = dma.hbm_to_vmem [thread:$0]  (!%p5076_p11), %s5106_s30, 16, %s857_s7, %s847_s21  }
  0xee   : > { %p5584_p10 = scmp.ne.s32.totalorder %s5557_s0, 0 }
  0xef   : > { %s5132_s23 = sand.u32 (!%p5584_p10), 1, %s4714_s3   ;;  %p5585_p7 = scmp.ne.s32.totalorder (!%p5584_p10), %s5577_s8, 0 }
  0xf0   : > { %865 = sbr.rel (%p5584_p10) target bundleno = 5780 (0x1694), region = 124  ;;  %s3622_s14 = sshll.u32 (!%p5584_p10), %s5132_s23, 3 }
  0xf1   : > { %s868_s22 = scalar_lea.sflag (!%p5584_p10), [#allocation3], %s5132_s23  ;;  %s871_s25 = scalar_lea.vmem (!%p5584_p10), [#allocation2], %s3622_s14 }
  0xf5   : > { %4673 = dma.done.wait (%p5585_p7), %s868_s22, 128  }
  0xf6   : > { %4675 = vsyncadd (%p5585_p7), %s868_s22, 4294967168  ;;  %s876_s16 = sand.u32 1, %s4900_s29   ;;  %s879_s30 = scalar_lea.vmem [#allocation5], %s5132_s23 }
  0xf7   : > { %s877_s0 = scalar_lea.sflag [#allocation6], %s876_s16 }
  0xf8   : > { %4677 = dma.done.wait (%p5585_p7), %s877_s0, 16  }
  0xf9   : > { %4679 = vsyncadd (%p5585_p7), %s877_s0, 4294967280  ;;  %p5586_p11 = scmp.eq.s32.totalorder %s4900_s29, 0 }
  0xfb   : > { %4681 = dma.done.wait (%p5586_p11), [#allocation6], 16   ;;  %p5587_p0 = pmov %p5586_p11 }
  0xfd   : > { %4683 = vsyncadd (%p5587_p0), [#allocation6], 4294967280  ;;  %p5588_p1 = pmov %p5587_p0 }
  0xfe   : > { %p5589_p3 = pmov %p5587_p0 }
  0xff   : > { %4685 = dma.done.wait (%p5588_p1), [#allocation9], 8208  }
 0x100   : > { %4687 = vsyncadd (%p5589_p3), [#allocation9], 4294959088  ;;  %p5590_p4 = pmov %p5587_p0 }
 0x101   : > { %p5591_p2 = pmov %p5587_p0 }
 0x102   : > { %4689 = dma.done.wait (%p5590_p4), [#allocation12], 16384  }
 0x103   : > { %4691 = vsyncadd (%p5591_p2), [#allocation12], 4294950912  ;;  %p5592_p8 = pmov %p5587_p0 }
 0x104   : > { %p5593_p9 = pmov %p5587_p0 }
 0x105   : > { %4693 = dma.done.wait (%p5592_p8), [#allocation15], 12288  }
 0x106   : > { %4695 = vsyncadd (%p5593_p9), [#allocation15], 4294955008  ;;  %p5594_p12 = pmov %p5587_p0 }
 0x107   : > { %p5595_p13 = pmov %p5587_p0 }
 0x108   : > { %4697 = dma.done.wait (%p5594_p12), [#allocation18], 8192  }
 0x109   : > { %4699 = vsyncadd (%p5595_p13), [#allocation18], 4294959104  ;;  %p5596_p5 = pmov %p5587_p0 }
 0x10a   : > { %p5597_p6 = pmov %p5587_p0 }
 0x10b   : > { %4701 = dma.done.wait (%p5596_p5), [#allocation21], 6144  }
 0x10c   : > { %4703 = vsyncadd (%p5597_p6), [#allocation21], 4294961152  ;;  %v5170_v0 = vld [vmem:[%s871_s25] sm:$0xff]  ;;  %v1055_v7 = vld [vmem:[#allocation10 + $0xe0] sm:$0xff]  ;;  %vm4742_vm0 = vmmov 0   ;;  %s5598_s21 = sld [smem:[#allocation42_spill]] }
 0x10d   : > { %v1058_v1 = vld [vmem:[#allocation10 + $0xf8] sm:$0xff]  ;;  %v1057_v2 = vld [vmem:[#allocation10 + $0xf0] sm:$0xff]  ;;  %999 = vadd.xlane.f32.xlu0 %v5170_v0  ;;  %v1001_v3 = vmul.f32 %v5170_v0, %v5170_v0  ;;  %v1056_v5 = vld [vmem:[#allocation10 + $0xe8] sm:$0xff]  ;;  %s5599_s1 = sld [smem:[#allocation40_spill]]  ;;  %vm1450_vm1 = vcmask 64512   ;;  %s3665_s10 = sshll.u32 %s4900_s29, 4 }
 0x10e   : > { %1071 = vmatprep.subr.mxu0 %v1058_v1  ;;  %v1173_v4 = vld [vmem:[#allocation11 + $0xf8] sm:$0xff]  ;;  %v1172_v6 = vld [vmem:[#allocation11 + $0xf0] sm:$0xff]  ;;  %v1171_v8 = vld [vmem:[#allocation11 + $0xe8] sm:$0xff]  ;;  %s5600_s2 = sld [smem:[#allocation44_spill]]  ;;  %s3402_s16 = scalar_lea.sflag [#allocation4], %s5132_s23 }
 0x10f   : > { %1072 = vmatpush1.msra.mxu0 %v1057_v2  ;;  %1186 = vmatprep.subr.mxu1 %v1173_v4  ;;  %v1054_v9 = vld [vmem:[#allocation10 + $0xd8] sm:$0xff]  ;;  %v1170_v10 = vld [vmem:[#allocation11 + $0xe0] sm:$0xff]  ;;  %v1053_v11 = vld [vmem:[#allocation10 + $0xd0] sm:$0xff]  ;;  %v4741_v4 = vmov 0.0   ;;  %s5601_s22 = sld [smem:[#allocation49_spill]]  ;;  %p5605_p7 = scmp.ne.s32.totalorder %s5578_s5, 0 }
 0x110   : > { %1073 = vmatprep.subr.mxu0 %v1056_v5  ;;  %1187 = vmatpush1.msra.mxu1 %v1172_v6  ;;  %v1169_v12 = vld [vmem:[#allocation11 + $0xd8] sm:$0xff]  ;;  %v1052_v13 = vld [vmem:[#allocation10 + $0xc8] sm:$0xff]  ;;  %v1168_v14 = vld [vmem:[#allocation11 + $0xd0] sm:$0xff]  ;;  %s5602_s0 = sld [smem:[#allocation51_spill]]  ;;  %s4743_s8 = smov [#allocation23]  }
 0x111   : > { %1002 = vadd.xlane.f32.xlu0 %v1001_v3  ;;  %1074 = vmatpush1.msra.mxu0 %v1055_v7  ;;  %v1051_v15 = vld [vmem:[#allocation10 + $0xc0] sm:$0xff]  ;;  %v1167_v16 = vld [vmem:[#allocation11 + $0xc8] sm:$0xff]  ;;  %v1050_v17 = vld [vmem:[#allocation10 + $0xb8] sm:$0xff]  ;;  %s5603_s24 = sld [smem:[#allocation53_spill]]  ;;  %s4634_s29 = sshll.u32 %s4743_s8, 4  ;;  %s4635_s29 = int_to_ptr.vmem [resolvable:$false] %s4634_s29 }
 0x112   : > { %1188 = vmatprep.subr.mxu1 %v1171_v8  ;;  %1075 = vmatprep.subr.mxu0 %v1054_v9  ;;  %v1166_v18 = vld [vmem:[#allocation11 + $0xc0] sm:$0xff]  ;;  %v1049_v19 = vld [vmem:[#allocation10 + $0xb0] sm:$0xff]  ;;  %v1165_v20 = vld [vmem:[#allocation11 + $0xb8] sm:$0xff]  ;;  %s4636_s7 = scalar_lea.vmem %s4635_s29, 32 }
 0x113   : > { %1189 = vmatpush1.msra.mxu1 %v1170_v10  ;;  %1076 = vmatpush1.msra.mxu0 %v1053_v11  ;;  %v1048_v21 = vld [vmem:[#allocation10 + $0xa8] sm:$0xff]  ;;  %v1164_v22 = vld [vmem:[#allocation11 + $0xb0] sm:$0xff]  ;;  %v1047_v23 = vld [vmem:[#allocation10 + $0xa0] sm:$0xff] }
 0x114   : > { %1190 = vmatprep.subr.mxu1 %v1169_v12  ;;  %1077 = vmatprep.subr.mxu0 %v1052_v13  ;;  %v1163_v24 = vld [vmem:[#allocation11 + $0xa8] sm:$0xff]  ;;  %v1046_v25 = vld [vmem:[#allocation10 + $0x98] sm:$0xff]  ;;  %v1162_v26 = vld [vmem:[#allocation11 + $0xa0] sm:$0xff] }
 0x115   : > { %1191 = vmatpush1.msra.mxu1 %v1168_v14  ;;  %1078 = vmatpush1.msra.mxu0 %v1051_v15  ;;  %v1045_v27 = vld [vmem:[#allocation10 + $0x90] sm:$0xff]  ;;  %v1161_v28 = vld [vmem:[#allocation11 + $0x98] sm:$0xff]  ;;  %v1044_v29 = vld [vmem:[#allocation10 + $0x88] sm:$0xff] }
 0x116   : > { %1192 = vmatprep.subr.mxu1 %v1167_v16  ;;  %1079 = vmatprep.subr.mxu0 %v1050_v17  ;;  %v1160_v30 = vld [vmem:[#allocation11 + $0x90] sm:$0xff]  ;;  %v1043_v31 = vld [vmem:[#allocation10 + $0x80] sm:$0xff]  ;;  %v1159_v32 = vld [vmem:[#allocation11 + $0x88] sm:$0xff] }
 0x117   : > { %1193 = vmatpush1.msra.mxu1 %v1166_v18  ;;  %1080 = vmatpush1.msra.mxu0 %v1049_v19  ;;  %v1042_v33 = vld [vmem:[#allocation10 + $0x78] sm:$0xff]  ;;  %v1158_v34 = vld [vmem:[#allocation11 + $0x80] sm:$0xff]  ;;  %v1041_v35 = vld [vmem:[#allocation10 + $0x70] sm:$0xff] }
 0x118   : > { %1194 = vmatprep.subr.mxu1 %v1165_v20  ;;  %1081 = vmatprep.subr.mxu0 %v1048_v21  ;;  %v1157_v36 = vld [vmem:[#allocation11 + $0x78] sm:$0xff]  ;;  %v1040_v37 = vld [vmem:[#allocation10 + $0x68] sm:$0xff]  ;;  %v1156_v38 = vld [vmem:[#allocation11 + $0x70] sm:$0xff] }
 0x119   : > { %1195 = vmatpush1.msra.mxu1 %v1164_v22  ;;  %1082 = vmatpush1.msra.mxu0 %v1047_v23  ;;  %v1039_v39 = vld [vmem:[#allocation10 + $0x60] sm:$0xff]  ;;  %v1155_v40 = vld [vmem:[#allocation11 + $0x68] sm:$0xff]  ;;  %v1038_v41 = vld [vmem:[#allocation10 + $0x58] sm:$0xff] }
 0x11a   : > { %1196 = vmatprep.subr.mxu1 %v1163_v24  ;;  %1083 = vmatprep.subr.mxu0 %v1046_v25  ;;  %v1154_v42 = vld [vmem:[#allocation11 + $0x60] sm:$0xff]  ;;  %v1037_v43 = vld [vmem:[#allocation10 + $0x50] sm:$0xff]  ;;  %v1153_v44 = vld [vmem:[#allocation11 + $0x58] sm:$0xff] }
 0x11b   : > { %1197 = vmatpush1.msra.mxu1 %v1162_v26  ;;  %1084 = vmatpush1.msra.mxu0 %v1045_v27  ;;  %v1036_v45 = vld [vmem:[#allocation10 + $0x48] sm:$0xff]  ;;  %v1152_v46 = vld [vmem:[#allocation11 + $0x50] sm:$0xff]  ;;  %v1035_v47 = vld [vmem:[#allocation10 + $0x40] sm:$0xff] }
 0x11c   : > { %1198 = vmatprep.subr.mxu1 %v1161_v28  ;;  %1085 = vmatprep.subr.mxu0 %v1044_v29  ;;  %v1151_v48 = vld [vmem:[#allocation11 + $0x48] sm:$0xff]  ;;  %v1034_v49 = vld [vmem:[#allocation10 + $0x38] sm:$0xff]  ;;  %v1150_v50 = vld [vmem:[#allocation11 + $0x40] sm:$0xff] }
 0x11d   : > { %1199 = vmatpush1.msra.mxu1 %v1160_v30  ;;  %1086 = vmatpush1.msra.mxu0 %v1043_v31  ;;  %v1033_v51 = vld [vmem:[#allocation10 + $0x30] sm:$0xff]  ;;  %v1149_v52 = vld [vmem:[#allocation11 + $0x38] sm:$0xff]  ;;  %v1032_v53 = vld [vmem:[#allocation10 + $0x28] sm:$0xff] }
 0x11e   : > { %1200 = vmatprep.subr.mxu1 %v1159_v32  ;;  %1087 = vmatprep.subr.mxu0 %v1042_v33  ;;  %v1148_v54 = vld [vmem:[#allocation11 + $0x30] sm:$0xff]  ;;  %v1031_v55 = vld [vmem:[#allocation10 + $0x20] sm:$0xff]  ;;  %v1147_v56 = vld [vmem:[#allocation11 + $0x28] sm:$0xff] }
 0x11f   : > { %1201 = vmatpush1.msra.mxu1 %v1158_v34  ;;  %1088 = vmatpush1.msra.mxu0 %v1041_v35  ;;  %v1030_v57 = vld [vmem:[#allocation10 + $0x18] sm:$0xff]  ;;  %v1146_v58 = vld [vmem:[#allocation11 + $0x20] sm:$0xff]  ;;  %v1029_v59 = vld [vmem:[#allocation10 + $0x10] sm:$0xff] }
 0x120   : > { %1202 = vmatprep.subr.mxu1 %v1157_v36  ;;  %1089 = vmatprep.subr.mxu0 %v1040_v37  ;;  %v1145_v60 = vld [vmem:[#allocation11 + $0x18] sm:$0xff]  ;;  %v1028_v61 = vld [vmem:[#allocation10 + $0x8] sm:$0xff]  ;;  %v1144_v62 = vld [vmem:[#allocation11 + $0x10] sm:$0xff] }
 0x121   : > { %1203 = vmatpush1.msra.mxu1 %v1156_v38  ;;  %1090 = vmatpush1.msra.mxu0 %v1039_v39  ;;  %v1027_v63 = vld [vmem:[#allocation10] sm:$0xff]  ;;  %v1143_v1 = vld [vmem:[#allocation11 + $0x8] sm:$0xff]  ;;  %v1288_v3 = vld [vmem:[#allocation13 + $0xf8] sm:$0xff] }
 0x122   : > { %1204 = vmatprep.subr.mxu1 %v1155_v40  ;;  %1091 = vmatprep.subr.mxu0 %v1038_v41  ;;  %v1142_v2 = vld [vmem:[#allocation11] sm:$0xff]  ;;  %v3634_v14 = vld [vmem:[#allocation7] ss:$0 sm:$0xff]  ;;  %v3635_v16 = vld [vmem:[#allocation8] ss:$0 sm:$0xff] }
 0x123   : > { %1205 = vmatpush1.msra.mxu1 %v1154_v42  ;;  %1092 = vmatpush1.msra.mxu0 %v1037_v43  ;;  %v1287_v19 = vld [vmem:[#allocation13 + $0xf0] sm:$0xff]  ;;  %v1286_v20 = vld [vmem:[#allocation13 + $0xe8] sm:$0xff]  ;;  %v1285_v21 = vld [vmem:[#allocation13 + $0xe0] sm:$0xff] }
 0x124   : > { %1206 = vmatprep.subr.mxu1 %v1153_v44  ;;  %1093 = vmatprep.subr.mxu0 %v1036_v45  ;;  %v1284_v22 = vld [vmem:[#allocation13 + $0xd8] sm:$0xff]  ;;  %v1282_v23 = vld [vmem:[#allocation13 + $0xc8] sm:$0xff]  ;;  %v1281_v24 = vld [vmem:[#allocation13 + $0xc0] sm:$0xff] }
 0x125   : > { %1207 = vmatpush1.msra.mxu1 %v1152_v46  ;;  %1094 = vmatpush1.msra.mxu0 %v1035_v47  ;;  %v1280_v25 = vld [vmem:[#allocation13 + $0xb8] sm:$0xff]  ;;  %v1279_v26 = vld [vmem:[#allocation13 + $0xb0] sm:$0xff]  ;;  %v1278_v27 = vld [vmem:[#allocation13 + $0xa8] sm:$0xff] }
 0x126   : > { %1208 = vmatprep.subr.mxu1 %v1151_v48  ;;  %1095 = vmatprep.subr.mxu0 %v1034_v49  ;;  %v1277_v28 = vld [vmem:[#allocation13 + $0xa0] sm:$0xff]  ;;  %v1276_v29 = vld [vmem:[#allocation13 + $0x98] sm:$0xff]  ;;  %v1275_v30 = vld [vmem:[#allocation13 + $0x90] sm:$0xff]  ;;  %v1061_v49 = vlaneseq }
 0x127   : > { %1209 = vmatpush1.msra.mxu1 %v1150_v50  ;;  %1096 = vmatpush1.msra.mxu0 %v1033_v51  ;;  %v1274_v31 = vld [vmem:[#allocation13 + $0x88] sm:$0xff]  ;;  %v1273_v32 = vld [vmem:[#allocation13 + $0x80] sm:$0xff]  ;;  %v1272_v33 = vld [vmem:[#allocation13 + $0x78] sm:$0xff] }
 0x128   : > { %1210 = vmatprep.subr.mxu1 %v1149_v52  ;;  %1097 = vmatprep.subr.mxu0 %v1032_v53  ;;  %v1271_v34 = vld [vmem:[#allocation13 + $0x70] sm:$0xff]  ;;  %v1270_v35 = vld [vmem:[#allocation13 + $0x68] sm:$0xff]  ;;  %v1269_v36 = vld [vmem:[#allocation13 + $0x60] sm:$0xff]  ;;  %v1062_v50 = vshrl.u32 %v1061_v49, 7 }
 0x129   : > { %1211 = vmatpush1.msra.mxu1 %v1148_v54  ;;  %1098 = vmatpush1.msra.mxu0 %v1031_v55  ;;  %v1268_v37 = vld [vmem:[#allocation13 + $0x58] sm:$0xff]  ;;  %v1267_v38 = vld [vmem:[#allocation13 + $0x50] sm:$0xff]  ;;  %v1266_v39 = vld [vmem:[#allocation13 + $0x48] sm:$0xff] }
 0x12a   : > { %1212 = vmatprep.subr.mxu1 %v1147_v56  ;;  %1099 = vmatprep.subr.mxu0 %v1030_v57  ;;  %v1265_v40 = vld [vmem:[#allocation13 + $0x40] sm:$0xff]  ;;  %v1264_v41 = vld [vmem:[#allocation13 + $0x38] sm:$0xff]  ;;  %v1263_v42 = vld [vmem:[#allocation13 + $0x30] sm:$0xff]  ;;  %v5190_v51 = vsub.s32 0, %v1062_v50 }
 0x12b   : > { %1213 = vmatpush1.msra.mxu1 %v1146_v58  ;;  %1100 = vmatpush1.msra.mxu0 %v1029_v59  ;;  %v1262_v43 = vld [vmem:[#allocation13 + $0x28] sm:$0xff]  ;;  %v1261_v44 = vld [vmem:[#allocation13 + $0x20] sm:$0xff]  ;;  %v1260_v45 = vld [vmem:[#allocation13 + $0x18] sm:$0xff] }
 0x12c   : > { %1214 = vmatprep.subr.mxu1 %v1145_v60  ;;  %1101 = vmatprep.subr.mxu0 %v1028_v61  ;;  %v1259_v46 = vld [vmem:[#allocation13 + $0x10] sm:$0xff]  ;;  %v1258_v47 = vld [vmem:[#allocation13 + $0x8] sm:$0xff]  ;;  %v1257_v48 = vld [vmem:[#allocation13] sm:$0xff] }
 0x12d   : > { %1215 = vmatpush1.msra.mxu1 %v1144_v62  ;;  %1102 = vmatpush1.msra.mxu0 %v1027_v63  ;;  %v1174_v52 = vld [vmem:[%s5598_s21] sm:$0x3]  ;;  %v1718_v49 = vld [vmem:[#allocation14 + $0xd8] sm:$0xff] }
 0x12e   : > { %1216 = vmatprep.subr.mxu1 %v1143_v1  ;;  %1135 = vmatprep.mubr.f32.mxu0 %v4741_v4  ;;  %v1059_v53 = vld [vmem:[%s5599_s1] sm:$0x3]  ;;  %v1179_v54 = vrot.slane %v1174_v52, %v5190_v51 }
 0x12f   : > { %1217 = vmatpush1.msra.mxu1 %v1142_v2  ;;  %1250 = vmatprep.mubr.f32.mxu1 %v4741_v4  ;;  %v1064_v55 = vrot.slane %v1059_v53, %v5190_v51  ;;  %v1289_v60 = vld [vmem:[%s5600_s2] sm:$0x3] }
 0x130   : > { %1301 = vmatprep.subr.mxu0 %v1288_v3  ;;  %3874 = vmatprep.subr.mxu1 %v4741_v4  ;;  %v1294_v61 = vrot.slane %v1289_v60, %v5190_v51 }
 0x196   : > { %v1000_v5 = vpop.xlane.xlu0 %999 }
 0x197   : > { %v1005_v6 = vmul.f32 0.03125, %v1000_v5  ;;  %v5210_v5 = vld [vmem:[%s879_s30] ss:$0 sm:$0xff] }
 0x199   : > { %v1007_v8 = vmul.f32 %v1005_v6, %v1005_v6  ;;  %v1009_v12 = vsub.f32 %v5170_v0, %v1005_v6  ;;  %v1283_v0 = vld [vmem:[#allocation13 + $0xd0] sm:$0xff] }
 0x19a   : > { %v1003_v7 = vpop.xlane.xlu0 %1002 }
 0x19b   : > { %v1006_v9 = vmul.f32 0.03125, %v1003_v7 }
 0x19d   : > { %v1008_v10 = vsub.f32 %v1006_v9, %v1007_v8 }
 0x19f   : > { %v1010_v11 = vadd.f32 1e-12, %v1008_v10 }
 0x1a1   : > { %4257 = vrsqrt.f32 %v1010_v11 }
 0x1ae   : > { %v4258_v13 = vpop.eup %4257 }
 0x1af   : > { %v1012_v15 = vmul.f32 %v4258_v13, %v1009_v12 }
 0x1b1   : > { %v1019_v17 = vmul.f32 %v3634_v14, %v1012_v15 }
 0x1b3   : > { %v5179_v18 = vadd.f32 %v3635_v16, %v1019_v17  ;;  %v5215_v16 = vsub.s32 1, %v1062_v50  ;;  %v1702_v50 = vld [vmem:[#allocation14 + $0x58] sm:$0xff] }
 0x1b5   : > { %1136 = vmatmul.mubr.f32.vlgmr.msra.gmra.mxu0 %v5179_v18  ;;  %1251 = vmatmul.mubr.f32.vlgmr.msra.gmra.mxu1 %v5179_v18  ;;  %v1183_v17 = vrot.slane %v1174_v52, %v5215_v16  ;;  %v1717_v52 = vld [vmem:[#allocation14 + $0xd0] sm:$0xff] }
 0x1b6   : > { %1302 = vmatpush1.msra.mxu0 %v1287_v19  ;;  %1365 = vmatprep.mubr.f32.mxu0 %v4741_v4 }
 0x1b7   : > { %1303 = vmatprep.subr.mxu0 %v1286_v20  ;;  %3876 = vmatprep.mubr.msk.f32.mxu1 %vm4742_vm0, %v4741_v4  ;;  %v1068_v20 = vrot.slane %v1059_v53, %v5215_v16  ;;  %v1701_v53 = vld [vmem:[#allocation14 + $0x50] sm:$0xff] }
 0x1b8   : > { %1304 = vmatpush1.msra.mxu0 %v1285_v21 }
 0x1b9   : > { %1305 = vmatprep.subr.mxu0 %v1284_v22 }
 0x1ba   : > { %1306 = vmatpush1.msra.mxu0 %v1283_v0  ;;  %v1298_v0 = vrot.slane %v1289_v60, %v5215_v16  ;;  %v1713_v60 = vld [vmem:[#allocation14 + $0xb0] sm:$0xff] }
 0x1bb   : > { %1307 = vmatprep.subr.mxu0 %v1282_v23 }
 0x1bc   : > { %1308 = vmatpush1.msra.mxu0 %v1281_v24 }
 0x1bd   : > { %1309 = vmatprep.subr.mxu0 %v1280_v25 }
 0x1be   : > { %1310 = vmatpush1.msra.mxu0 %v1279_v26 }
 0x1bf   : > { %1311 = vmatprep.subr.mxu0 %v1278_v27 }
 0x1c0   : > { %1312 = vmatpush1.msra.mxu0 %v1277_v28 }
 0x1c1   : > { %1313 = vmatprep.subr.mxu0 %v1276_v29 }
 0x1c2   : > { %1314 = vmatpush1.msra.mxu0 %v1275_v30 }
 0x1c3   : > { %1315 = vmatprep.subr.mxu0 %v1274_v31 }
 0x1c4   : > { %1316 = vmatpush1.msra.mxu0 %v1273_v32 }
 0x1c5   : > { %1317 = vmatprep.subr.mxu0 %v1272_v33 }
 0x1c6   : > { %1318 = vmatpush1.msra.mxu0 %v1271_v34 }
 0x1c7   : > { %1319 = vmatprep.subr.mxu0 %v1270_v35 }
 0x1c8   : > { %1320 = vmatpush1.msra.mxu0 %v1269_v36 }
 0x1c9   : > { %1321 = vmatprep.subr.mxu0 %v1268_v37 }
 0x1ca   : > { %1322 = vmatpush1.msra.mxu0 %v1267_v38  ;;  %v1722_v38 = vld [vmem:[#allocation14 + $0xf8] sm:$0xff] }
 0x1cb   : > { %1323 = vmatprep.subr.mxu0 %v1266_v39 }
 0x1cc   : > { %1324 = vmatpush1.msra.mxu0 %v1265_v40 }
 0x1cd   : > { %1325 = vmatprep.subr.mxu0 %v1264_v41 }
 0x1ce   : > { %1326 = vmatpush1.msra.mxu0 %v1263_v42  ;;  %v1706_v42 = vld [vmem:[#allocation14 + $0x78] sm:$0xff] }
 0x1cf   : > { %1327 = vmatprep.subr.mxu0 %v1262_v43  ;;  %v1721_v43 = vld [vmem:[#allocation14 + $0xf0] sm:$0xff] }
 0x1d0   : > { %1328 = vmatpush1.msra.mxu0 %v1261_v44  ;;  %v1705_v44 = vld [vmem:[#allocation14 + $0x70] sm:$0xff] }
 0x1d1   : > { %1329 = vmatprep.subr.mxu0 %v1260_v45  ;;  %v1720_v45 = vld [vmem:[#allocation14 + $0xe8] sm:$0xff] }
 0x1d2   : > { %1330 = vmatpush1.msra.mxu0 %v1259_v46  ;;  %v1704_v46 = vld [vmem:[#allocation14 + $0x68] sm:$0xff] }
 0x1d3   : > { %1331 = vmatprep.subr.mxu0 %v1258_v47  ;;  %v1719_v47 = vld [vmem:[#allocation14 + $0xe0] sm:$0xff] }
 0x1d4   : > { %1332 = vmatpush1.msra.mxu0 %v1257_v48  ;;  %v1703_v48 = vld [vmem:[#allocation14 + $0x60] sm:$0xff] }
 0x1d5   : > { %1366 = vmatmul.mubr.f32.vlgmr.msra.gmra.mxu0 %v5179_v18  ;;  %3894 = vmatprep.subr.mxu0 %v4741_v4 }
 0x1d6   : > { %3926 = vmatprep.mubr.msk.f32.mxu0 %vm4742_vm0, %v4741_v4 }
 0x275   : > { %v1252_v56 = vpop.f32.mrf.mxu1  ;;  %v1137_v57 = vpop.f32.mrf.mxu0 }
 0x276   : > { %v1253_v58 = vadd.f32 %v1252_v56, %v1179_v54  ;;  %v1138_v59 = vadd.f32 %v1137_v57, %v1064_v55  ;;  %v1716_v54 = vld [vmem:[#allocation14 + $0xc8] sm:$0xff]  ;;  %v1715_v56 = vld [vmem:[#allocation14 + $0xc0] sm:$0xff] }
 0x277   : > { %v1139_v62 = vpop.f32.mrf.mxu0  ;;  %v1254_v2 = vpop.f32.mrf.mxu1  ;;  %v1700_v55 = vld [vmem:[#allocation14 + $0x48] sm:$0xff]  ;;  %v1699_v57 = vld [vmem:[#allocation14 + $0x40] sm:$0xff] }
 0x278   : > { %3875 = vmatpush3.xpose.msra.mxu1 %v1253_v58  ;;  %v1255_v22 = vadd.f32 %v1254_v2, %v1183_v17  ;;  %v1140_v24 = vadd.f32 %v1139_v62, %v1068_v20  ;;  %v1714_v58 = vld [vmem:[#allocation14 + $0xb8] sm:$0xff]  ;;  %v1712_v62 = vld [vmem:[#allocation14 + $0xa8] sm:$0xff]  ;;  %v1695_v2 = vld [vmem:[#allocation14 + $0x20] sm:$0xff] }
 0x279   : > { %3879 = vmatprep.subr.mxu1 %v4741_v4  ;;  %v1844_v17 = vld [vmem:[#allocation16 + $0x70] sm:$0xff]  ;;  %v3639_v20 = vld [vmem:[%s5500_s11] ss:$0 sm:$0xff] }
 0x27b   : > { %3877 = vmatmul.mubr.f32.vlgmr.msra.gmra.mxu1 %v1138_v59  ;;  %v1698_v59 = vld [vmem:[#allocation14 + $0x38] sm:$0xff] }
 0x27c   : > { %3881 = vmatprep.mubr.msk.f32.mxu1 %vm4742_vm0, %v4741_v4 }
 0x295   : > { %v1367_v63 = vpop.f32.mrf.mxu0 }
 0x296   : > { %v1368_v1 = vadd.f32 %v1367_v63, %v1294_v61  ;;  %v1697_v61 = vld [vmem:[#allocation14 + $0x30] sm:$0xff]  ;;  %v1696_v63 = vld [vmem:[#allocation14 + $0x28] sm:$0xff] }
 0x297   : > { %v1369_v23 = vpop.f32.mrf.mxu0 }
 0x298   : > { %3880 = vmatpush3.msra.mxu1 %v1368_v1  ;;  %v1370_v25 = vadd.f32 %v1369_v23, %v1298_v0  ;;  %v1711_v1 = vld [vmem:[#allocation14 + $0xa0] sm:$0xff] }
 0x299   : > { %3884 = vmatprep.subr.mxu1 %v4741_v4 }
 0x33b   : > { %v1438_v3 = vpop.f32.mrf.mxu1 }
 0x33c   : > { %v1442_v6 = vmul.f32 0.25, %v1438_v3  ;;  %v1710_v3 = vld [vmem:[#allocation14 + $0x98] sm:$0xff] }
 0x33d   : > { %v3878_v7 = vpop.f32.mrf.mxu1 }
 0x33e   : > { %v1449_v8 = vadd.f32 %v5210_v5, %v1442_v6  ;;  %v1694_v6 = vld [vmem:[#allocation14 + $0x18] sm:$0xff]  ;;  %v1709_v7 = vld [vmem:[#allocation14 + $0x90] sm:$0xff] }
 0x340   : > { %v1451_v9 = vsel %vm1450_vm1, %v1449_v8, -inf }
 0x341   : > { %1452 = vmax.xlane.f32.xlu1 %v1451_v9  ;;  %v1708_v9 = vld [vmem:[#allocation14 + $0x88] sm:$0xff] }
 0x3ca   : > { %v1453_v10 = vpop.xlane.xlu1 %1452 }
 0x3cb   : > { %v1454_v11 = vsub.f32 %v1449_v8, %v1453_v10  ;;  %v1693_v8 = vld [vmem:[#allocation14 + $0x10] sm:$0xff]  ;;  %v1692_v10 = vld [vmem:[#allocation14 + $0x8] sm:$0xff] }
 0x3cd   : > { %v1455_v12 = vmul.f32 1.442695, %v1454_v11  ;;  %v1707_v11 = vld [vmem:[#allocation14 + $0x80] sm:$0xff] }
 0x3cf   : > { %4259 = vpow2.f32 %v1455_v12  ;;  %v1691_v12 = vld [vmem:[#allocation14] sm:$0xff] }
 0x3dc   : > { %v4260_v13 = vpop.eup %4259 }
 0x3dd   : > { %v1457_v14 = vsel %vm1450_vm1, %v4260_v13, 0.0 }
 0x3de   : > { %1458 = vadd.xlane.f32.xlu1 %v1457_v14 }
 0x467   : > { %v1459_v15 = vpop.xlane.xlu1 %1458 }
 0x468   : > { %4261 = vrcp.f32 %v1459_v15  ;;  %v1845_v15 = vld [vmem:[#allocation16 + $0x78] sm:$0xff] }
 0x469   : > { %3895 = vmatpush3.msra.mxu0 %v1845_v15 }
 0x46a   : > { %3896 = vmatprep.subr.mxu0 %v4741_v4 }
 0x46b   : > { %3897 = vmatpush3.msra.mxu0 %v1844_v17 }
 0x46c   : > { %3898 = vmatprep.subr.mxu0 %v4741_v4 }
 0x475   : > { %v4262_v19 = vpop.eup %4261 }
 0x476   : > { %v1461_v21 = vmul.f32 %v4262_v19, %v4260_v13 }
 0x478   : > { %3882 = vmatmul.mubr.msk.f32.vlgmr.msra.gmra.mxu1 %vm1450_vm1, %v1461_v21 }
 0x479   : > { %3885 = vmatpush3.xpose.msra.mxu1 %v1255_v22  ;;  %3886 = vmatprep.mubr.msk.f32.mxu1 %vm4742_vm0, %v4741_v4 }
 0x47a   : > { %3889 = vmatprep.subr.mxu1 %v4741_v4 }
 0x47c   : > { %3887 = vmatmul.mubr.f32.vlgmr.msra.gmra.mxu1 %v1140_v24 }
 0x47d   : > { %3890 = vmatpush3.msra.mxu1 %v1370_v25  ;;  %3891 = vmatprep.mubr.msk.f32.mxu1 %vm4742_vm0, %v4741_v4  ;;  %v1843_v25 = vld [vmem:[#allocation16 + $0x68] sm:$0xff] }
 0x47e   : > { %3676 = vmatprep.subr.mxu1 %v1722_v38  ;;  %3899 = vmatpush3.msra.mxu0 %v1843_v25  ;;  %v2085_v25 = vld [vmem:[#allocation10 + $0x1e8] sm:$0xff] }
 0x47f   : > { %3900 = vmatprep.subr.mxu0 %v4741_v4 }
 0x538   : > { %v5226_v26 = vpop.f32.mrf.mxu1 }
 0x53a   : > { %v3883_v27 = vpop.f32.mrf.mxu1 }
 0x53b   : > { %v1841_v27 = vld [vmem:[#allocation16 + $0x58] sm:$0xff] }
 0x53c   : > { %v1601_v28 = vpop.f32.mrf.mxu1 }
 0x53d   : > { %v1605_v29 = vmul.f32 0.25, %v1601_v28  ;;  %v1840_v28 = vld [vmem:[#allocation16 + $0x50] sm:$0xff] }
 0x53e   : > { %v3888_v30 = vpop.f32.mrf.mxu1 }
 0x53f   : > { %v1606_v31 = vadd.f32 %v5210_v5, %v1605_v29  ;;  %v1839_v29 = vld [vmem:[#allocation16 + $0x48] sm:$0xff]  ;;  %v1837_v30 = vld [vmem:[#allocation16 + $0x38] sm:$0xff] }
 0x541   : > { %v1607_v32 = vsel %vm1450_vm1, %v1606_v31, -inf }
 0x542   : > { %1608 = vmax.xlane.f32.xlu0 %v1607_v32  ;;  %v1835_v32 = vld [vmem:[#allocation16 + $0x28] sm:$0xff] }
 0x5cb   : > { %v1609_v33 = vpop.xlane.xlu0 %1608 }
 0x5cc   : > { %v1610_v34 = vsub.f32 %v1606_v31, %v1609_v33  ;;  %v1836_v31 = vld [vmem:[#allocation16 + $0x30] sm:$0xff]  ;;  %v1834_v33 = vld [vmem:[#allocation16 + $0x20] sm:$0xff] }
 0x5ce   : > { %v1611_v35 = vmul.f32 1.442695, %v1610_v34  ;;  %v1833_v34 = vld [vmem:[#allocation16 + $0x18] sm:$0xff] }
 0x5d0   : > { %4263 = vpow2.f32 %v1611_v35  ;;  %v1832_v35 = vld [vmem:[#allocation16 + $0x10] sm:$0xff] }
 0x5dd   : > { %v4264_v36 = vpop.eup %4263 }
 0x5de   : > { %v1613_v37 = vsel %vm1450_vm1, %v4264_v36, 0.0 }
 0x5df   : > { %1614 = vadd.xlane.f32.xlu1 %v1613_v37  ;;  %v1830_v37 = vld [vmem:[#allocation16] sm:$0xff] }
 0x668   : > { %v1615_v39 = vpop.xlane.xlu1 %1614 }
 0x669   : > { %4265 = vrcp.f32 %v1615_v39 }
 0x676   : > { %v4266_v40 = vpop.eup %4265 }
 0x677   : > { %v1617_v41 = vmul.f32 %v4266_v40, %v4264_v36  ;;  %v1831_v36 = vld [vmem:[#allocation16 + $0x8] sm:$0xff] }
 0x679   : > { %3892 = vmatmul.mubr.msk.f32.vlgmr.msra.gmra.mxu1 %vm1450_vm1, %v1617_v41 }
 0x67a   : > { %3677 = vmatpush3.msra.mxu1 %v1706_v42 }
 0x67b   : > { %3678 = vmatprep.subr.mxu1 %v1721_v43 }
 0x67c   : > { %3679 = vmatpush3.msra.mxu1 %v1705_v44 }
 0x67d   : > { %3680 = vmatprep.subr.mxu1 %v1720_v45 }
 0x67e   : > { %3681 = vmatpush3.msra.mxu1 %v1704_v46 }
 0x67f   : > { %3682 = vmatprep.subr.mxu1 %v1719_v47  ;;  %v3640_v47 = vld [vmem:[%s5501_s12] ss:$0 sm:$0xff] }
 0x680   : > { %3683 = vmatpush3.msra.mxu1 %v1703_v48 }
 0x681   : > { %3684 = vmatprep.subr.mxu1 %v1718_v49  ;;  %v3641_v49 = vld [vmem:[%s5502_s13] ss:$0 sm:$0xff] }
 0x682   : > { %3685 = vmatpush3.msra.mxu1 %v1702_v50 }
 0x683   : > { %3686 = vmatprep.subr.mxu1 %v1717_v52 }
 0x684   : > { %3687 = vmatpush3.msra.mxu1 %v1701_v53  ;;  %v1947_v53 = vld [vmem:[#allocation17 + $0x78] sm:$0xff] }
 0x685   : > { %3688 = vmatprep.subr.mxu1 %v1716_v54  ;;  %v1946_v54 = vld [vmem:[#allocation17 + $0x70] sm:$0xff] }
 0x686   : > { %3689 = vmatpush3.msra.mxu1 %v1700_v55  ;;  %v1945_v55 = vld [vmem:[#allocation17 + $0x68] sm:$0xff] }
 0x687   : > { %3690 = vmatprep.subr.mxu1 %v1715_v56  ;;  %v1944_v56 = vld [vmem:[#allocation17 + $0x60] sm:$0xff] }
 0x688   : > { %3691 = vmatpush3.msra.mxu1 %v1699_v57  ;;  %v1943_v57 = vld [vmem:[#allocation17 + $0x58] sm:$0xff] }
 0x689   : > { %3692 = vmatprep.subr.mxu1 %v1714_v58  ;;  %v1942_v58 = vld [vmem:[#allocation17 + $0x50] sm:$0xff] }
 0x68a   : > { %3693 = vmatpush3.msra.mxu1 %v1698_v59  ;;  %v1941_v59 = vld [vmem:[#allocation17 + $0x48] sm:$0xff] }
 0x68b   : > { %3694 = vmatprep.subr.mxu1 %v1713_v60  ;;  %v1940_v60 = vld [vmem:[#allocation17 + $0x40] sm:$0xff] }
 0x68c   : > { %3695 = vmatpush3.msra.mxu1 %v1697_v61  ;;  %v1939_v61 = vld [vmem:[#allocation17 + $0x38] sm:$0xff] }
 0x68d   : > { %3696 = vmatprep.subr.mxu1 %v1712_v62  ;;  %v1938_v62 = vld [vmem:[#allocation17 + $0x30] sm:$0xff] }
 0x68e   : > { %3697 = vmatpush3.msra.mxu1 %v1696_v63  ;;  %v1937_v63 = vld [vmem:[#allocation17 + $0x28] sm:$0xff] }
 0x68f   : > { %3698 = vmatprep.subr.mxu1 %v1711_v1  ;;  %v1936_v1 = vld [vmem:[#allocation17 + $0x20] sm:$0xff] }
 0x690   : > { %3699 = vmatpush3.msra.mxu1 %v1695_v2  ;;  %v1935_v2 = vld [vmem:[#allocation17 + $0x18] sm:$0xff] }
 0x691   : > { %3700 = vmatprep.subr.mxu1 %v1710_v3  ;;  %v1934_v3 = vld [vmem:[#allocation17 + $0x10] sm:$0xff] }
 0x692   : > { %3701 = vmatpush3.msra.mxu1 %v1694_v6  ;;  %v1933_v6 = vld [vmem:[#allocation17 + $0x8] sm:$0xff] }
 0x693   : > { %3702 = vmatprep.subr.mxu1 %v1709_v7  ;;  %v1932_v7 = vld [vmem:[#allocation17] sm:$0xff] }
 0x694   : > { %3703 = vmatpush3.msra.mxu1 %v1693_v8  ;;  %v3642_v8 = vld [vmem:[%s5504_s15] ss:$0 sm:$0xff] }
 0x695   : > { %3704 = vmatprep.subr.mxu1 %v1708_v9 }
 0x696   : > { %3705 = vmatpush3.msra.mxu1 %v1692_v10 }
 0x697   : > { %3706 = vmatprep.subr.mxu1 %v1707_v11 }
 0x698   : > { %3707 = vmatpush3.msra.mxu1 %v1691_v12 }
 0x699   : > { %3929 = vmatprep.subr.mxu1 %v4741_v4 }
 0x739   : > { %v1687_v13 = vpop.f32.mrf.mxu1 }
 0x73a   : > { %1794 = vmatprep.mubr.f32.mxu1 %v1687_v13 }
 0x73b   : > { %v3893_v14 = vpop.f32.mrf.mxu1  ;;  %1795 = vmatmul.mubr.f32.vlgmr.msra.gmra.mxu1 %v5226_v26  ;;  %v1842_v26 = vld [vmem:[#allocation16 + $0x60] sm:$0xff] }
 0x73c   : > { %3961 = vmatprep.mubr.msk.f32.mxu1 %vm4742_vm0, %v4741_v4  ;;  %3901 = vmatpush3.msra.mxu0 %v1842_v26  ;;  %v2203_v26 = vld [vmem:[#allocation11 + $0x1f0] sm:$0xff] }
 0x73d   : > { %3902 = vmatprep.subr.mxu0 %v4741_v4  ;;  %3930 = vmatpush3.msra.mxu1 %v1947_v53  ;;  %v2074_v53 = vld [vmem:[#allocation10 + $0x190] sm:$0xff] }
 0x73e   : > { %3903 = vmatpush3.msra.mxu0 %v1841_v27  ;;  %3931 = vmatprep.subr.mxu1 %v4741_v4  ;;  %v2084_v27 = vld [vmem:[#allocation10 + $0x1e0] sm:$0xff] }
 0x73f   : > { %3904 = vmatprep.subr.mxu0 %v4741_v4  ;;  %3932 = vmatpush3.msra.mxu1 %v1946_v54  ;;  %v2192_v54 = vld [vmem:[#allocation11 + $0x198] sm:$0xff] }
 0x740   : > { %3905 = vmatpush3.msra.mxu0 %v1840_v28  ;;  %3933 = vmatprep.subr.mxu1 %v4741_v4  ;;  %v2202_v28 = vld [vmem:[#allocation11 + $0x1e8] sm:$0xff] }
 0x741   : > { %3906 = vmatprep.subr.mxu0 %v4741_v4  ;;  %3934 = vmatpush3.msra.mxu1 %v1945_v55  ;;  %v2073_v55 = vld [vmem:[#allocation10 + $0x188] sm:$0xff] }
 0x742   : > { %3907 = vmatpush3.msra.mxu0 %v1839_v29  ;;  %3935 = vmatprep.subr.mxu1 %v4741_v4  ;;  %v2083_v29 = vld [vmem:[#allocation10 + $0x1d8] sm:$0xff] }
 0x743   : > { %3908 = vmatprep.subr.mxu0 %v4741_v4  ;;  %3936 = vmatpush3.msra.mxu1 %v1944_v56  ;;  %v2191_v56 = vld [vmem:[#allocation11 + $0x190] sm:$0xff] }
 0x744   : > { %3937 = vmatprep.subr.mxu1 %v4741_v4 }
 0x745   : > { %3938 = vmatpush3.msra.mxu1 %v1943_v57  ;;  %v2072_v57 = vld [vmem:[#allocation10 + $0x180] sm:$0xff] }
 0x746   : > { %3939 = vmatprep.subr.mxu1 %v4741_v4 }
 0x747   : > { %3940 = vmatpush3.msra.mxu1 %v1942_v58  ;;  %v2190_v58 = vld [vmem:[#allocation11 + $0x188] sm:$0xff] }
 0x748   : > { %3941 = vmatprep.subr.mxu1 %v4741_v4 }
 0x749   : > { %3942 = vmatpush3.msra.mxu1 %v1941_v59  ;;  %v2071_v59 = vld [vmem:[#allocation10 + $0x178] sm:$0xff] }
 0x74a   : > { %3943 = vmatprep.subr.mxu1 %v4741_v4 }
 0x74b   : > { %3944 = vmatpush3.msra.mxu1 %v1940_v60  ;;  %v2189_v60 = vld [vmem:[#allocation11 + $0x180] sm:$0xff] }
 0x74c   : > { %3945 = vmatprep.subr.mxu1 %v4741_v4 }
 0x74d   : > { %3946 = vmatpush3.msra.mxu1 %v1939_v61  ;;  %v2070_v61 = vld [vmem:[#allocation10 + $0x170] sm:$0xff] }
 0x74e   : > { %3947 = vmatprep.subr.mxu1 %v4741_v4 }
 0x74f   : > { %3948 = vmatpush3.msra.mxu1 %v1938_v62  ;;  %v2188_v62 = vld [vmem:[#allocation11 + $0x178] sm:$0xff] }
 0x750   : > { %3949 = vmatprep.subr.mxu1 %v4741_v4 }
 0x751   : > { %3950 = vmatpush3.msra.mxu1 %v1937_v63  ;;  %v2069_v63 = vld [vmem:[#allocation10 + $0x168] sm:$0xff] }
 0x752   : > { %3951 = vmatprep.subr.mxu1 %v4741_v4 }
 0x753   : > { %3952 = vmatpush3.msra.mxu1 %v1936_v1  ;;  %v2187_v1 = vld [vmem:[#allocation11 + $0x170] sm:$0xff] }
 0x754   : > { %3953 = vmatprep.subr.mxu1 %v4741_v4 }
 0x755   : > { %3954 = vmatpush3.msra.mxu1 %v1935_v2  ;;  %v2068_v2 = vld [vmem:[#allocation10 + $0x160] sm:$0xff] }
 0x756   : > { %3955 = vmatprep.subr.mxu1 %v4741_v4 }
 0x757   : > { %3956 = vmatpush3.msra.mxu1 %v1934_v3  ;;  %v2186_v3 = vld [vmem:[#allocation11 + $0x168] sm:$0xff] }
 0x758   : > { %3957 = vmatprep.subr.mxu1 %v4741_v4 }
 0x759   : > { %3958 = vmatpush3.msra.mxu1 %v1933_v6  ;;  %v2067_v6 = vld [vmem:[#allocation10 + $0x158] sm:$0xff] }
 0x75a   : > { %3959 = vmatprep.subr.mxu1 %v4741_v4 }
 0x75b   : > { %3960 = vmatpush3.msra.mxu1 %v1932_v7  ;;  %v2185_v7 = vld [vmem:[#allocation11 + $0x160] sm:$0xff] }
 0x7fb   : > { %v3708_v19 = vpop.f32.mrf.mxu1 }
 0x7fd   : > { %v3709_v21 = vpop.f32.mrf.mxu1 }
 0x7fe   : > { %v3710_v22 = vadd.f32 %v3709_v21, %v3708_v19 }
 0x800   : > { %v1797_v0 = vadd.f32 %v3710_v22, %v3639_v20 }
 0x802   : > { %v1800_v23 = vadd.f32 %v1797_v0, %v5179_v18  ;;  %v1838_v18 = vld [vmem:[#allocation16 + $0x40] sm:$0xff]  ;;  %v2087_v0 = vld [vmem:[#allocation10 + $0x1f8] sm:$0xff] }
 0x803   : > { %3909 = vmatpush3.msra.mxu0 %v1838_v18  ;;  %v2201_v18 = vld [vmem:[#allocation11 + $0x1e0] sm:$0xff] }
 0x804   : > { %1803 = vadd.xlane.f32.xlu0 %v1800_v23  ;;  %v1805_v24 = vmul.f32 %v1800_v23, %v1800_v23  ;;  %3910 = vmatprep.subr.mxu0 %v4741_v4 }
 0x805   : > { %3911 = vmatpush3.msra.mxu0 %v1837_v30  ;;  %v3643_v30 = vld [vmem:[%s5506_s17] ss:$0 sm:$0xff] }
 0x806   : > { %1806 = vadd.xlane.f32.xlu1 %v1805_v24  ;;  %3912 = vmatprep.subr.mxu0 %v4741_v4  ;;  %v2204_v24 = vld [vmem:[#allocation11 + $0x1f8] sm:$0xff] }
 0x807   : > { %3913 = vmatpush3.msra.mxu0 %v1836_v31  ;;  %2218 = vmatprep.subr.mxu1 %v2204_v24  ;;  %v2177_v24 = vld [vmem:[#allocation11 + $0x120] sm:$0xff] }
 0x808   : > { %3914 = vmatprep.subr.mxu0 %v4741_v4 }
 0x809   : > { %3915 = vmatpush3.msra.mxu0 %v1835_v32 }
 0x80a   : > { %3916 = vmatprep.subr.mxu0 %v4741_v4 }
 0x80b   : > { %3917 = vmatpush3.msra.mxu0 %v1834_v33 }
 0x80c   : > { %3918 = vmatprep.subr.mxu0 %v4741_v4 }
 0x80d   : > { %3919 = vmatpush3.msra.mxu0 %v1833_v34 }
 0x80e   : > { %3920 = vmatprep.subr.mxu0 %v4741_v4 }
 0x80f   : > { %3921 = vmatpush3.msra.mxu0 %v1832_v35 }
 0x810   : > { %3922 = vmatprep.subr.mxu0 %v4741_v4 }
 0x811   : > { %3923 = vmatpush3.msra.mxu0 %v1831_v36  ;;  %v2082_v36 = vld [vmem:[#allocation10 + $0x1d0] sm:$0xff] }
 0x812   : > { %3924 = vmatprep.subr.mxu0 %v4741_v4 }
 0x813   : > { %3925 = vmatpush3.msra.mxu0 %v1830_v37  ;;  %v2200_v37 = vld [vmem:[#allocation11 + $0x1d8] sm:$0xff] }
 0x814   : > { %2101 = vmatprep.subr.mxu0 %v2087_v0  ;;  %v2178_v0 = vld [vmem:[#allocation11 + $0x128] sm:$0xff] }
 0x88d   : > { %v1804_v38 = vpop.xlane.xlu0 %1803 }
 0x88e   : > { %v1808_v39 = vmul.f32 0.03125, %v1804_v38  ;;  %v2081_v38 = vld [vmem:[#allocation10 + $0x1c8] sm:$0xff] }
 0x88f   : > { %v1807_v40 = vpop.xlane.xlu1 %1806 }
 0x890   : > { %v1810_v41 = vmul.f32 %v1808_v39, %v1808_v39  ;;  %v1809_v42 = vmul.f32 0.03125, %v1807_v40  ;;  %v1812_v45 = vsub.f32 %v1800_v23, %v1808_v39  ;;  %v2086_v23 = vld [vmem:[#allocation10 + $0x1f0] sm:$0xff]  ;;  %v2080_v40 = vld [vmem:[#allocation10 + $0x1c0] sm:$0xff] }
 0x891   : > { %v2199_v39 = vld [vmem:[#allocation11 + $0x1d0] sm:$0xff] }
 0x892   : > { %v1811_v43 = vsub.f32 %v1809_v42, %v1810_v41  ;;  %v2198_v41 = vld [vmem:[#allocation11 + $0x1c8] sm:$0xff]  ;;  %v2079_v42 = vld [vmem:[#allocation10 + $0x1b8] sm:$0xff] }
 0x894   : > { %v1813_v44 = vadd.f32 1e-12, %v1811_v43  ;;  %v2197_v43 = vld [vmem:[#allocation11 + $0x1c0] sm:$0xff] }
 0x896   : > { %4267 = vrsqrt.f32 %v1813_v44  ;;  %v2078_v44 = vld [vmem:[#allocation10 + $0x1b0] sm:$0xff] }
 0x8a3   : > { %v4268_v46 = vpop.eup %4267 }
 0x8a4   : > { %v1815_v48 = vmul.f32 %v4268_v46, %v1812_v45  ;;  %v2196_v45 = vld [vmem:[#allocation11 + $0x1b8] sm:$0xff]  ;;  %v2077_v46 = vld [vmem:[#allocation10 + $0x1a8] sm:$0xff] }
 0x8a6   : > { %v1822_v50 = vmul.f32 %v3640_v47, %v1815_v48  ;;  %v2195_v47 = vld [vmem:[#allocation11 + $0x1b0] sm:$0xff]  ;;  %v2076_v48 = vld [vmem:[#allocation10 + $0x1a0] sm:$0xff] }
 0x8a8   : > { %v5261_v52 = vadd.f32 %v3641_v49, %v1822_v50  ;;  %v2194_v49 = vld [vmem:[#allocation11 + $0x1a8] sm:$0xff]  ;;  %v2075_v50 = vld [vmem:[#allocation10 + $0x198] sm:$0xff] }
 0x8aa   : > { %3927 = vmatmul.mubr.f32.vlgmr.msra.gmra.mxu0 %v5261_v52 }
 0x8ab   : > { %2165 = vmatprep.mubr.f32.mxu0 %v4741_v4  ;;  %2102 = vmatpush1.msra.mxu0 %v2086_v23  ;;  %v2059_v23 = vld [vmem:[#allocation10 + $0x118] sm:$0xff] }
 0x8ac   : > { %2103 = vmatprep.subr.mxu0 %v2085_v25  ;;  %v2058_v25 = vld [vmem:[#allocation10 + $0x110] sm:$0xff] }
 0x8ad   : > { %2104 = vmatpush1.msra.mxu0 %v2084_v27  ;;  %v2057_v27 = vld [vmem:[#allocation10 + $0x108] sm:$0xff] }
 0x8ae   : > { %2105 = vmatprep.subr.mxu0 %v2083_v29  ;;  %v2056_v29 = vld [vmem:[#allocation10 + $0x100] sm:$0xff] }
 0x8af   : > { %2106 = vmatpush1.msra.mxu0 %v2082_v36 }
 0x8b0   : > { %2107 = vmatprep.subr.mxu0 %v2081_v38 }
 0x8b1   : > { %2108 = vmatpush1.msra.mxu0 %v2080_v40 }
 0x8b2   : > { %2109 = vmatprep.subr.mxu0 %v2079_v42  ;;  %v3644_v42 = vld [vmem:[%s5507_s18] ss:$0 sm:$0xff] }
 0x8b3   : > { %2110 = vmatpush1.msra.mxu0 %v2078_v44  ;;  %v3645_v44 = vld [vmem:[%s5508_s19] ss:$0 sm:$0xff] }
 0x8b4   : > { %2111 = vmatprep.subr.mxu0 %v2077_v46 }
 0x8b5   : > { %2112 = vmatpush1.msra.mxu0 %v2076_v48  ;;  %v2319_v48 = vld [vmem:[#allocation13 + $0x1e8] sm:$0xff] }
 0x8b6   : > { %2113 = vmatprep.subr.mxu0 %v2075_v50  ;;  %v2316_v50 = vld [vmem:[#allocation13 + $0x1d0] sm:$0xff] }
 0x8b7   : > { %2114 = vmatpush1.msra.mxu0 %v2074_v53  ;;  %v2314_v53 = vld [vmem:[#allocation13 + $0x1c0] sm:$0xff] }
 0x8b8   : > { %2115 = vmatprep.subr.mxu0 %v2073_v55  ;;  %v2312_v55 = vld [vmem:[#allocation13 + $0x1b0] sm:$0xff] }
 0x8b9   : > { %2116 = vmatpush1.msra.mxu0 %v2072_v57  ;;  %v2310_v57 = vld [vmem:[#allocation13 + $0x1a0] sm:$0xff] }
 0x8ba   : > { %2117 = vmatprep.subr.mxu0 %v2071_v59  ;;  %v2308_v59 = vld [vmem:[#allocation13 + $0x190] sm:$0xff] }
 0x8bb   : > { %2118 = vmatpush1.msra.mxu0 %v2070_v61  ;;  %v2306_v61 = vld [vmem:[#allocation13 + $0x180] sm:$0xff] }
 0x8bc   : > { %2119 = vmatprep.subr.mxu0 %v2069_v63  ;;  %v2304_v63 = vld [vmem:[#allocation13 + $0x170] sm:$0xff] }
 0x8bd   : > { %2120 = vmatpush1.msra.mxu0 %v2068_v2  ;;  %v2302_v2 = vld [vmem:[#allocation13 + $0x160] sm:$0xff] }
 0x8be   : > { %2121 = vmatprep.subr.mxu0 %v2067_v6  ;;  %v2300_v6 = vld [vmem:[#allocation13 + $0x150] sm:$0xff] }
 0x96a   : > { %v1919_v9 = vpop.f32.mrf.mxu0 }
 0x96b   : > { %v1920_v10 = vadd.f32 %v3642_v8, %v1919_v9  ;;  %v2066_v8 = vld [vmem:[#allocation10 + $0x150] sm:$0xff]  ;;  %v2184_v9 = vld [vmem:[#allocation11 + $0x158] sm:$0xff] }
 0x96c   : > { %v3928_v11 = vpop.f32.mrf.mxu0  ;;  %2122 = vmatpush1.msra.mxu0 %v2066_v8  ;;  %v2298_v8 = vld [vmem:[#allocation13 + $0x140] sm:$0xff] }
 0x96d   : > { %v1924_v12 = vmul.f32 0.044715, %v1920_v10  ;;  %v1923_v20 = vmul.f32 0.5, %v1920_v10  ;;  %v2183_v11 = vld [vmem:[#allocation11 + $0x150] sm:$0xff] }
 0x96f   : > { %v1925_v13 = vmul.f32 %v1924_v12, %v1920_v10  ;;  %v2064_v12 = vld [vmem:[#allocation10 + $0x140] sm:$0xff] }
 0x971   : > { %v1926_v14 = vmul.f32 %v1925_v13, %v1920_v10  ;;  %v2182_v13 = vld [vmem:[#allocation11 + $0x148] sm:$0xff] }
 0x973   : > { %v1927_v15 = vadd.f32 %v1926_v14, %v1920_v10  ;;  %v2065_v10 = vld [vmem:[#allocation10 + $0x148] sm:$0xff]  ;;  %v2063_v14 = vld [vmem:[#allocation10 + $0x138] sm:$0xff] }
 0x974   : > { %2123 = vmatprep.subr.mxu0 %v2065_v10  ;;  %v2296_v10 = vld [vmem:[#allocation13 + $0x130] sm:$0xff] }
 0x975   : > { %v1928_v17 = vmul.f32 0.7978846, %v1927_v15  ;;  %v2181_v15 = vld [vmem:[#allocation11 + $0x140] sm:$0xff]  ;;  %2124 = vmatpush1.msra.mxu0 %v2064_v12 }
 0x976   : > { %2125 = vmatprep.subr.mxu0 %v2063_v14  ;;  %v2294_v12 = vld [vmem:[#allocation13 + $0x120] sm:$0xff]  ;;  %v2292_v14 = vld [vmem:[#allocation13 + $0x110] sm:$0xff] }
 0x977   : > { %4269 = vtanh.f32 %v1928_v17  ;;  %v2062_v17 = vld [vmem:[#allocation10 + $0x130] sm:$0xff] }
 0x978   : > { %2126 = vmatpush1.msra.mxu0 %v2062_v17  ;;  %v2290_v17 = vld [vmem:[#allocation13 + $0x100] sm:$0xff] }
 0x984   : > { %v4270_v19 = vpop.eup %4269 }
 0x985   : > { %v1930_v21 = vadd.f32 1.0, %v4270_v19  ;;  %v2180_v19 = vld [vmem:[#allocation11 + $0x138] sm:$0xff] }
 0x987   : > { %v1931_v22 = vmul.f32 %v1930_v21, %v1923_v20  ;;  %v2061_v20 = vld [vmem:[#allocation10 + $0x128] sm:$0xff]  ;;  %v2179_v21 = vld [vmem:[#allocation11 + $0x130] sm:$0xff] }
 0x988   : > { %2127 = vmatprep.subr.mxu0 %v2061_v20  ;;  %v3646_v20 = vld [vmem:[%s5599_s1 + $0x2] sm:$0x3] }
 0x989   : > { %3962 = vmatmul.mubr.f32.vlgmr.msra.gmra.mxu1 %v1931_v22  ;;  %v2060_v22 = vld [vmem:[#allocation10 + $0x120] sm:$0xff] }
 0x98a   : > { %2282 = vmatprep.mubr.f32.mxu1 %v4741_v4  ;;  %2219 = vmatpush1.msra.mxu1 %v2203_v26  ;;  %v2176_v26 = vld [vmem:[#allocation11 + $0x118] sm:$0xff] }
 0x98b   : > { %2220 = vmatprep.subr.mxu1 %v2202_v28  ;;  %2128 = vmatpush1.msra.mxu0 %v2060_v22  ;;  %v2175_v28 = vld [vmem:[#allocation11 + $0x110] sm:$0xff]  ;;  %v2094_v22 = vrot.slane %v3646_v20, %v5190_v51 }
 0x98c   : > { %2221 = vmatpush1.msra.mxu1 %v2201_v18  ;;  %2129 = vmatprep.subr.mxu0 %v2059_v23  ;;  %v2174_v18 = vld [vmem:[#allocation11 + $0x108] sm:$0xff] }
 0x98d   : > { %2222 = vmatprep.subr.mxu1 %v2200_v37  ;;  %2130 = vmatpush1.msra.mxu0 %v2058_v25 }
 0x98e   : > { %2223 = vmatpush1.msra.mxu1 %v2199_v39  ;;  %2131 = vmatprep.subr.mxu0 %v2057_v27 }
 0x98f   : > { %2224 = vmatprep.subr.mxu1 %v2198_v41  ;;  %2132 = vmatpush1.msra.mxu0 %v2056_v29 }
 0x990   : > { %2225 = vmatpush1.msra.mxu1 %v2197_v43 }
 0x991   : > { %2226 = vmatprep.subr.mxu1 %v2196_v45 }
 0x992   : > { %2227 = vmatpush1.msra.mxu1 %v2195_v47  ;;  %v2320_v47 = vld [vmem:[#allocation13 + $0x1f0] sm:$0xff] }
 0x993   : > { %2228 = vmatprep.subr.mxu1 %v2194_v49  ;;  %v2317_v49 = vld [vmem:[#allocation13 + $0x1d8] sm:$0xff] }
 0xa49   : > { %v2021_v31 = vpop.f32.mrf.mxu1 }
 0xa4a   : > { %v2022_v32 = vadd.f32 %v3643_v30, %v2021_v31  ;;  %v2173_v30 = vld [vmem:[#allocation11 + $0x100] sm:$0xff]  ;;  %v2321_v31 = vld [vmem:[#allocation13 + $0x1f8] sm:$0xff] }
 0xa4b   : > { %v3963_v33 = vpop.f32.mrf.mxu1  ;;  %2335 = vmatprep.subr.mxu0 %v2321_v31 }
 0xa4c   : > { %v5288_v34 = vadd.f32 %v2022_v32, %v5261_v52  ;;  %v2193_v52 = vld [vmem:[#allocation11 + $0x1a0] sm:$0xff] }
 0xa4d   : > { %2229 = vmatpush1.msra.mxu1 %v2193_v52  ;;  %v2315_v52 = vld [vmem:[#allocation13 + $0x1c8] sm:$0xff] }
 0xa4e   : > { %2028 = vadd.xlane.f32.xlu0 %v5288_v34  ;;  %v2030_v35 = vmul.f32 %v5288_v34, %v5288_v34  ;;  %2230 = vmatprep.subr.mxu1 %v2192_v54  ;;  %v2313_v54 = vld [vmem:[#allocation13 + $0x1b8] sm:$0xff] }
 0xa4f   : > { %2231 = vmatpush1.msra.mxu1 %v2191_v56  ;;  %v2311_v56 = vld [vmem:[#allocation13 + $0x1a8] sm:$0xff] }
 0xa50   : > { %2031 = vadd.xlane.f32.xlu1 %v2030_v35  ;;  %2232 = vmatprep.subr.mxu1 %v2190_v58  ;;  %v2309_v58 = vld [vmem:[#allocation13 + $0x198] sm:$0xff] }
 0xa51   : > { %2233 = vmatpush1.msra.mxu1 %v2189_v60  ;;  %v2307_v60 = vld [vmem:[#allocation13 + $0x188] sm:$0xff] }
 0xa52   : > { %2234 = vmatprep.subr.mxu1 %v2188_v62  ;;  %v2305_v62 = vld [vmem:[#allocation13 + $0x178] sm:$0xff] }
 0xa53   : > { %2235 = vmatpush1.msra.mxu1 %v2187_v1  ;;  %v2303_v1 = vld [vmem:[#allocation13 + $0x168] sm:$0xff] }
 0xa54   : > { %2236 = vmatprep.subr.mxu1 %v2186_v3  ;;  %v2301_v3 = vld [vmem:[#allocation13 + $0x158] sm:$0xff] }
 0xa55   : > { %2237 = vmatpush1.msra.mxu1 %v2185_v7  ;;  %v2299_v7 = vld [vmem:[#allocation13 + $0x148] sm:$0xff] }
 0xa56   : > { %2238 = vmatprep.subr.mxu1 %v2184_v9  ;;  %v2297_v9 = vld [vmem:[#allocation13 + $0x138] sm:$0xff] }
 0xa57   : > { %2239 = vmatpush1.msra.mxu1 %v2183_v11  ;;  %v2295_v11 = vld [vmem:[#allocation13 + $0x128] sm:$0xff] }
 0xa58   : > { %2240 = vmatprep.subr.mxu1 %v2182_v13  ;;  %v2293_v13 = vld [vmem:[#allocation13 + $0x118] sm:$0xff] }
 0xa59   : > { %2241 = vmatpush1.msra.mxu1 %v2181_v15  ;;  %v2291_v15 = vld [vmem:[#allocation13 + $0x108] sm:$0xff] }
 0xa5a   : > { %2242 = vmatprep.subr.mxu1 %v2180_v19  ;;  %v3647_v19 = vld [vmem:[%s5598_s21 + $0x2] sm:$0x3] }
 0xa5b   : > { %2243 = vmatpush1.msra.mxu1 %v2179_v21  ;;  %v2211_v21 = vrot.slane %v3647_v19, %v5190_v51 }
 0xa5c   : > { %2244 = vmatprep.subr.mxu1 %v2178_v0 }
 0xa5d   : > { %2245 = vmatpush1.msra.mxu1 %v2177_v24 }
 0xa5e   : > { %2246 = vmatprep.subr.mxu1 %v2176_v26  ;;  %v3648_v26 = vld [vmem:[%s5600_s2 + $0x2] sm:$0x3] }
 0xa5f   : > { %2247 = vmatpush1.msra.mxu1 %v2175_v28  ;;  %v2328_v27 = vrot.slane %v3648_v26, %v5190_v51 }
 0xa60   : > { %2248 = vmatprep.subr.mxu1 %v2174_v18 }
 0xa61   : > { %2249 = vmatpush1.msra.mxu1 %v2173_v30 }
 0xa62   : > { %3964 = vmatprep.subr.mxu1 %v4741_v4 }
 0xad7   : > { %v2029_v32 = vpop.xlane.xlu0 %2028 }
 0xad8   : > { %v2033_v33 = vmul.f32 0.03125, %v2029_v32 }
 0xad9   : > { %v2032_v35 = vpop.xlane.xlu1 %2031 }
 0xada   : > { %v2035_v36 = vmul.f32 %v2033_v33, %v2033_v33  ;;  %v2034_v37 = vmul.f32 0.03125, %v2032_v35  ;;  %v2037_v40 = vsub.f32 %v5288_v34, %v2033_v33  ;;  %v2318_v34 = vld [vmem:[#allocation13 + $0x1e0] sm:$0xff] }
 0xadc   : > { %v2036_v38 = vsub.f32 %v2034_v37, %v2035_v36 }
 0xade   : > { %v2038_v39 = vadd.f32 1e-12, %v2036_v38 }
 0xae0   : > { %4271 = vrsqrt.f32 %v2038_v39 }
 0xaed   : > { %v4272_v41 = vpop.eup %4271 }
 0xaee   : > { %v2040_v43 = vmul.f32 %v4272_v41, %v2037_v40 }
 0xaf0   : > { %v2047_v45 = vmul.f32 %v3644_v42, %v2040_v43  ;;  %v2215_v43 = vrot.slane %v3647_v19, %v5215_v16  ;;  %v2728_v19 = vld [vmem:[#allocation14 + $0x148] sm:$0xff] }
 0xaf2   : > { %v5301_v46 = vadd.f32 %v3645_v44, %v2047_v45  ;;  %v2098_v45 = vrot.slane %v3646_v20, %v5215_v16  ;;  %v2743_v20 = vld [vmem:[#allocation14 + $0x1c0] sm:$0xff] }
 0xaf4   : > { %2166 = vmatmul.mubr.f32.vlgmr.msra.gmra.mxu0 %v5301_v46  ;;  %2283 = vmatmul.mubr.f32.vlgmr.msra.gmra.mxu1 %v5301_v46 }
 0xaf5   : > { %2336 = vmatpush1.msra.mxu0 %v2320_v47  ;;  %2399 = vmatprep.mubr.f32.mxu0 %v4741_v4 }
 0xaf6   : > { %2337 = vmatprep.subr.mxu0 %v2319_v48  ;;  %3966 = vmatprep.mubr.msk.f32.mxu1 %vm4742_vm0, %v4741_v4  ;;  %v2332_v48 = vrot.slane %v3648_v26, %v5215_v16  ;;  %v2724_v26 = vld [vmem:[#allocation14 + $0x128] sm:$0xff] }
 0xaf7   : > { %2338 = vmatpush1.msra.mxu0 %v2318_v34 }
 0xaf8   : > { %2339 = vmatprep.subr.mxu0 %v2317_v49 }
 0xaf9   : > { %2340 = vmatpush1.msra.mxu0 %v2316_v50 }
 0xafa   : > { %2341 = vmatprep.subr.mxu0 %v2315_v52 }
 0xafb   : > { %2342 = vmatpush1.msra.mxu0 %v2314_v53 }
 0xafc   : > { %2343 = vmatprep.subr.mxu0 %v2313_v54 }
 0xafd   : > { %2344 = vmatpush1.msra.mxu0 %v2312_v55 }
 0xafe   : > { %2345 = vmatprep.subr.mxu0 %v2311_v56 }
 0xaff   : > { %2346 = vmatpush1.msra.mxu0 %v2310_v57  ;;  %v4287_v57 = vld [vmem:[%s879_s30] ss:$0 sm:$0xff]  ;;  %s994_s30 = scalar_lea.vmem [#allocation23], %s5132_s23 }
 0xb00   : > { %2347 = vmatprep.subr.mxu0 %v2309_v58  ;;  %s3414_s9 = sshll.u32 %s994_s30, 4  ;;  %s3415_s9 = int_to_ptr.vmem [resolvable:$true] %s3414_s9 }
 0xb01   : > { %2348 = vmatpush1.msra.mxu0 %v2308_v59  ;;  %p4637_p1 = scmp.lt.s32.totalorder %s3415_s9, %s4635_s29 }
 0xb02   : > { %2349 = vmatprep.subr.mxu0 %v2307_v60 }
 0xb03   : > { %2350 = vmatpush1.msra.mxu0 %v2306_v61 }
 0xb04   : > { %2351 = vmatprep.subr.mxu0 %v2305_v62 }
 0xb05   : > { %2352 = vmatpush1.msra.mxu0 %v2304_v63 }
 0xb06   : > { %2353 = vmatprep.subr.mxu0 %v2303_v1 }
 0xb07   : > { %2354 = vmatpush1.msra.mxu0 %v2302_v2  ;;  %v2750_v2 = vld [vmem:[#allocation14 + $0x1f8] sm:$0xff] }
 0xb08   : > { %2355 = vmatprep.subr.mxu0 %v2301_v3  ;;  %v2734_v3 = vld [vmem:[#allocation14 + $0x178] sm:$0xff] }
 0xb09   : > { %2356 = vmatpush1.msra.mxu0 %v2300_v6  ;;  %v2749_v6 = vld [vmem:[#allocation14 + $0x1f0] sm:$0xff] }
 0xb0a   : > { %2357 = vmatprep.subr.mxu0 %v2299_v7  ;;  %v2733_v7 = vld [vmem:[#allocation14 + $0x170] sm:$0xff] }
 0xb0b   : > { %2358 = vmatpush1.msra.mxu0 %v2298_v8  ;;  %v2748_v8 = vld [vmem:[#allocation14 + $0x1e8] sm:$0xff] }
 0xb0c   : > { %2359 = vmatprep.subr.mxu0 %v2297_v9  ;;  %v2732_v9 = vld [vmem:[#allocation14 + $0x168] sm:$0xff] }
 0xb0d   : > { %2360 = vmatpush1.msra.mxu0 %v2296_v10  ;;  %v2747_v10 = vld [vmem:[#allocation14 + $0x1e0] sm:$0xff] }
 0xb0e   : > { %2361 = vmatprep.subr.mxu0 %v2295_v11  ;;  %v2731_v11 = vld [vmem:[#allocation14 + $0x160] sm:$0xff] }
 0xb0f   : > { %2362 = vmatpush1.msra.mxu0 %v2294_v12  ;;  %v2746_v12 = vld [vmem:[#allocation14 + $0x1d8] sm:$0xff] }
 0xb10   : > { %2363 = vmatprep.subr.mxu0 %v2293_v13  ;;  %v2730_v13 = vld [vmem:[#allocation14 + $0x158] sm:$0xff] }
 0xb11   : > { %2364 = vmatpush1.msra.mxu0 %v2292_v14  ;;  %v2745_v14 = vld [vmem:[#allocation14 + $0x1d0] sm:$0xff] }
 0xb12   : > { %2365 = vmatprep.subr.mxu0 %v2291_v15  ;;  %v2729_v15 = vld [vmem:[#allocation14 + $0x150] sm:$0xff] }
 0xb13   : > { %2366 = vmatpush1.msra.mxu0 %v2290_v17  ;;  %v2744_v17 = vld [vmem:[#allocation14 + $0x1c8] sm:$0xff] }
 0xb14   : > { %2400 = vmatmul.mubr.f32.vlgmr.msra.gmra.mxu0 %v5301_v46  ;;  %3753 = vmatprep.subr.mxu0 %v2750_v2 }
 0xb15   : > { %3754 = vmatpush3.msra.mxu0 %v2734_v3 }
 0xb16   : > { %3755 = vmatprep.subr.mxu0 %v2749_v6 }
 0xb17   : > { %3756 = vmatpush3.msra.mxu0 %v2733_v7 }
 0xb18   : > { %3757 = vmatprep.subr.mxu0 %v2748_v8 }
 0xb19   : > { %3758 = vmatpush3.msra.mxu0 %v2732_v9 }
 0xb1a   : > { %3759 = vmatprep.subr.mxu0 %v2747_v10 }
 0xb1b   : > { %3760 = vmatpush3.msra.mxu0 %v2731_v11 }
 0xb1c   : > { %3761 = vmatprep.subr.mxu0 %v2746_v12  ;;  %v3655_v12 = vld [vmem:[%s5501_s12 + $0x1] ss:$0 sm:$0xff] }
 0xb1d   : > { %3762 = vmatpush3.msra.mxu0 %v2730_v13 }
 0xb1e   : > { %3763 = vmatprep.subr.mxu0 %v2745_v14  ;;  %v3656_v14 = vld [vmem:[%s5502_s13 + $0x1] ss:$0 sm:$0xff] }
 0xb1f   : > { %3764 = vmatpush3.msra.mxu0 %v2729_v15 }
 0xb20   : > { %3765 = vmatprep.subr.mxu0 %v2744_v17 }
 0xb21   : > { %3766 = vmatpush3.msra.mxu0 %v2728_v19  ;;  %v2981_v19 = vld [vmem:[#allocation17 + $0xf8] sm:$0xff] }
 0xb22   : > { %3767 = vmatprep.subr.mxu0 %v2743_v20  ;;  %v2980_v20 = vld [vmem:[#allocation17 + $0xf0] sm:$0xff] }
 0xbb4   : > { %v2284_v0 = vpop.f32.mrf.mxu1  ;;  %v2167_v23 = vpop.f32.mrf.mxu0 }
 0xbb5   : > { %v2285_v24 = vadd.f32 %v2284_v0, %v2211_v21  ;;  %v2168_v25 = vadd.f32 %v2167_v23, %v2094_v22  ;;  %v2727_v21 = vld [vmem:[#allocation14 + $0x140] sm:$0xff]  ;;  %v2742_v22 = vld [vmem:[#allocation14 + $0x1b8] sm:$0xff]  ;;  %v2741_v23 = vld [vmem:[#allocation14 + $0x1b0] sm:$0xff] }
 0xbb6   : > { %v2169_v28 = vpop.f32.mrf.mxu0  ;;  %v2286_v30 = vpop.f32.mrf.mxu1  ;;  %v2726_v0 = vld [vmem:[#allocation14 + $0x138] sm:$0xff]  ;;  %3768 = vmatpush3.msra.mxu0 %v2727_v21  ;;  %v2979_v21 = vld [vmem:[#allocation17 + $0xe8] sm:$0xff] }
 0xbb7   : > { %3965 = vmatpush3.xpose.msra.mxu1 %v2285_v24  ;;  %v2170_v49 = vadd.f32 %v2169_v28, %v2098_v45  ;;  %3769 = vmatprep.subr.mxu0 %v2742_v22  ;;  %v2725_v24 = vld [vmem:[#allocation14 + $0x130] sm:$0xff]  ;;  %v2723_v28 = vld [vmem:[#allocation14 + $0x120] sm:$0xff]  ;;  %v3652_v45 = vld [vmem:[%s5500_s11 + $0x1] ss:$0 sm:$0xff] }
 0xbb8   : > { %3969 = vmatprep.subr.mxu1 %v4741_v4  ;;  %3770 = vmatpush3.msra.mxu0 %v2726_v0  ;;  %v2978_v22 = vld [vmem:[#allocation17 + $0xe0] sm:$0xff]  ;;  %v2977_v0 = vld [vmem:[#allocation17 + $0xd8] sm:$0xff] }
 0xbb9   : > { %3771 = vmatprep.subr.mxu0 %v2741_v23  ;;  %v2976_v23 = vld [vmem:[#allocation17 + $0xd0] sm:$0xff] }
 0xbba   : > { %3967 = vmatmul.mubr.f32.vlgmr.msra.gmra.mxu1 %v2168_v25  ;;  %v2740_v25 = vld [vmem:[#allocation14 + $0x1a8] sm:$0xff]  ;;  %3772 = vmatpush3.msra.mxu0 %v2725_v24 }
 0xbbb   : > { %3971 = vmatprep.mubr.msk.f32.mxu1 %vm4742_vm0, %v4741_v4  ;;  %3773 = vmatprep.subr.mxu0 %v2740_v25  ;;  %v2975_v24 = vld [vmem:[#allocation17 + $0xc8] sm:$0xff]  ;;  %v2974_v25 = vld [vmem:[#allocation17 + $0xc0] sm:$0xff] }
 0xbbc   : > { %3774 = vmatpush3.msra.mxu0 %v2724_v26  ;;  %v2973_v26 = vld [vmem:[#allocation17 + $0xb8] sm:$0xff] }
 0xbd4   : > { %v2401_v29 = vpop.f32.mrf.mxu0 }
 0xbd5   : > { %v2402_v18 = vadd.f32 %v2401_v29, %v2328_v27  ;;  %v2739_v27 = vld [vmem:[#allocation14 + $0x1a0] sm:$0xff]  ;;  %v2738_v29 = vld [vmem:[#allocation14 + $0x198] sm:$0xff] }
 0xbd6   : > { %v2403_v34 = vpop.f32.mrf.mxu0  ;;  %3775 = vmatprep.subr.mxu0 %v2739_v27  ;;  %v2972_v27 = vld [vmem:[#allocation17 + $0xb0] sm:$0xff] }
 0xbd7   : > { %3970 = vmatpush3.msra.mxu1 %v2402_v18  ;;  %v2404_v50 = vadd.f32 %v2403_v34, %v2332_v48  ;;  %v2722_v18 = vld [vmem:[#allocation14 + $0x118] sm:$0xff]  ;;  %3776 = vmatpush3.msra.mxu0 %v2723_v28  ;;  %v2971_v28 = vld [vmem:[#allocation17 + $0xa8] sm:$0xff] }
 0xbd8   : > { %3974 = vmatprep.subr.mxu1 %v4741_v4  ;;  %3777 = vmatprep.subr.mxu0 %v2738_v29  ;;  %v2970_v29 = vld [vmem:[#allocation17 + $0xa0] sm:$0xff] }
 0xbd9   : > { %3778 = vmatpush3.msra.mxu0 %v2722_v18  ;;  %v2969_v18 = vld [vmem:[#allocation17 + $0x98] sm:$0xff] }
 0xc7a   : > { %v2472_v31 = vpop.f32.mrf.mxu1 }
 0xc7b   : > { %v2476_v32 = vmul.f32 0.25, %v2472_v31  ;;  %v2721_v31 = vld [vmem:[#allocation14 + $0x110] sm:$0xff] }
 0xc7c   : > { %v3968_v33 = vpop.f32.mrf.mxu1 }
 0xc7d   : > { %v2477_v35 = vadd.f32 %v5210_v5, %v2476_v32  ;;  %v2287_v5 = vadd.f32 %v2286_v30, %v2215_v43  ;;  %v2737_v30 = vld [vmem:[#allocation14 + $0x190] sm:$0xff]  ;;  %v2736_v32 = vld [vmem:[#allocation14 + $0x188] sm:$0xff] }
 0xc7e   : > { %3779 = vmatprep.subr.mxu0 %v2737_v30  ;;  %v2720_v33 = vld [vmem:[#allocation14 + $0x108] sm:$0xff]  ;;  %v2876_v43 = vld [vmem:[#allocation16 + $0xf0] sm:$0xff] }
 0xc7f   : > { %v2478_v36 = vsel %vm1450_vm1, %v2477_v35, -inf  ;;  %3780 = vmatpush3.msra.mxu0 %v2721_v31  ;;  %v2968_v30 = vld [vmem:[#allocation17 + $0x90] sm:$0xff]  ;;  %v2967_v31 = vld [vmem:[#allocation17 + $0x88] sm:$0xff] }
 0xc80   : > { %2479 = vmax.xlane.f32.xlu0 %v2478_v36  ;;  %3781 = vmatprep.subr.mxu0 %v2736_v32  ;;  %v2966_v32 = vld [vmem:[#allocation17 + $0x80] sm:$0xff] }
 0xc81   : > { %3782 = vmatpush3.msra.mxu0 %v2720_v33  ;;  %v3658_v33 = vld [vmem:[%s5504_s15 + $0x1] ss:$0 sm:$0xff] }
 0xd09   : > { %v2480_v37 = vpop.xlane.xlu0 %2479 }
 0xd0a   : > { %v2481_v38 = vsub.f32 %v2477_v35, %v2480_v37 }
 0xd0c   : > { %v2482_v39 = vmul.f32 1.442695, %v2481_v38  ;;  %v2735_v38 = vld [vmem:[#allocation14 + $0x180] sm:$0xff] }
 0xd0d   : > { %3783 = vmatprep.subr.mxu0 %v2735_v38 }
 0xd0e   : > { %4273 = vpow2.f32 %v2482_v39  ;;  %v2719_v39 = vld [vmem:[#allocation14 + $0x100] sm:$0xff] }
 0xd0f   : > { %3784 = vmatpush3.msra.mxu0 %v2719_v39 }
 0xd10   : > { %4019 = vmatprep.subr.mxu0 %v4741_v4 }
 0xd1b   : > { %v4274_v40 = vpop.eup %4273 }
 0xd1c   : > { %v2484_v41 = vsel %vm1450_vm1, %v4274_v40, 0.0 }
 0xd1d   : > { %2485 = vadd.xlane.f32.xlu1 %v2484_v41 }
 0xda6   : > { %v2486_v42 = vpop.xlane.xlu1 %2485 }
 0xda7   : > { %4275 = vrcp.f32 %v2486_v42  ;;  %v2877_v42 = vld [vmem:[#allocation16 + $0xf8] sm:$0xff] }
 0xdb4   : > { %v4276_v44 = vpop.eup %4275 }
 0xdb5   : > { %v2488_v47 = vmul.f32 %v4276_v44, %v4274_v40 }
 0xdb7   : > { %3972 = vmatmul.mubr.msk.f32.vlgmr.msra.gmra.mxu1 %vm1450_vm1, %v2488_v47 }
 0xdb8   : > { %3975 = vmatpush3.xpose.msra.mxu1 %v2287_v5  ;;  %3976 = vmatprep.mubr.msk.f32.mxu1 %vm4742_vm0, %v4741_v4 }
 0xdb9   : > { %3979 = vmatprep.subr.mxu1 %v4741_v4 }
 0xdbb   : > { %3977 = vmatmul.mubr.f32.vlgmr.msra.gmra.mxu1 %v2170_v49 }
 0xdbc   : > { %3980 = vmatpush3.msra.mxu1 %v2404_v50  ;;  %3981 = vmatprep.mubr.msk.f32.mxu1 %vm4742_vm0, %v4741_v4  ;;  %v2875_v50 = vld [vmem:[#allocation16 + $0xe8] sm:$0xff] }
 0xdbd   : > { %3984 = vmatprep.subr.mxu1 %v4741_v4 }
 0xe77   : > { %v5338_v52 = vpop.f32.mrf.mxu1 }
 0xe79   : > { %v3973_v53 = vpop.f32.mrf.mxu1 }
 0xe7a   : > { %v2873_v53 = vld [vmem:[#allocation16 + $0xd8] sm:$0xff] }
 0xe7b   : > { %v2628_v54 = vpop.f32.mrf.mxu1 }
 0xe7c   : > { %v2632_v55 = vmul.f32 0.25, %v2628_v54  ;;  %v2872_v54 = vld [vmem:[#allocation16 + $0xd0] sm:$0xff] }
 0xe7d   : > { %v3978_v56 = vpop.f32.mrf.mxu1 }
 0xe7e   : > { %v2633_v58 = vadd.f32 %v4287_v57, %v2632_v55  ;;  %v2871_v55 = vld [vmem:[#allocation16 + $0xc8] sm:$0xff]  ;;  %v2869_v56 = vld [vmem:[#allocation16 + $0xb8] sm:$0xff]  ;;  %v2868_v57 = vld [vmem:[#allocation16 + $0xb0] sm:$0xff] }
 0xe80   : > { %v2634_v59 = vsel %vm1450_vm1, %v2633_v58, -inf }
 0xe81   : > { %2635 = vmax.xlane.f32.xlu0 %v2634_v59  ;;  %v2866_v59 = vld [vmem:[#allocation16 + $0xa0] sm:$0xff] }
 0xf0a   : > { %v2636_v60 = vpop.xlane.xlu0 %2635 }
 0xf0b   : > { %v2637_v61 = vsub.f32 %v2633_v58, %v2636_v60  ;;  %v2867_v58 = vld [vmem:[#allocation16 + $0xa8] sm:$0xff]  ;;  %v2865_v60 = vld [vmem:[#allocation16 + $0x98] sm:$0xff] }
 0xf0d   : > { %v2638_v62 = vmul.f32 1.442695, %v2637_v61  ;;  %v2864_v61 = vld [vmem:[#allocation16 + $0x90] sm:$0xff] }
 0xf0f   : > { %4277 = vpow2.f32 %v2638_v62  ;;  %v2863_v62 = vld [vmem:[#allocation16 + $0x88] sm:$0xff] }
 0xf1c   : > { %v5343_v63 = vpop.eup %4277 }
 0xf1d   : > { %v2640_v1 = vsel %vm1450_vm1, %v5343_v63, 0.0 }
 0xf1e   : > { %2641 = vadd.xlane.f32.xlu1 %v2640_v1 }
 0xfa7   : > { %v2642_v35 = vpop.xlane.xlu1 %2641 }
 0xfa8   : > { %4279 = vrcp.f32 %v2642_v35 }
 0xfb5   : > { %v4280_v36 = vpop.eup %4279 }
 0xfb6   : > { %v2644_v37 = vmul.f32 %v4280_v36, %v5343_v63  ;;  %v2862_v63 = vld [vmem:[#allocation16 + $0x80] sm:$0xff] }
 0xfb8   : > { %3982 = vmatmul.mubr.msk.f32.vlgmr.msra.gmra.mxu1 %vm1450_vm1, %v2644_v37 }
 0xfb9   : > { %4016 = vmatprep.mubr.msk.f32.mxu1 %vm4742_vm0, %v4741_v4  ;;  %3985 = vmatpush3.msra.mxu1 %v2877_v42 }
 0xfba   : > { %3986 = vmatprep.subr.mxu1 %v4741_v4 }
 0xfbb   : > { %3987 = vmatpush3.msra.mxu1 %v2876_v43 }
 0xfbc   : > { %3988 = vmatprep.subr.mxu1 %v4741_v4 }
 0xfbd   : > { %3989 = vmatpush3.msra.mxu1 %v2875_v50  ;;  %v3660_v50 = vld [vmem:[%s5506_s17 + $0x1] ss:$0 sm:$0xff] }
 0xfbe   : > { %3990 = vmatprep.subr.mxu1 %v4741_v4 }
0x1078   : > { %v2714_v40 = vpop.f32.mrf.mxu1 }
0x1079   : > { %2823 = vmatprep.mubr.f32.mxu0 %v2714_v40 }
0x107a   : > { %v3983_v41 = vpop.f32.mrf.mxu1  ;;  %2824 = vmatmul.mubr.f32.vlgmr.msra.gmra.mxu0 %v5338_v52  ;;  %v2874_v52 = vld [vmem:[#allocation16 + $0xe0] sm:$0xff] }
0x107b   : > { %4051 = vmatprep.mubr.msk.f32.mxu0 %vm4742_vm0, %v4741_v4  ;;  %3991 = vmatpush3.msra.mxu1 %v2874_v52 }
0x107c   : > { %3992 = vmatprep.subr.mxu1 %v4741_v4  ;;  %4020 = vmatpush3.msra.mxu0 %v2981_v19  ;;  %v3097_v19 = vld [vmem:[#allocation19 + $0x28] sm:$0xff] }
0x107d   : > { %3993 = vmatpush3.msra.mxu1 %v2873_v53  ;;  %4021 = vmatprep.subr.mxu0 %v4741_v4 }
0x107e   : > { %3994 = vmatprep.subr.mxu1 %v4741_v4  ;;  %4022 = vmatpush3.msra.mxu0 %v2980_v20  ;;  %v3096_v20 = vld [vmem:[#allocation19 + $0x20] sm:$0xff] }
0x107f   : > { %3995 = vmatpush3.msra.mxu1 %v2872_v54  ;;  %4023 = vmatprep.subr.mxu0 %v4741_v4 }
0x1080   : > { %3996 = vmatprep.subr.mxu1 %v4741_v4  ;;  %4024 = vmatpush3.msra.mxu0 %v2979_v21  ;;  %v3095_v21 = vld [vmem:[#allocation19 + $0x18] sm:$0xff] }
0x1081   : > { %3997 = vmatpush3.msra.mxu1 %v2871_v55  ;;  %4025 = vmatprep.subr.mxu0 %v4741_v4 }
0x1082   : > { %3998 = vmatprep.subr.mxu1 %v4741_v4  ;;  %4026 = vmatpush3.msra.mxu0 %v2978_v22  ;;  %v3094_v22 = vld [vmem:[#allocation19 + $0x10] sm:$0xff] }
0x1083   : > { %4027 = vmatprep.subr.mxu0 %v4741_v4 }
0x1084   : > { %4028 = vmatpush3.msra.mxu0 %v2977_v0  ;;  %v3093_v0 = vld [vmem:[#allocation19 + $0x8] sm:$0xff] }
0x1085   : > { %4029 = vmatprep.subr.mxu0 %v4741_v4 }
0x1086   : > { %4030 = vmatpush3.msra.mxu0 %v2976_v23  ;;  %v3092_v23 = vld [vmem:[#allocation19] sm:$0xff] }
0x1087   : > { %4031 = vmatprep.subr.mxu0 %v4741_v4 }
0x1088   : > { %4032 = vmatpush3.msra.mxu0 %v2975_v24  ;;  %v3240_v24 = vld [vmem:[#allocation20 + $0xf8] sm:$0xff] }
0x1089   : > { %4033 = vmatprep.subr.mxu0 %v4741_v4 }
0x108a   : > { %4034 = vmatpush3.msra.mxu0 %v2974_v25  ;;  %v3224_v25 = vld [vmem:[#allocation20 + $0x78] sm:$0xff] }
0x108b   : > { %4035 = vmatprep.subr.mxu0 %v4741_v4 }
0x108c   : > { %4036 = vmatpush3.msra.mxu0 %v2973_v26  ;;  %v3239_v26 = vld [vmem:[#allocation20 + $0xf0] sm:$0xff] }
0x108d   : > { %4037 = vmatprep.subr.mxu0 %v4741_v4 }
0x108e   : > { %4038 = vmatpush3.msra.mxu0 %v2972_v27  ;;  %v3223_v27 = vld [vmem:[#allocation20 + $0x70] sm:$0xff] }
0x108f   : > { %4039 = vmatprep.subr.mxu0 %v4741_v4 }
0x1090   : > { %4040 = vmatpush3.msra.mxu0 %v2971_v28  ;;  %v3238_v28 = vld [vmem:[#allocation20 + $0xe8] sm:$0xff] }
0x1091   : > { %4041 = vmatprep.subr.mxu0 %v4741_v4 }
0x1092   : > { %4042 = vmatpush3.msra.mxu0 %v2970_v29  ;;  %v3222_v29 = vld [vmem:[#allocation20 + $0x68] sm:$0xff] }
0x1093   : > { %4043 = vmatprep.subr.mxu0 %v4741_v4 }
0x1094   : > { %4044 = vmatpush3.msra.mxu0 %v2969_v18  ;;  %v3237_v18 = vld [vmem:[#allocation20 + $0xe0] sm:$0xff] }
0x1095   : > { %4045 = vmatprep.subr.mxu0 %v4741_v4 }
0x1096   : > { %4046 = vmatpush3.msra.mxu0 %v2968_v30  ;;  %v3221_v30 = vld [vmem:[#allocation20 + $0x60] sm:$0xff] }
0x1097   : > { %4047 = vmatprep.subr.mxu0 %v4741_v4 }
0x1098   : > { %4048 = vmatpush3.msra.mxu0 %v2967_v31  ;;  %v3236_v31 = vld [vmem:[#allocation20 + $0xd8] sm:$0xff] }
0x1099   : > { %4049 = vmatprep.subr.mxu0 %v4741_v4 }
0x109a   : > { %4050 = vmatpush3.msra.mxu0 %v2966_v32  ;;  %v3220_v32 = vld [vmem:[#allocation20 + $0x58] sm:$0xff] }
0x109b   : > { %3822 = vmatprep.subr.mxu0 %v3240_v24 }
0x113a   : > { %v3785_v44 = vpop.f32.mrf.mxu0 }
0x113c   : > { %v3786_v47 = vpop.f32.mrf.mxu0 }
0x113d   : > { %v3787_v5 = vadd.f32 %v3786_v47, %v3785_v44 }
0x113f   : > { %v2826_v48 = vadd.f32 %v3787_v5, %v3652_v45  ;;  %v3123_v5 = vld [vmem:[#allocation19 + $0xf8] sm:$0xff] }
0x1141   : > { %v2829_v34 = vadd.f32 %v2826_v48, %v5301_v46  ;;  %v2870_v46 = vld [vmem:[#allocation16 + $0xc0] sm:$0xff]  ;;  %v3122_v48 = vld [vmem:[#allocation19 + $0xf0] sm:$0xff] }
0x1142   : > { %3999 = vmatpush3.msra.mxu1 %v2870_v46 }
0x1143   : > { %2834 = vadd.xlane.f32.xlu0 %v2829_v34  ;;  %v2836_v49 = vmul.f32 %v2829_v34, %v2829_v34  ;;  %4000 = vmatprep.subr.mxu1 %v4741_v4 }
0x1144   : > { %4001 = vmatpush3.msra.mxu1 %v2869_v56  ;;  %v3119_v56 = vld [vmem:[#allocation19 + $0xd8] sm:$0xff] }
0x1145   : > { %2837 = vadd.xlane.f32.xlu1 %v2836_v49  ;;  %4002 = vmatprep.subr.mxu1 %v4741_v4  ;;  %v3120_v49 = vld [vmem:[#allocation19 + $0xe0] sm:$0xff] }
0x1146   : > { %4003 = vmatpush3.msra.mxu1 %v2868_v57  ;;  %v3118_v57 = vld [vmem:[#allocation19 + $0xd0] sm:$0xff] }
0x1147   : > { %4004 = vmatprep.subr.mxu1 %v4741_v4 }
0x1148   : > { %4005 = vmatpush3.msra.mxu1 %v2867_v58  ;;  %v3117_v58 = vld [vmem:[#allocation19 + $0xc8] sm:$0xff] }
0x1149   : > { %4006 = vmatprep.subr.mxu1 %v4741_v4 }
0x114a   : > { %4007 = vmatpush3.msra.mxu1 %v2866_v59  ;;  %v3116_v59 = vld [vmem:[#allocation19 + $0xc0] sm:$0xff] }
0x114b   : > { %4008 = vmatprep.subr.mxu1 %v4741_v4 }
0x114c   : > { %4009 = vmatpush3.msra.mxu1 %v2865_v60  ;;  %v3115_v60 = vld [vmem:[#allocation19 + $0xb8] sm:$0xff] }
0x114d   : > { %4010 = vmatprep.subr.mxu1 %v4741_v4 }
0x114e   : > { %4011 = vmatpush3.msra.mxu1 %v2864_v61  ;;  %v3114_v61 = vld [vmem:[#allocation19 + $0xb0] sm:$0xff] }
0x114f   : > { %4012 = vmatprep.subr.mxu1 %v4741_v4 }
0x1150   : > { %4013 = vmatpush3.msra.mxu1 %v2863_v62  ;;  %v3113_v62 = vld [vmem:[#allocation19 + $0xa8] sm:$0xff] }
0x1151   : > { %4014 = vmatprep.subr.mxu1 %v4741_v4 }
0x1152   : > { %4015 = vmatpush3.msra.mxu1 %v2862_v63  ;;  %v3112_v63 = vld [vmem:[#allocation19 + $0xa0] sm:$0xff] }
0x1153   : > { %3136 = vmatprep.subr.mxu1 %v3123_v5  ;;  %v3213_v5 = vld [vmem:[#allocation20 + $0x20] sm:$0xff] }
0x11cc   : > { %v2835_v1 = vpop.xlane.xlu0 %2834 }
0x11cd   : > { %v2839_v2 = vmul.f32 0.03125, %v2835_v1  ;;  %v3111_v1 = vld [vmem:[#allocation19 + $0x98] sm:$0xff] }
0x11ce   : > { %v2838_v3 = vpop.xlane.xlu1 %2837 }
0x11cf   : > { %v2841_v6 = vmul.f32 %v2839_v2, %v2839_v2  ;;  %v2840_v7 = vmul.f32 0.03125, %v2838_v3  ;;  %v2843_v10 = vsub.f32 %v2829_v34, %v2839_v2  ;;  %v3121_v34 = vld [vmem:[#allocation19 + $0xe8] sm:$0xff]  ;;  %v3110_v2 = vld [vmem:[#allocation19 + $0x90] sm:$0xff] }
0x11d0   : > { %v3109_v3 = vld [vmem:[#allocation19 + $0x88] sm:$0xff] }
0x11d1   : > { %v2842_v8 = vsub.f32 %v2840_v7, %v2841_v6  ;;  %v3108_v6 = vld [vmem:[#allocation19 + $0x80] sm:$0xff]  ;;  %v3107_v7 = vld [vmem:[#allocation19 + $0x78] sm:$0xff] }
0x11d3   : > { %v2844_v9 = vadd.f32 1e-12, %v2842_v8  ;;  %v3106_v8 = vld [vmem:[#allocation19 + $0x70] sm:$0xff] }
0x11d5   : > { %4281 = vrsqrt.f32 %v2844_v9  ;;  %v3105_v9 = vld [vmem:[#allocation19 + $0x68] sm:$0xff] }
0x11e2   : > { %v4282_v11 = vpop.eup %4281 }
0x11e3   : > { %v2846_v13 = vmul.f32 %v4282_v11, %v2843_v10  ;;  %v3104_v10 = vld [vmem:[#allocation19 + $0x60] sm:$0xff]  ;;  %v3103_v11 = vld [vmem:[#allocation19 + $0x58] sm:$0xff] }
0x11e5   : > { %v2853_v15 = vmul.f32 %v3655_v12, %v2846_v13  ;;  %v3102_v12 = vld [vmem:[#allocation19 + $0x50] sm:$0xff]  ;;  %v3101_v13 = vld [vmem:[#allocation19 + $0x48] sm:$0xff] }
0x11e7   : > { %v5380_v17 = vadd.f32 %v3656_v14, %v2853_v15  ;;  %v3100_v14 = vld [vmem:[#allocation19 + $0x40] sm:$0xff]  ;;  %v3099_v15 = vld [vmem:[#allocation19 + $0x38] sm:$0xff] }
0x11e9   : > { %4017 = vmatmul.mubr.f32.vlgmr.msra.gmra.mxu1 %v5380_v17 }
0x11ea   : > { %3200 = vmatprep.mubr.f32.mxu1 %v4741_v4  ;;  %3137 = vmatpush1.msra.mxu1 %v3122_v48 }
0x11eb   : > { %3138 = vmatprep.subr.mxu1 %v3121_v34 }
0x11ec   : > { %3139 = vmatpush1.msra.mxu1 %v3120_v49 }
0x11ed   : > { %3140 = vmatprep.subr.mxu1 %v3119_v56 }
0x11ee   : > { %3141 = vmatpush1.msra.mxu1 %v3118_v57  ;;  %v3663_v57 = vld [vmem:[%s5507_s18 + $0x1] ss:$0 sm:$0xff] }
0x11ef   : > { %3142 = vmatprep.subr.mxu1 %v3117_v58 }
0x11f0   : > { %3143 = vmatpush1.msra.mxu1 %v3116_v59  ;;  %v3664_v59 = vld [vmem:[%s5508_s19 + $0x1] ss:$0 sm:$0xff] }
0x11f1   : > { %3144 = vmatprep.subr.mxu1 %v3115_v60 }
0x11f2   : > { %3145 = vmatpush1.msra.mxu1 %v3114_v61 }
0x11f3   : > { %3146 = vmatprep.subr.mxu1 %v3113_v62  ;;  %v3228_v62 = vld [vmem:[#allocation20 + $0x98] sm:$0xff] }
0x11f4   : > { %3147 = vmatpush1.msra.mxu1 %v3112_v63  ;;  %v3212_v63 = vld [vmem:[#allocation20 + $0x18] sm:$0xff] }
0x11f5   : > { %3148 = vmatprep.subr.mxu1 %v3111_v1  ;;  %v3211_v1 = vld [vmem:[#allocation20 + $0x10] sm:$0xff] }
0x11f6   : > { %3149 = vmatpush1.msra.mxu1 %v3110_v2  ;;  %v3226_v2 = vld [vmem:[#allocation20 + $0x88] sm:$0xff] }
0x11f7   : > { %3150 = vmatprep.subr.mxu1 %v3109_v3  ;;  %v3210_v3 = vld [vmem:[#allocation20 + $0x8] sm:$0xff] }
0x11f8   : > { %3151 = vmatpush1.msra.mxu1 %v3108_v6  ;;  %v3225_v6 = vld [vmem:[#allocation20 + $0x80] sm:$0xff] }
0x11f9   : > { %3152 = vmatprep.subr.mxu1 %v3107_v7  ;;  %v3209_v7 = vld [vmem:[#allocation20] sm:$0xff] }
0x11fa   : > { %3153 = vmatpush1.msra.mxu1 %v3106_v8  ;;  %v3328_v8 = vld [vmem:[#allocation22 + $0x78] sm:$0xff] }
0x11fb   : > { %3154 = vmatprep.subr.mxu1 %v3105_v9  ;;  %v3327_v9 = vld [vmem:[#allocation22 + $0x70] sm:$0xff] }
0x11fc   : > { %3155 = vmatpush1.msra.mxu1 %v3104_v10  ;;  %v3326_v10 = vld [vmem:[#allocation22 + $0x68] sm:$0xff] }
0x11fd   : > { %3156 = vmatprep.subr.mxu1 %v3103_v11  ;;  %v3325_v11 = vld [vmem:[#allocation22 + $0x60] sm:$0xff] }
0x11fe   : > { %3157 = vmatpush1.msra.mxu1 %v3102_v12  ;;  %v3324_v12 = vld [vmem:[#allocation22 + $0x58] sm:$0xff] }
0x11ff   : > { %3158 = vmatprep.subr.mxu1 %v3101_v13  ;;  %v3323_v13 = vld [vmem:[#allocation22 + $0x50] sm:$0xff] }
0x1200   : > { %3159 = vmatpush1.msra.mxu1 %v3100_v14  ;;  %v3322_v14 = vld [vmem:[#allocation22 + $0x48] sm:$0xff] }
0x1201   : > { %3160 = vmatprep.subr.mxu1 %v3099_v15  ;;  %v3321_v15 = vld [vmem:[#allocation22 + $0x40] sm:$0xff] }
0x12a9   : > { %v2952_v35 = vpop.f32.mrf.mxu1 }
0x12aa   : > { %v2953_v36 = vadd.f32 %v3658_v33, %v2952_v35  ;;  %v3235_v33 = vld [vmem:[#allocation20 + $0xd0] sm:$0xff] }
0x12ab   : > { %v4018_v37 = vpop.f32.mrf.mxu1  ;;  %v3219_v35 = vld [vmem:[#allocation20 + $0x50] sm:$0xff] }
0x12ac   : > { %v2957_v38 = vmul.f32 0.044715, %v2953_v36  ;;  %v2956_v44 = vmul.f32 0.5, %v2953_v36  ;;  %v3218_v37 = vld [vmem:[#allocation20 + $0x48] sm:$0xff] }
0x12ae   : > { %v2958_v39 = vmul.f32 %v2957_v38, %v2953_v36  ;;  %v3233_v38 = vld [vmem:[#allocation20 + $0xc0] sm:$0xff] }
0x12b0   : > { %v2959_v40 = vmul.f32 %v2958_v39, %v2953_v36  ;;  %v3217_v39 = vld [vmem:[#allocation20 + $0x40] sm:$0xff] }
0x12b2   : > { %v2960_v41 = vadd.f32 %v2959_v40, %v2953_v36  ;;  %v3234_v36 = vld [vmem:[#allocation20 + $0xc8] sm:$0xff]  ;;  %v3232_v40 = vld [vmem:[#allocation20 + $0xb8] sm:$0xff] }
0x12b4   : > { %v2961_v42 = vmul.f32 0.7978846, %v2960_v41  ;;  %v3216_v41 = vld [vmem:[#allocation20 + $0x38] sm:$0xff] }
0x12b6   : > { %4283 = vtanh.f32 %v2961_v42  ;;  %v3231_v42 = vld [vmem:[#allocation20 + $0xb0] sm:$0xff] }
0x12c3   : > { %v4284_v43 = vpop.eup %4283 }
0x12c4   : > { %v2963_v45 = vadd.f32 1.0, %v4284_v43  ;;  %v3215_v43 = vld [vmem:[#allocation20 + $0x30] sm:$0xff] }
0x12c6   : > { %v2964_v47 = vmul.f32 %v2963_v45, %v2956_v44  ;;  %v3230_v44 = vld [vmem:[#allocation20 + $0xa8] sm:$0xff] }
0x12c7   : > { %v3214_v45 = vld [vmem:[#allocation20 + $0x28] sm:$0xff] }
0x12c8   : > { %4052 = vmatmul.mubr.f32.vlgmr.msra.gmra.mxu0 %v2964_v47  ;;  %v3229_v47 = vld [vmem:[#allocation20 + $0xa0] sm:$0xff] }
0x12c9   : > { %3823 = vmatpush3.msra.mxu0 %v3224_v25 }
0x12ca   : > { %3824 = vmatprep.subr.mxu0 %v3239_v26 }
0x12cb   : > { %3825 = vmatpush3.msra.mxu0 %v3223_v27 }
0x12cc   : > { %3826 = vmatprep.subr.mxu0 %v3238_v28 }
0x12cd   : > { %3827 = vmatpush3.msra.mxu0 %v3222_v29  ;;  %v3317_v29 = vld [vmem:[#allocation22 + $0x20] sm:$0xff] }
0x12ce   : > { %3828 = vmatprep.subr.mxu0 %v3237_v18  ;;  %v3316_v18 = vld [vmem:[#allocation22 + $0x18] sm:$0xff] }
0x12cf   : > { %3829 = vmatpush3.msra.mxu0 %v3221_v30  ;;  %v3315_v30 = vld [vmem:[#allocation22 + $0x10] sm:$0xff] }
0x12d0   : > { %3830 = vmatprep.subr.mxu0 %v3236_v31 }
0x12d1   : > { %3831 = vmatpush3.msra.mxu0 %v3220_v32  ;;  %v3241_v32 = vld [vmem:[%s5602_s0] sm:$0x1]  ;;  %s4630_s0 = scalar_lea.vmem %s3415_s9, 16 }
0x12d2   : > { %3832 = vmatprep.subr.mxu0 %v3235_v33  ;;  %p4631_p10 = scmp.ne.s32.totalorder %s3415_s9, %s4630_s0  ;;  %p4638_p3 = scmp.lt.s32.totalorder %s4636_s7, %s4630_s0 }
0x12d3   : > { %3833 = vmatpush3.msra.mxu0 %v3219_v35 }
0x12d4   : > { %3834 = vmatprep.subr.mxu0 %v3234_v36  ;;  %p4632_p11 = pnand %p4631_p10, %p5605_p7  ;;  %p4639_p4 = por %p4638_p3, %p4637_p1 }
0x12d5   : > { %3835 = vmatpush3.msra.mxu0 %v3218_v37 }
0x12d6   : > { %3836 = vmatprep.subr.mxu0 %v3233_v38  ;;  %v3329_v38 = vld [vmem:[%s5603_s24] sm:$0x1]  ;;  %p4633_p0 = pneg %p4632_p11 }
0x12d7   : > { %3837 = vmatpush3.msra.mxu0 %v3217_v39 }
0x12d8   : > { %3838 = vmatprep.subr.mxu0 %v3232_v40  ;;  %p4640_p2 = pnand %p4639_p4, %p4633_p0 }
0x12d9   : > { %3839 = vmatpush3.msra.mxu0 %v3216_v41 }
0x12da   : > { %3840 = vmatprep.subr.mxu0 %v3231_v42 }
0x12db   : > { %3841 = vmatpush3.msra.mxu0 %v3215_v43 }
0x12dc   : > { %3842 = vmatprep.subr.mxu0 %v3230_v44 }
0x12dd   : > { %3843 = vmatpush3.msra.mxu0 %v3214_v45 }
0x12de   : > { %3844 = vmatprep.subr.mxu0 %v3229_v47 }
0x12df   : > { %3845 = vmatpush3.msra.mxu0 %v3213_v5 }
0x12e0   : > { %3846 = vmatprep.subr.mxu0 %v3228_v62 }
0x12e1   : > { %3847 = vmatpush3.msra.mxu0 %v3212_v63 }
0x1388   : > { %v3056_v52 = vpop.f32.mrf.mxu0 }
0x1389   : > { %v3057_v53 = vadd.f32 %v3660_v50, %v3056_v52 }
0x138a   : > { %v4053_v54 = vpop.f32.mrf.mxu0 }
0x138b   : > { %v5406_v55 = vadd.f32 %v3057_v53, %v5380_v17  ;;  %v3098_v17 = vld [vmem:[#allocation19 + $0x30] sm:$0xff] }
0x138c   : > { %3161 = vmatpush1.msra.mxu1 %v3098_v17  ;;  %v3320_v17 = vld [vmem:[#allocation22 + $0x38] sm:$0xff] }
0x138d   : > { %3065 = vadd.xlane.f32.xlu0 %v5406_v55  ;;  %v3067_v46 = vmul.f32 %v5406_v55, %v5406_v55  ;;  %3162 = vmatprep.subr.mxu1 %v3097_v19  ;;  %v3319_v19 = vld [vmem:[#allocation22 + $0x30] sm:$0xff] }
0x138e   : > { %3163 = vmatpush1.msra.mxu1 %v3096_v20  ;;  %v3318_v20 = vld [vmem:[#allocation22 + $0x28] sm:$0xff] }
0x138f   : > { %3068 = vadd.xlane.f32.xlu1 %v3067_v46  ;;  %3164 = vmatprep.subr.mxu1 %v3095_v21  ;;  %v3124_v21 = vld [vmem:[%s5601_s22] sm:$0x3]  ;;  %s5604_s22 = sld [smem:[#allocation54_spill]] }
0x1390   : > { %3165 = vmatpush1.msra.mxu1 %v3094_v22  ;;  %v3129_v22 = vrot.slane %v3124_v21, %v5190_v51  ;;  %v3314_v51 = vld [vmem:[#allocation22 + $0x8] sm:$0xff] }
0x1391   : > { %3166 = vmatprep.subr.mxu1 %v3093_v0  ;;  %v3133_v0 = vrot.slane %v3124_v21, %v5215_v16  ;;  %v3313_v16 = vld [vmem:[#allocation22] sm:$0xff] }
0x1392   : > { %3167 = vmatpush1.msra.mxu1 %v3092_v23 }
0x1393   : > { %4054 = vmatprep.subr.mxu1 %v4741_v4 }
0x1395   : > { %s5452_s25 = scalar_lea.hbm %s5604_s22, %s3665_s10 }
0x1416   : > { %v3066_v48 = vpop.xlane.xlu0 %3065 }
0x1417   : > { %v3070_v34 = vmul.f32 0.03125, %v3066_v48 }
0x1418   : > { %v3069_v49 = vpop.xlane.xlu1 %3068 }
0x1419   : > { %v3072_v50 = vmul.f32 %v3070_v34, %v3070_v34  ;;  %v3071_v52 = vmul.f32 0.03125, %v3069_v49  ;;  %v3074_v46 = vsub.f32 %v5406_v55, %v3070_v34  ;;  %v3227_v55 = vld [vmem:[#allocation20 + $0x90] sm:$0xff] }
0x141a   : > { %3848 = vmatprep.subr.mxu0 %v3227_v55 }
0x141b   : > { %v3073_v53 = vsub.f32 %v3071_v52, %v3072_v50  ;;  %3849 = vmatpush3.msra.mxu0 %v3211_v1 }
0x141c   : > { %3850 = vmatprep.subr.mxu0 %v3226_v2 }
0x141d   : > { %v3075_v54 = vadd.f32 1e-12, %v3073_v53  ;;  %3851 = vmatpush3.msra.mxu0 %v3210_v3 }
0x141e   : > { %3852 = vmatprep.subr.mxu0 %v3225_v6 }
0x141f   : > { %4285 = vrsqrt.f32 %v3075_v54  ;;  %3853 = vmatpush3.msra.mxu0 %v3209_v7 }
0x142c   : > { %v4286_v56 = vpop.eup %4285 }
0x142d   : > { %v3077_v58 = vmul.f32 %v4286_v56, %v3074_v46 }
0x142f   : > { %v3084_v60 = vmul.f32 %v3663_v57, %v3077_v58 }
0x1431   : > { %v3091_v61 = vadd.f32 %v3664_v59, %v3084_v60 }
0x1433   : > { %3201 = vmatmul.mubr.f32.vlgmr.msra.gmra.mxu1 %v3091_v61 }
0x1434   : > { %4086 = vmatprep.mubr.msk.f32.mxu1 %vm4742_vm0, %v4741_v4  ;;  %4055 = vmatpush3.msra.mxu1 %v3328_v8 }
0x1435   : > { %4056 = vmatprep.subr.mxu1 %v4741_v4 }
0x1436   : > { %4057 = vmatpush3.msra.mxu1 %v3327_v9 }
0x1437   : > { %4058 = vmatprep.subr.mxu1 %v4741_v4 }
0x1438   : > { %4059 = vmatpush3.msra.mxu1 %v3326_v10 }
0x1439   : > { %4060 = vmatprep.subr.mxu1 %v4741_v4 }
0x143a   : > { %4061 = vmatpush3.msra.mxu1 %v3325_v11 }
0x143b   : > { %4062 = vmatprep.subr.mxu1 %v4741_v4 }
0x143c   : > { %4063 = vmatpush3.msra.mxu1 %v3324_v12 }
0x143d   : > { %4064 = vmatprep.subr.mxu1 %v4741_v4 }
0x143e   : > { %4065 = vmatpush3.msra.mxu1 %v3323_v13 }
0x143f   : > { %4066 = vmatprep.subr.mxu1 %v4741_v4 }
0x1440   : > { %4067 = vmatpush3.msra.mxu1 %v3322_v14 }
0x1441   : > { %4068 = vmatprep.subr.mxu1 %v4741_v4 }
0x1442   : > { %4069 = vmatpush3.msra.mxu1 %v3321_v15 }
0x1443   : > { %4070 = vmatprep.subr.mxu1 %v4741_v4 }
0x1444   : > { %4071 = vmatpush3.msra.mxu1 %v3320_v17 }
0x1445   : > { %4072 = vmatprep.subr.mxu1 %v4741_v4 }
0x1446   : > { %4073 = vmatpush3.msra.mxu1 %v3319_v19 }
0x1447   : > { %4074 = vmatprep.subr.mxu1 %v4741_v4 }
0x1448   : > { %4075 = vmatpush3.msra.mxu1 %v3318_v20 }
0x1449   : > { %4076 = vmatprep.subr.mxu1 %v4741_v4 }
0x144a   : > { %4077 = vmatpush3.msra.mxu1 %v3317_v29 }
0x144b   : > { %4078 = vmatprep.subr.mxu1 %v4741_v4 }
0x144c   : > { %4079 = vmatpush3.msra.mxu1 %v3316_v18 }
0x144d   : > { %4080 = vmatprep.subr.mxu1 %v4741_v4 }
0x144e   : > { %4081 = vmatpush3.msra.mxu1 %v3315_v30 }
0x144f   : > { %4082 = vmatprep.subr.mxu1 %v4741_v4 }
0x1450   : > { %4083 = vmatpush3.msra.mxu1 %v3314_v51 }
0x1451   : > { %4084 = vmatprep.subr.mxu1 %v4741_v4 }
0x1452   : > { %4085 = vmatpush3.msra.mxu1 %v3313_v16 }
0x14f3   : > { %v3202_v23 = vpop.f32.mrf.mxu1 }
0x14f4   : > { %v3203_v24 = vadd.f32 %v3202_v23, %v3129_v22 }
0x14f5   : > { %v3204_v25 = vpop.f32.mrf.mxu1 }
0x14f6   : > { %v3205_v26 = vadd.f32 %v3204_v25, %v3133_v0  ;;  %v3207_v28 = vmax.f32 %v3203_v24, 0.0 }
0x14f8   : > { %v3208_v27 = vmax.f32 %v3205_v26, 0.0 }
0x14fa   : > { %3306 = vmatprep.mubr.f32.mxu0 %v3208_v27 }
0x14fb   : > { %3307 = vmatmul.mubr.f32.vlgmr.msra.gmra.mxu0 %v3207_v28 }
0x15bb   : > { %v3854_v31 = vpop.f32.mrf.mxu0 }
0x15bd   : > { %v3855_v33 = vpop.f32.mrf.mxu0 }
0x15be   : > { %v3856_v35 = vadd.f32 %v3855_v33, %v3854_v31 }
0x15c0   : > { %v3309_v36 = vadd.f32 %v3856_v35, %v3241_v32 }
0x15c2   : > { %v3312_v37 = vmax.f32 %v3309_v36, 0.0 }
0x15c4   : > { %4087 = vmatmul.mubr.f32.vlgmr.msra.gmra.mxu1 %v3312_v37 }
0x1684   : > { %v3396_v4 = vpop.f32.mrf.mxu1 }
0x1685   : > { %v3397_v39 = vadd.f32 %v3396_v4, %v3329_v38 }
0x1686   : > { %v4088_v40 = vpop.f32.mrf.mxu1 }
0x1687   : > { %3400 = vst [vmem:[%s994_s30] sm:$0x1] %v3397_v39 }
0x1688   : > { %4643 = shalt.err (!%p4640_p2)
}
0x1689   : > { %s4644_s24 = scalar_lea.hbm %s5452_s25, 16  ;;  %s4648_s30 = scalar_lea.hbm %s5604_s22, 32 }
0x168a   : > { %p4645_p8 = scmp.ne.s32.totalorder %s5452_s25, %s4644_s24  ;;  %p4649_p13 = scmp.lt.s32.totalorder %s5452_s25, %s5604_s22 }
0x168b   : > { %p4650_p5 = scmp.lt.s32.totalorder %s4648_s30, %s4644_s24 }
0x168c   : > { %p4646_p9 = pnand %p4645_p8, %p5605_p7 }
0x168d   : > { %p4651_p6 = por %p4650_p5, %p4649_p13 }
0x168e   : > { %p4647_p12 = pneg %p4646_p9 }
0x1690   : > { %p4652_p10 = pnand %p4651_p6, %p4647_p12 }
0x1692   : > { %4655 = shalt.err (!%p4652_p10)
}
0x1693   : > { %4137 = dma.vmem_to_hbm [thread:$0]  (%p5605_p7), %s3415_s9, 16, %s5452_s25, %s3402_s16  }
0x1694 PF: > { %s3426_s0 = sand.u32 1, %s4710_s27   ;;  %p5606_p11 = scmp.ne.s32.totalorder %s5579_s4, 0 }
0x1695   : > { %p5607_p0 = scmp.ge.s32.totalorder %s4722_s28, 2  ;;  %s3427_s8 = scalar_lea.sflag [#allocation4], %s3426_s0 }
0x1697   : > { %p4181_p1 = pnand %p5607_p0, %p5606_p11 }
0x1699   : > { %p4182_p3 = pneg %p4181_p1 }
0x169b   : > { %4705 = dma.done.wait (%p4182_p3), %s3427_s8, 16  }
0x169c   : > { %4707 = vsyncadd (%p4182_p3), %s3427_s8, 4294967280  ;;  %s5608_s29 = sld [smem:[#allocation33_spill]]  ;;  %p47_p4 = scmp.ge.s32.totalorder %s5037_s6, 4  }
0x169d   : > { %s5609_s7 = sld [smem:[#allocation34_spill]]  ;;  %s5610_s27 = smov %s4714_s3 }
0x169e   : > { %s5612_s28 = smov %s5037_s6  ;;  %49 = sbr.rel (!%p47_p4) target bundleno = 33 (0x21), region = 242 }
0x16a2   : > { %s5611_s3 = smov %s5608_s29 }
0x16a3   :  { %3431 = vsyncpa [#allocation3], 1 }
0x16a4   :  { %3433 = vsyncpa [#allocation3 + $0x1], 1 }
0x16a5   :  { %3434 = vsyncpa [#allocation6], 1 }
0x16a6   :  { %3436 = vsyncpa [#allocation6 + $0x1], 1 }
0x16a7   :  { %3437 = vsyncpa [#allocation9], 1 }
0x16a8   :  { %3438 = vsyncpa [#allocation12], 1 }
0x16a9   :  { %3439 = vsyncpa [#allocation15], 1 }
0x16aa   :  { %3440 = vsyncpa [#allocation18], 1 }
0x16ab   :  { %3441 = vsyncpa [#allocation21], 1 }
0x16ac   :  { %3442 = vsyncpa [#allocation4], 1 }
0x16ad   :  { %3444 = vsyncpa [#allocation4 + $0x1], 1 }

</bundles_post_ra>
